<compile_context>
chip_gen: v6e
topology: v6e:2x2x1
jax: 0.10.0
libtpu: 0.0.40
codegen_flags: <defaults>
</compile_context>

<pallas_src>
import functools

import jax
import jax.numpy as jnp
from jax import lax
from jax.experimental import pallas as pl
from jax.experimental.pallas import tpu as pltpu

# ---- model hyper-parameters (small, consistent with the forward pass) -------
IN_CH = 3            # input channels
STEM_CH = 16         # stem conv channels
HIDDEN = 32          # real transformer hidden dim D
FFN = 2 * HIDDEN     # real FFN hidden dim (64)
NUM_QUERIES = 8      # decoder queries Q
NUM_CLASSES = 4      # classes (focal-loss style: sigmoid, no background)
NUM_TOP = 4          # postprocessor top-k

DP = 128                          # lane-dense padded width inside the kernel
CONV2_K = STEM_CH * 9             # 144 = im2col K of the second stem conv
SLAB_ROWS = CONV2_K               # weight-slab row count (max K of any matmul)

# Packed weight/bias slab column layout.  Every sub-block starts on a 128-lane
# tile boundary so every in-kernel slice is a relayout-free view.
_SLAB = [
    ("conv2",   DP),        # col2(144)  -> tokens(128), relu
    ("enc_qkv", 3 * DP),    # packed Q|K|V projection (1/sqrt(D) folded into Q)
    ("enc_o",   DP),
    ("enc_f1",  DP),
    ("enc_f2",  DP),
    ("dec_kv",  2 * DP),    # packed K|V projection of the encoder memory
    ("dec_o",   DP),
    ("dec_f1",  DP),
    ("dec_f2",  DP),
    ("head",    DP),        # packed cls|box head, zero padded to 128 lanes
]
_OFFS = {}
_c = 0
for _name, _n in _SLAB:
    _OFFS[_name] = (_c, _c + _n)
    _c += _n
W_COLS = _c                        # 1664


# =============================================================================
# Pallas kernel 1: tiled matmul + bias (+ relu) for the conv1 stem (im2col GEMM)
# =============================================================================
def _matmul_bias_kernel(act, x_ref, w_ref, b_ref, o_ref):
    """o = act(x @ w + b) for one (tm, K) x (K, N) tile pair (bf16 in, f32 acc)."""
    y = jnp.dot(x_ref[...], w_ref[...], preferred_element_type=jnp.float32)
    y = y + b_ref[...]
    if act == "relu":
        y = jnp.maximum(y, 0.0)
    o_ref[...] = y.astype(o_ref.dtype)


def linear(x, w, b, act=None, tm=1024):
    """Pallas tiled matmul + bias (+ optional relu). x:[M,K] f32, w:[K,N] f32.
    N should be a multiple of 128 (caller pads) so stores are lane-dense."""
    M, K = x.shape
    K2, N = w.shape
    assert K == K2

    # Pad K up to a multiple of 8 with zeros (free, aligns loads; 27 -> 32).
    Kp = ((K + 7) // 8) * 8
    if Kp != K:
        x = jnp.pad(x, ((0, 0), (0, Kp - K)))
        w = jnp.pad(w, ((0, Kp - K), (0, 0)))

    # Row tiling: tm <= 1024, multiple of 8; pad M so the grid divides evenly.
    tm = min(tm, ((M + 7) // 8) * 8)
    Mp = ((M + tm - 1) // tm) * tm
    if Mp != M:
        x = jnp.pad(x, ((0, Mp - M), (0, 0)))

    y = pl.pallas_call(
        functools.partial(_matmul_bias_kernel, act),
        out_shape=jax.ShapeDtypeStruct((Mp, N), jnp.float32),
        grid=(Mp // tm,),
        in_specs=[
            pl.BlockSpec((tm, Kp), lambda i: (i, 0)),
            pl.BlockSpec((Kp, N), lambda i: (0, 0)),
            pl.BlockSpec((1, N), lambda i: (0, 0)),
        ],
        out_specs=pl.BlockSpec((tm, N), lambda i: (i, 0)),
        compiler_params=pltpu.CompilerParams(
            dimension_semantics=("parallel",),
            vmem_limit_bytes=32 * 1024 * 1024),
    )(x.astype(jnp.bfloat16), w.astype(jnp.bfloat16),
      b.reshape(1, N).astype(jnp.float32))
    return y[:M]


# =============================================================================
# Pallas kernel 2: fused conv2-GEMM + encoder + decoder + heads (one launch)
# =============================================================================
def _fused_detr_kernel(bb, S, Q, col_ref, w_ref, b_ref, c_ref, out_ref):
    """Fused conv2 GEMM + encoder layer + decoder layer + packed cls|box head.

    col_ref : (bb*S, CONV2_K) bf16   im2col patches of the second stem conv
    w_ref   : (SLAB_ROWS, W_COLS) bf16   all weights, 128-lane-aligned blocks
    b_ref   : (1, W_COLS) f32            all biases, same column layout
    c_ref   : (S, 4*DP) f32   [pos@Wq | pos@Wk | dec_q_precomp | query_embed]
    out_ref : (bb*Q, DP) f32  lane-dense packed cls|box head slab
    """
    f32, bf16 = jnp.float32, jnp.bfloat16

    def mm(x_b, name, act=None, rows=DP):
        # bf16 MXU operands, f32 accumulation, f32 bias add on the VPU.
        c0, c1 = _OFFS[name]
        y = jnp.dot(x_b, w_ref[0:rows, c0:c1],
                    preferred_element_type=f32) + b_ref[:, c0:c1]
        if act == "relu":
            y = jnp.maximum(y, 0.0)
        return y

    def sdpa(q_b, k_b, v_b):
        # Single-head attention; 1/sqrt(D) already folded into q_b's weights.
        s = lax.dot_general(q_b, k_b, (((1,), (1,)), ((), ())),
                            preferred_element_type=f32)
        m = jnp.max(s, axis=-1, keepdims=True)
        p = jnp.exp(s - m)
        l = jnp.sum(p, axis=-1, keepdims=True)
        o = jnp.dot(p.astype(bf16), v_b, preferred_element_type=f32)
        return o * pl.reciprocal(l, approx=True)

    pos_q = c_ref[:, 0:DP]                           # (S, DP) f32
    pos_k = c_ref[:, DP:2 * DP]                      # (S, DP) f32
    dq_b = c_ref[0:Q, 2 * DP:3 * DP].astype(bf16)    # (Q, DP) precomputed
    qry = c_ref[0:Q, 3 * DP:4 * DP]                  # (Q, DP) f32

    # ---- conv2 as GEMM: tokens stay VMEM-resident ---------------------------
    tok = mm(col_ref[...], "conv2", act="relu", rows=SLAB_ROWS)  # (bb*S, DP)

    # ---- encoder layer: packed Q|K|V proj, per-image SDPA, O proj, FFN ------
    qkv = mm(tok.astype(bf16), "enc_qkv")                        # (bb*S, 3*DP)
    enc_att = []
    for i in range(bb):                                          # static, bb<=2
        r0 = i * S
        q = (qkv[r0:r0 + S, 0:DP] + pos_q).astype(bf16)
        k = (qkv[r0:r0 + S, DP:2 * DP] + pos_k).astype(bf16)
        v = qkv[r0:r0 + S, 2 * DP:3 * DP].astype(bf16)
        enc_att.append(sdpa(q, k, v))
    att = enc_att[0] if bb == 1 else jnp.concatenate(enc_att, axis=0)
    src = tok + mm(att.astype(bf16), "enc_o")
    src = src + mm(mm(src.astype(bf16), "enc_f1", act="relu").astype(bf16),
                   "enc_f2")

    # ---- decoder layer: constant precomputed queries, packed K|V, FFN -------
    kv = mm(src.astype(bf16), "dec_kv")                          # (bb*S, 2*DP)
    dec_att = []
    for i in range(bb):
        r0 = i * S
        dk = kv[r0:r0 + S, 0:DP].astype(bf16)
        dv = kv[r0:r0 + S, DP:2 * DP].astype(bf16)
        dec_att.append(sdpa(dq_b, dk, dv))
    datt = dec_att[0] if bb == 1 else jnp.concatenate(dec_att, axis=0)
    qry_t = qry if bb == 1 else jnp.concatenate([qry] * bb, axis=0)
    tgt = qry_t + mm(datt.astype(bf16), "dec_o")
    tgt = tgt + mm(mm(tgt.astype(bf16), "dec_f1", act="relu").astype(bf16),
                   "dec_f2")

    # ---- packed cls|box head -> lane-dense 128-wide output slab -------------
    out_ref[...] = mm(tgt.astype(bf16), "head").astype(out_ref.dtype)


def _grid_blocks(batch):
    """2-way parallel batch axis only on 2-TensorCore chips (v7x); 1 otherwise
    (on v5e/v6e a batch grid axis is pure serial pipeline overhead)."""
    try:
        kind = jax.devices()[0].device_kind.lower()
    except Exception:  # pragma: no cover
        kind = ""
    if "v7" in kind and batch >= 2 and batch % 2 == 0:
        return 2
    return 1


def fused_transformer(prep, col2, batch, seq):
    """col2:[B*S, CONV2_K] f32 -> packed head slab [B, Q, DP] (cls|box|zeros)."""
    Q = NUM_QUERIES
    nb = _grid_blocks(batch)
    bb = batch // nb
    out = pl.pallas_call(
        functools.partial(_fused_detr_kernel, bb, seq, Q),
        out_shape=jax.ShapeDtypeStruct((batch * Q, DP), jnp.float32),
        grid=(nb,),
        in_specs=[
            pl.BlockSpec((bb * seq, CONV2_K), lambda b: (b, 0)),
            pl.BlockSpec(prep["w_slab"].shape, lambda b: (0, 0)),
            pl.BlockSpec(prep["b_slab"].shape, lambda b: (0, 0)),
            pl.BlockSpec(prep["const"].shape, lambda b: (0, 0)),
        ],
        out_specs=pl.BlockSpec((bb * Q, DP), lambda b: (b, 0)),
        compiler_params=pltpu.CompilerParams(
            dimension_semantics=("parallel",),
            # Well inside v7x's 64 MiB physical VMEM per TC (and v5e/v6e's 128).
            vmem_limit_bytes=32 * 1024 * 1024),
    )(col2.astype(jnp.bfloat16), prep["w_slab"], prep["b_slab"], prep["const"])
    return out.reshape(batch, Q, DP)


# =============================================================================
# Plain-JAX glue: im2col, parameters, constant folding/packing, postprocessor
# =============================================================================
def im2col(x_nchw, kh, kw, stride, pad):
    """NCHW -> [B*Ho*Wo, C*kh*kw] patch matrix (C-major, matching torch conv)."""
    # TODO(synk): for real image sizes this should be a strided-DMA Pallas
    # kernel or lax.conv_general_dilated; fine at toy 32x32 shapes.
    B, C, H, W = x_nchw.shape
    xp = jnp.pad(x_nchw, ((0, 0), (0, 0), (pad, pad), (pad, pad)))
    Ho = (H + 2 * pad - kh) // stride + 1
    Wo = (W + 2 * pad - kw) // stride + 1
    cols = []
    for i in range(kh):
        for j in range(kw):
            cols.append(xp[:, :, i:i + stride * Ho:stride, j:j + stride * Wo:stride])
    col = jnp.stack(cols, axis=2)                       # [B, C, kh*kw, Ho, Wo]
    col = col.transpose(0, 3, 4, 1, 2).reshape(B * Ho * Wo, C * kh * kw)
    return col, Ho, Wo


def build_params(key):
    D, Q, NC, F = HIDDEN, NUM_QUERIES, NUM_CLASSES, FFN

    def rnd(k, shp):
        return 0.1 * jax.random.normal(k, shp, jnp.float32)

    def z(n):
        return jnp.zeros((n,), jnp.float32)

    ks = iter(jax.random.split(key, 24))
    p = {
        "conv1_w": rnd(next(ks), (STEM_CH, IN_CH, 3, 3)), "conv1_b": z(STEM_CH),
        "conv2_w": rnd(next(ks), (D, STEM_CH, 3, 3)),     "conv2_b": z(D),
        "pos_emb": rnd(next(ks), (64, D)),
        "query_embed": rnd(next(ks), (Q, D)),
        "enc_q_w": rnd(next(ks), (D, D)), "enc_q_b": z(D),
        "enc_k_w": rnd(next(ks), (D, D)), "enc_k_b": z(D),
        "enc_v_w": rnd(next(ks), (D, D)), "enc_v_b": z(D),
        "enc_o_w": rnd(next(ks), (D, D)), "enc_o_b": z(D),
        "enc_f1_w": rnd(next(ks), (D, F)), "enc_f1_b": z(F),
        "enc_f2_w": rnd(next(ks), (F, D)), "enc_f2_b": z(D),
        "dec_q_w": rnd(next(ks), (D, D)), "dec_q_b": z(D),
        "dec_k_w": rnd(next(ks), (D, D)), "dec_k_b": z(D),
        "dec_v_w": rnd(next(ks), (D, D)), "dec_v_b": z(D),
        "dec_o_w": rnd(next(ks), (D, D)), "dec_o_b": z(D),
        "dec_f1_w": rnd(next(ks), (D, F)), "dec_f1_b": z(F),
        "dec_f2_w": rnd(next(ks), (F, D)), "dec_f2_b": z(D),
        "head_w": rnd(next(ks), (D, NC + 4)), "head_b": z(NC + 4),
    }
    return p


def prepare_params(p):
    """Fold constants (attention scale, pos@Wq/k, decoder Q projection) and
    pack weights / biases / constants into lane-dense 128-aligned VMEM slabs."""
    Q = NUM_QUERIES
    S = p["pos_emb"].shape[0]
    scale = 1.0 / (HIDDEN ** 0.5)
    f32 = jnp.float32

    def pc(w, cols=DP):   # pad columns (lane dim) with zeros
        return jnp.pad(w, ((0, 0), (0, cols - w.shape[1])))

    def pv(b, cols=DP):   # pad a bias vector with zeros
        return jnp.pad(b, (0, cols - b.shape[0]))

    # conv1 GEMM weight: lane-dense N (16 -> 128), result sliced back in JAX.
    conv1_w = pc(p["conv1_w"].reshape(STEM_CH, -1).T)             # (27, 128)
    conv1_b = pv(p["conv1_b"])                                    # (128,)

    # Attention 1/sqrt(D) folded into the encoder-Q / decoder-Q projections.
    enc_q_w = p["enc_q_w"] * scale
    enc_q_b = p["enc_q_b"] * scale

    blocks = {
        "conv2":   (p["conv2_w"].reshape(HIDDEN, -1).T, p["conv2_b"]),
        "enc_qkv": (jnp.concatenate([pc(enc_q_w), pc(p["enc_k_w"]),
                                     pc(p["enc_v_w"])], axis=1),
                    jnp.concatenate([pv(enc_q_b), pv(p["enc_k_b"]),
                                     pv(p["enc_v_b"])])),
        "enc_o":   (p["enc_o_w"], p["enc_o_b"]),
        "enc_f1":  (p["enc_f1_w"], p["enc_f1_b"]),
        "enc_f2":  (p["enc_f2_w"], p["enc_f2_b"]),
        "dec_kv":  (jnp.concatenate([pc(p["dec_k_w"]), pc(p["dec_v_w"])], axis=1),
                    jnp.concatenate([pv(p["dec_k_b"]), pv(p["dec_v_b"])])),
        "dec_o":   (p["dec_o_w"], p["dec_o_b"]),
        "dec_f1":  (p["dec_f1_w"], p["dec_f1_b"]),
        "dec_f2":  (p["dec_f2_w"], p["dec_f2_b"]),
        "head":    (p["head_w"], p["head_b"]),
    }
    w_cols, b_cols = [], []
    for name, ncols in _SLAB:
        w, b = blocks[name]
        w = jnp.pad(w, ((0, SLAB_ROWS - w.shape[0]), (0, ncols - w.shape[1])))
        b = jnp.pad(b, (0, ncols - b.shape[0]))
        w_cols.append(w)
        b_cols.append(b)
    w_slab = jnp.concatenate(w_cols, axis=1).astype(jnp.bfloat16)  # (144, 1664)
    b_slab = jnp.concatenate(b_cols)[None, :].astype(f32)          # (1, 1664)

    # Constants: pos contribution to the encoder Q/K projections (scale already
    # folded into enc_q_w), precomputed decoder queries, raw query embeddings.
    pos = p["pos_emb"]
    pos_q = pc(pos @ enc_q_w)                                      # (S, 128)
    pos_k = pc(pos @ p["enc_k_w"])                                 # (S, 128)
    dq = pc((p["query_embed"] @ p["dec_q_w"] + p["dec_q_b"]) * scale)
    qry = pc(p["query_embed"])
    dq = jnp.pad(dq, ((0, S - Q), (0, 0)))
    qry = jnp.pad(qry, ((0, S - Q), (0, 0)))
    const = jnp.concatenate([pos_q, pos_k, dq, qry], axis=1).astype(f32)

    return {"conv1_w": conv1_w, "conv1_b": conv1_b,
            "w_slab": w_slab, "b_slab": b_slab, "const": const}


def rtdetr_model(prep, x_nchw):
    """Returns (pred_logits [B,Q,NC], pred_boxes [B,Q,4] cxcywh in [0,1])."""
    B = x_nchw.shape[0]

    # ---- backbone stem conv1: 3x3/s2 + ReLU as a lane-dense GEMM ------------
    col1, Ho1, Wo1 = im2col(x_nchw, 3, 3, 2, 1)
    y1 = linear(col1, prep["conv1_w"], prep["conv1_b"], act="relu")
    y1 = y1[:, :STEM_CH].reshape(B, Ho1, Wo1, STEM_CH).transpose(0, 3, 1, 2)

    # ---- conv2 im2col; the conv2 GEMM itself is fused into the kernel -------
    col2, Ho2, Wo2 = im2col(y1, 3, 3, 2, 1)            # (B*S, 144)
    S = Ho2 * Wo2
    assert S == prep["const"].shape[0]

    # ---- fused conv2 + encoder + decoder + packed heads (one Pallas launch) -
    head = fused_transformer(prep, col2, B, S)         # (B, Q, 128)
    pred_logits = head[..., :NUM_CLASSES]
    pred_boxes = jax.nn.sigmoid(head[..., NUM_CLASSES:NUM_CLASSES + 4])
    return pred_logits, pred_boxes


def postprocess(pred_logits, pred_boxes, image_sizes, num_top=NUM_TOP):
    """RT-DETR deploy postprocessor in plain JAX (tiny tensors; a Pallas launch
    costs more than it saves). Returns (labels, boxes, scores)."""
    B, Q, NC = pred_logits.shape
    scores = jax.nn.sigmoid(pred_logits)
    cx, cy, w, h = jnp.split(pred_boxes, 4, axis=-1)
    xyxy = jnp.concatenate(
        [cx - 0.5 * w, cy - 0.5 * h, cx + 0.5 * w, cy + 0.5 * h], axis=-1)
    # scale = image_sizes.repeat(1, 2) -> [s0, s1, s0, s1], as in the torch code
    scale = jnp.concatenate([image_sizes, image_sizes], axis=-1)[:, None, :]
    xyxy = xyxy * scale.astype(jnp.float32)

    # TODO(synk): top-k + gather have no clean Pallas-TPU primitive; kept in JAX.
    flat = scores.reshape(B, Q * NC)
    topk_scores, topk_idx = jax.lax.top_k(flat, num_top)
    labels = topk_idx % NC
    box_idx = topk_idx // NC
    idx = jnp.broadcast_to(box_idx[..., None], (B, num_top, 4))
    boxes_sel = jnp.take_along_axis(xyxy, idx, axis=1)
    return labels, boxes_sel, topk_scores


@jax.jit
def _forward_core(prep, x):
    pred_logits, pred_boxes = rtdetr_model(prep, x)
    B = x.shape[0]
    # Mirrors the torch wrapper exactly: image_sizes[i] = (x[i].shape[1],
    # x[i].shape[2]).  Per the module docstring the input layout is
    # [batch, channels, width, height], so this is (w, h) and the xyxy scale
    # is [w, h, w, h] as the RT-DETR deploy postprocessor expects (the toy
    # driver uses square images so H/W ordering cannot diverge anyway).
    image_sizes = jnp.broadcast_to(
        jnp.array([x.shape[2], x.shape[3]], jnp.float32), (B, 2))
    labels, boxes, scores = postprocess(pred_logits, pred_boxes, image_sizes)
    return pred_logits, pred_boxes, labels, boxes, scores


def wrapped_rtdetr_forward(prep, x):
    """Mirror of WrappedRTDETR.forward in eval mode.

    x: [B, C, H, W] float32 (same layout as the torch module).
    Returns (dd_outputs, detr_outputs, detr_targets, detr_indices).
    """
    B = x.shape[0]
    pred_logits, pred_boxes, labels, boxes, scores = _forward_core(prep, x)

    last_outputs = {"pred_logits": pred_logits, "pred_boxes": pred_boxes}
    detr_outputs = {"last_outputs": [last_outputs]}

    # eval path: postprocessor (+1 on labels), dd_outputs is per-image dicts
    labels = labels + 1
    dd_outputs = [{"scores": scores[i], "labels": labels[i], "boxes": boxes[i]}
                  for i in range(B)]

    # TODO(synk): training path (HungarianMatcher / criterion) not implemented.
    detr_targets = []
    detr_indices = [jnp.zeros((0,), jnp.float32)]
    return dd_outputs, detr_outputs, detr_targets, detr_indices


if __name__ == "__main__":
    key = jax.random.PRNGKey(0)
    pkey, xkey = jax.random.split(key)
    params = build_params(pkey)
    prep = prepare_params(params)
    x = jax.random.uniform(xkey, (2, IN_CH, 32, 32), jnp.float32)

    dd_outputs, detr_outputs, detr_targets, detr_indices = \
        wrapped_rtdetr_forward(prep, x)

    jax.block_until_ready(
        (dd_outputs, detr_outputs["last_outputs"][0], detr_indices))

    lo = detr_outputs["last_outputs"][0]
    assert lo["pred_logits"].shape == (2, NUM_QUERIES, NUM_CLASSES)
    assert lo["pred_boxes"].shape == (2, NUM_QUERIES, 4)
    assert dd_outputs[0]["boxes"].shape == (NUM_TOP, 4)
    assert bool(jnp.all(jnp.isfinite(lo["pred_logits"])))
    assert bool(jnp.all(jnp.isfinite(dd_outputs[0]["boxes"])))
    print("KERNEL_OK")
</pallas_src>

<mosaic_0001>
module attributes {stable_mosaic.version = 11 : i64} {
  func.func @_matmul_bias_kernel(%arg0: i32, %arg1: memref<512x32xbf16, #tpu.memory_space<vmem>>, %arg2: memref<32x128xbf16, #tpu.memory_space<vmem>>, %arg3: memref<1x128xf32, #tpu.memory_space<vmem>>, %arg4: memref<512x128xf32, #tpu.memory_space<vmem>>) attributes {dimension_semantics = [#tpu.dimension_semantics<parallel>], iteration_bounds = array<i64: 1>, scalar_prefetch = 0 : i64, scratch_operands = 0 : i64, tpu.core_type = #tpu.core_type<tc>, window_params = [{transform_indices = @transform_0, window_bounds = array<i64: 512, 32>}, {pipeline_mode = #tpu.pipeline_mode<synchronous>, transform_indices = @transform_1, window_bounds = array<i64: 32, 128>}, {pipeline_mode = #tpu.pipeline_mode<synchronous>, transform_indices = @transform_2, window_bounds = array<i64: 1, 128>}, {transform_indices = @transform_3, window_bounds = array<i64: 512, 128>}]} {
    %c0 = arith.constant 0 : index
    %c0_0 = arith.constant 0 : index
    %0 = vector.load %arg1[%c0, %c0_0] : memref<512x32xbf16, #tpu.memory_space<vmem>>, vector<512x32xbf16>
    %c0_1 = arith.constant 0 : index
    %c0_2 = arith.constant 0 : index
    %1 = vector.load %arg2[%c0_1, %c0_2] : memref<32x128xbf16, #tpu.memory_space<vmem>>, vector<32x128xbf16>
    %cst = arith.constant dense<0.000000e+00> : vector<512x128xf32>
    %2 = tpu.matmul %0, %1, %cst {dimension_numbers = #tpu.dot_dimension_numbers<[1], [0], [0], [1], [0, 0, 1, 1], [], []>} : vector<512x32xbf16>, vector<32x128xbf16>, vector<512x128xf32> -> vector<512x128xf32>
    %c0_3 = arith.constant 0 : index
    %c0_4 = arith.constant 0 : index
    %3 = vector.load %arg3[%c0_3, %c0_4] : memref<1x128xf32, #tpu.memory_space<vmem>>, vector<1x128xf32>
    %4 = vector.broadcast %3 : vector<1x128xf32> to vector<512x128xf32>
    %5 = arith.addf %2, %4 : vector<512x128xf32>
    %cst_5 = arith.constant 0.000000e+00 : f32
    %6 = vector.broadcast %cst_5 : f32 to vector<512x128xf32>
    %7 = arith.maximumf %5, %6 : vector<512x128xf32>
    %c0_6 = arith.constant 0 : index
    %c0_7 = arith.constant 0 : index
    %8 = vector.load %arg4[%c0_6, %c0_7] : memref<512x128xf32, #tpu.memory_space<vmem>>, vector<512x128xf32>
    tpu.vector_store %arg4[%c0_6, %c0_7], %7 {strides = array<i32>} : memref<512x128xf32, #tpu.memory_space<vmem>>, vector<512x128xf32>,
    return
  }
  func.func @transform_0(%arg0: i32) -> (i32, i32) {
    %c0_i32 = arith.constant 0 : i32
    %c0_i32_0 = arith.constant 0 : i32
    return %arg0, %c0_i32 : i32, i32
  }
  func.func @transform_1(%arg0: i32) -> (i32, i32) {
    %c0_i32 = arith.constant 0 : i32
    %c0_i32_0 = arith.constant 0 : i32
    %c0_i32_1 = arith.constant 0 : i32
    return %c0_i32, %c0_i32_0 : i32, i32
  }
  func.func @transform_2(%arg0: i32) -> (i32, i32) {
    %c0_i32 = arith.constant 0 : i32
    %c0_i32_0 = arith.constant 0 : i32
    %c0_i32_1 = arith.constant 0 : i32
    return %c0_i32, %c0_i32_0 : i32, i32
  }
  func.func @transform_3(%arg0: i32) -> (i32, i32) {
    %c0_i32 = arith.constant 0 : i32
    %c0_i32_0 = arith.constant 0 : i32
    return %arg0, %c0_i32 : i32, i32
  }
}

module attributes {stable_mosaic.version = 11 : i64} {
  func.func @_fused_detr_kernel(%arg0: i32, %arg1: memref<128x144xbf16, #tpu.memory_space<vmem>>, %arg2: memref<144x1664xbf16, #tpu.memory_space<vmem>>, %arg3: memref<1x1664xf32, #tpu.memory_space<vmem>>, %arg4: memref<64x512xf32, #tpu.memory_space<vmem>>, %arg5: memref<16x128xf32, #tpu.memory_space<vmem>>) attributes {dimension_semantics = [#tpu.dimension_semantics<parallel>], iteration_bounds = array<i64: 1>, scalar_prefetch = 0 : i64, scratch_operands = 0 : i64, tpu.core_type = #tpu.core_type<tc>, window_params = [{transform_indices = @transform_0, window_bounds = array<i64: 128, 144>}, {pipeline_mode = #tpu.pipeline_mode<synchronous>, transform_indices = @transform_1, window_bounds = array<i64: 144, 1664>}, {pipeline_mode = #tpu.pipeline_mode<synchronous>, transform_indices = @transform_2, window_bounds = array<i64: 1, 1664>}, {pipeline_mode = #tpu.pipeline_mode<synchronous>, transform_indices = @transform_3, window_bounds = array<i64: 64, 512>}, {transform_indices = @transform_4, window_bounds = array<i64: 16, 128>}]} {
    %c0 = arith.constant 0 : index
    %c0_0 = arith.constant 0 : index
    %0 = vector.load %arg4[%c0, %c0_0] : memref<64x512xf32, #tpu.memory_space<vmem>>, vector<64x128xf32>
    %c0_1 = arith.constant 0 : index
    %c128 = arith.constant 128 : index
    %1 = vector.load %arg4[%c0_1, %c128] : memref<64x512xf32, #tpu.memory_space<vmem>>, vector<64x128xf32>
    %c0_2 = arith.constant 0 : index
    %c256 = arith.constant 256 : index
    %2 = vector.load %arg4[%c0_2, %c256] : memref<64x512xf32, #tpu.memory_space<vmem>>, vector<8x128xf32>
    %3 = arith.truncf %2 : vector<8x128xf32> to vector<8x128xbf16>
    %c0_3 = arith.constant 0 : index
    %c384 = arith.constant 384 : index
    %4 = vector.load %arg4[%c0_3, %c384] : memref<64x512xf32, #tpu.memory_space<vmem>>, vector<8x128xf32>
    %c0_4 = arith.constant 0 : index
    %c0_5 = arith.constant 0 : index
    %5 = vector.load %arg1[%c0_4, %c0_5] : memref<128x144xbf16, #tpu.memory_space<vmem>>, vector<128x144xbf16>
    %c0_6 = arith.constant 0 : index
    %c0_7 = arith.constant 0 : index
    %6 = vector.load %arg2[%c0_6, %c0_7] : memref<144x1664xbf16, #tpu.memory_space<vmem>>, vector<144x128xbf16>
    %cst = arith.constant dense<0.000000e+00> : vector<128x128xf32>
    %7 = tpu.matmul %5, %6, %cst {dimension_numbers = #tpu.dot_dimension_numbers<[1], [0], [0], [1], [0, 0, 1, 1], [], []>} : vector<128x144xbf16>, vector<144x128xbf16>, vector<128x128xf32> -> vector<128x128xf32>
    %c0_8 = arith.constant 0 : index
    %c0_9 = arith.constant 0 : index
    %8 = vector.load %arg3[%c0_8, %c0_9] : memref<1x1664xf32, #tpu.memory_space<vmem>>, vector<1x128xf32>
    %9 = vector.broadcast %8 : vector<1x128xf32> to vector<128x128xf32>
    %10 = arith.addf %7, %9 : vector<128x128xf32>
    %cst_10 = arith.constant 0.000000e+00 : f32
    %11 = vector.broadcast %cst_10 : f32 to vector<128x128xf32>
    %12 = arith.maximumf %10, %11 : vector<128x128xf32>
    %13 = arith.truncf %12 : vector<128x128xf32> to vector<128x128xbf16>
    %c0_11 = arith.constant 0 : index
    %c128_12 = arith.constant 128 : index
    %14 = vector.load %arg2[%c0_11, %c128_12] : memref<144x1664xbf16, #tpu.memory_space<vmem>>, vector<128x384xbf16>
    %cst_13 = arith.constant dense<0.000000e+00> : vector<128x384xf32>
    %15 = tpu.matmul %13, %14, %cst_13 {dimension_numbers = #tpu.dot_dimension_numbers<[1], [0], [0], [1], [0, 0, 1, 1], [], []>} : vector<128x128xbf16>, vector<128x384xbf16>, vector<128x384xf32> -> vector<128x384xf32>
    %c0_14 = arith.constant 0 : index
    %c128_15 = arith.constant 128 : index
    %16 = vector.load %arg3[%c0_14, %c128_15] : memref<1x1664xf32, #tpu.memory_space<vmem>>, vector<1x384xf32>
    %17 = vector.broadcast %16 : vector<1x384xf32> to vector<128x384xf32>
    %18 = arith.addf %15, %17 : vector<128x384xf32>
    %19 = vector.extract_strided_slice %18 {offsets = [0, 0], sizes = [64, 128], strides = [1, 1]} : vector<128x384xf32> to vector<64x128xf32>
    %20 = arith.addf %19, %0 : vector<64x128xf32>
    %21 = arith.truncf %20 : vector<64x128xf32> to vector<64x128xbf16>
    %22 = vector.extract_strided_slice %18 {offsets = [0, 128], sizes = [64, 128], strides = [1, 1]} : vector<128x384xf32> to vector<64x128xf32>
    %23 = arith.addf %22, %1 : vector<64x128xf32>
    %24 = arith.truncf %23 : vector<64x128xf32> to vector<64x128xbf16>
    %25 = vector.extract_strided_slice %18 {offsets = [0, 256], sizes = [64, 128], strides = [1, 1]} : vector<128x384xf32> to vector<64x128xf32>
    %26 = arith.truncf %25 : vector<64x128xf32> to vector<64x128xbf16>
    %cst_16 = arith.constant dense<0.000000e+00> : vector<64x64xf32>
    %27 = tpu.matmul %21, %24, %cst_16 {dimension_numbers = #tpu.dot_dimension_numbers<[1], [1], [0], [0], [0, 0, 1, 0], [], []>} : vector<64x128xbf16>, vector<64x128xbf16>, vector<64x64xf32> -> vector<64x64xf32>
    %cst_17 = arith.constant dense<0xFF800000> : vector<64xf32>
    %28 = vector.multi_reduction <maximumf>, %27, %cst_17 [1] : vector<64x64xf32> to vector<64xf32>
    %29 = vector.shape_cast %28 : vector<64xf32> to vector<64x1xf32>
    %30 = vector.broadcast %29 : vector<64x1xf32> to vector<64x64xf32>
    %31 = arith.subf %27, %30 : vector<64x64xf32>
    %32 = math.exp %31 : vector<64x64xf32>
    %cst_18 = arith.constant dense<0.000000e+00> : vector<64xf32>
    %33 = vector.multi_reduction <add>, %32, %cst_18 [1] : vector<64x64xf32> to vector<64xf32>
    %34 = vector.shape_cast %33 : vector<64xf32> to vector<64x1xf32>
    %35 = arith.truncf %32 : vector<64x64xf32> to vector<64x64xbf16>
    %cst_19 = arith.constant dense<0.000000e+00> : vector<64x128xf32>
    %36 = tpu.matmul %35, %26, %cst_19 {dimension_numbers = #tpu.dot_dimension_numbers<[1], [0], [0], [1], [0, 0, 1, 1], [], []>} : vector<64x64xbf16>, vector<64x128xbf16>, vector<64x128xf32> -> vector<64x128xf32>
    %37 = tpu.reciprocal %34 {approx = true} : vector<64x1xf32> -> vector<64x1xf32>
    %38 = vector.broadcast %37 : vector<64x1xf32> to vector<64x128xf32>
    %39 = arith.mulf %36, %38 : vector<64x128xf32>
    %40 = vector.extract_strided_slice %18 {offsets = [64, 0], sizes = [64, 128], strides = [1, 1]} : vector<128x384xf32> to vector<64x128xf32>
    %41 = arith.addf %40, %0 : vector<64x128xf32>
    %42 = arith.truncf %41 : vector<64x128xf32> to vector<64x128xbf16>
    %43 = vector.extract_strided_slice %18 {offsets = [64, 128], sizes = [64, 128], strides = [1, 1]} : vector<128x384xf32> to vector<64x128xf32>
    %44 = arith.addf %43, %1 : vector<64x128xf32>
    %45 = arith.truncf %44 : vector<64x128xf32> to vector<64x128xbf16>
    %46 = vector.extract_strided_slice %18 {offsets = [64, 256], sizes = [64, 128], strides = [1, 1]} : vector<128x384xf32> to vector<64x128xf32>
    %47 = arith.truncf %46 : vector<64x128xf32> to vector<64x128xbf16>
    %cst_20 = arith.constant dense<0.000000e+00> : vector<64x64xf32>
    %48 = tpu.matmul %42, %45, %cst_20 {dimension_numbers = #tpu.dot_dimension_numbers<[1], [1], [0], [0], [0, 0, 1, 0], [], []>} : vector<64x128xbf16>, vector<64x128xbf16>, vector<64x64xf32> -> vector<64x64xf32>
    %cst_21 = arith.constant dense<0xFF800000> : vector<64xf32>
    %49 = vector.multi_reduction <maximumf>, %48, %cst_21 [1] : vector<64x64xf32> to vector<64xf32>
    %50 = vector.shape_cast %49 : vector<64xf32> to vector<64x1xf32>
    %51 = vector.broadcast %50 : vector<64x1xf32> to vector<64x64xf32>
    %52 = arith.subf %48, %51 : vector<64x64xf32>
    %53 = math.exp %52 : vector<64x64xf32>
    %cst_22 = arith.constant dense<0.000000e+00> : vector<64xf32>
    %54 = vector.multi_reduction <add>, %53, %cst_22 [1] : vector<64x64xf32> to vector<64xf32>
    %55 = vector.shape_cast %54 : vector<64xf32> to vector<64x1xf32>
    %56 = arith.truncf %53 : vector<64x64xf32> to vector<64x64xbf16>
    %cst_23 = arith.constant dense<0.000000e+00> : vector<64x128xf32>
    %57 = tpu.matmul %56, %47, %cst_23 {dimension_numbers = #tpu.dot_dimension_numbers<[1], [0], [0], [1], [0, 0, 1, 1], [], []>} : vector<64x64xbf16>, vector<64x128xbf16>, vector<64x128xf32> -> vector<64x128xf32>
    %58 = tpu.reciprocal %55 {approx = true} : vector<64x1xf32> -> vector<64x1xf32>
    %59 = vector.broadcast %58 : vector<64x1xf32> to vector<64x128xf32>
    %60 = arith.mulf %57, %59 : vector<64x128xf32>
    %61 = tpu.concatenate %39, %60 in 0 : vector<64x128xf32>, vector<64x128xf32> -> vector<128x128xf32>
    %62 = arith.truncf %61 : vector<128x128xf32> to vector<128x128xbf16>
    %c0_24 = arith.constant 0 : index
    %c512 = arith.constant 512 : index
    %63 = vector.load %arg2[%c0_24, %c512] : memref<144x1664xbf16, #tpu.memory_space<vmem>>, vector<128x128xbf16>
    %cst_25 = arith.constant dense<0.000000e+00> : vector<128x128xf32>
    %64 = tpu.matmul %62, %63, %cst_25 {dimension_numbers = #tpu.dot_dimension_numbers<[1], [0], [0], [1], [0, 0, 1, 1], [], []>} : vector<128x128xbf16>, vector<128x128xbf16>, vector<128x128xf32> -> vector<128x128xf32>
    %c0_26 = arith.constant 0 : index
    %c512_27 = arith.constant 512 : index
    %65 = vector.load %arg3[%c0_26, %c512_27] : memref<1x1664xf32, #tpu.memory_space<vmem>>, vector<1x128xf32>
    %66 = vector.broadcast %65 : vector<1x128xf32> to vector<128x128xf32>
    %67 = arith.addf %64, %66 : vector<128x128xf32>
    %68 = arith.addf %12, %67 : vector<128x128xf32>
    %69 = arith.truncf %68 : vector<128x128xf32> to vector<128x128xbf16>
    %c0_28 = arith.constant 0 : index
    %c640 = arith.constant 640 : index
    %70 = vector.load %arg2[%c0_28, %c640] : memref<144x1664xbf16, #tpu.memory_space<vmem>>, vector<128x128xbf16>
    %cst_29 = arith.constant dense<0.000000e+00> : vector<128x128xf32>
    %71 = tpu.matmul %69, %70, %cst_29 {dimension_numbers = #tpu.dot_dimension_numbers<[1], [0], [0], [1], [0, 0, 1, 1], [], []>} : vector<128x128xbf16>, vector<128x128xbf16>, vector<128x128xf32> -> vector<128x128xf32>
    %c0_30 = arith.constant 0 : index
    %c640_31 = arith.constant 640 : index
    %72 = vector.load %arg3[%c0_30, %c640_31] : memref<1x1664xf32, #tpu.memory_space<vmem>>, vector<1x128xf32>
    %73 = vector.broadcast %72 : vector<1x128xf32> to vector<128x128xf32>
    %74 = arith.addf %71, %73 : vector<128x128xf32>
    %cst_32 = arith.constant 0.000000e+00 : f32
    %75 = vector.broadcast %cst_32 : f32 to vector<128x128xf32>
    %76 = arith.maximumf %74, %75 : vector<128x128xf32>
    %77 = arith.truncf %76 : vector<128x128xf32> to vector<128x128xbf16>
    %c0_33 = arith.constant 0 : index
    %c768 = arith.constant 768 : index
    %78 = vector.load %arg2[%c0_33, %c768] : memref<144x1664xbf16, #tpu.memory_space<vmem>>, vector<128x128xbf16>
    %cst_34 = arith.constant dense<0.000000e+00> : vector<128x128xf32>
    %79 = tpu.matmul %77, %78, %cst_34 {dimension_numbers = #tpu.dot_dimension_numbers<[1], [0], [0], [1], [0, 0, 1, 1], [], []>} : vector<128x128xbf16>, vector<128x128xbf16>, vector<128x128xf32> -> vector<128x128xf32>
    %c0_35 = arith.constant 0 : index
    %c768_36 = arith.constant 768 : index
    %80 = vector.load %arg3[%c0_35, %c768_36] : memref<1x1664xf32, #tpu.memory_space<vmem>>, vector<1x128xf32>
    %81 = vector.broadcast %80 : vector<1x128xf32> to vector<128x128xf32>
    %82 = arith.addf %79, %81 : vector<128x128xf32>
    %83 = arith.addf %68, %82 : vector<128x128xf32>
    %84 = arith.truncf %83 : vector<128x128xf32> to vector<128x128xbf16>
    %c0_37 = arith.constant 0 : index
    %c896 = arith.constant 896 : index
    %85 = vector.load %arg2[%c0_37, %c896] : memref<144x1664xbf16, #tpu.memory_space<vmem>>, vector<128x256xbf16>
    %cst_38 = arith.constant dense<0.000000e+00> : vector<128x256xf32>
    %86 = tpu.matmul %84, %85, %cst_38 {dimension_numbers = #tpu.dot_dimension_numbers<[1], [0], [0], [1], [0, 0, 1, 1], [], []>} : vector<128x128xbf16>, vector<128x256xbf16>, vector<128x256xf32> -> vector<128x256xf32>
    %c0_39 = arith.constant 0 : index
    %c896_40 = arith.constant 896 : index
    %87 = vector.load %arg3[%c0_39, %c896_40] : memref<1x1664xf32, #tpu.memory_space<vmem>>, vector<1x256xf32>
    %88 = vector.broadcast %87 : vector<1x256xf32> to vector<128x256xf32>
    %89 = arith.addf %86, %88 : vector<128x256xf32>
    %90 = vector.extract_strided_slice %89 {offsets = [0, 0], sizes = [64, 128], strides = [1, 1]} : vector<128x256xf32> to vector<64x128xf32>
    %91 = arith.truncf %90 : vector<64x128xf32> to vector<64x128xbf16>
    %92 = vector.extract_strided_slice %89 {offsets = [0, 128], sizes = [64, 128], strides = [1, 1]} : vector<128x256xf32> to vector<64x128xf32>
    %93 = arith.truncf %92 : vector<64x128xf32> to vector<64x128xbf16>
    %cst_41 = arith.constant dense<0.000000e+00> : vector<8x64xf32>
    %94 = tpu.matmul %3, %91, %cst_41 {dimension_numbers = #tpu.dot_dimension_numbers<[1], [1], [0], [0], [0, 0, 1, 0], [], []>} : vector<8x128xbf16>, vector<64x128xbf16>, vector<8x64xf32> -> vector<8x64xf32>
    %cst_42 = arith.constant dense<0xFF800000> : vector<8xf32>
    %95 = vector.multi_reduction <maximumf>, %94, %cst_42 [1] : vector<8x64xf32> to vector<8xf32>
    %96 = vector.shape_cast %95 : vector<8xf32> to vector<8x1xf32>
    %97 = vector.broadcast %96 : vector<8x1xf32> to vector<8x64xf32>
    %98 = arith.subf %94, %97 : vector<8x64xf32>
    %99 = math.exp %98 : vector<8x64xf32>
    %cst_43 = arith.constant dense<0.000000e+00> : vector<8xf32>
    %100 = vector.multi_reduction <add>, %99, %cst_43 [1] : vector<8x64xf32> to vector<8xf32>
    %101 = vector.shape_cast %100 : vector<8xf32> to vector<8x1xf32>
    %102 = arith.truncf %99 : vector<8x64xf32> to vector<8x64xbf16>
    %cst_44 = arith.constant dense<0.000000e+00> : vector<8x128xf32>
    %103 = tpu.matmul %102, %93, %cst_44 {dimension_numbers = #tpu.dot_dimension_numbers<[1], [0], [0], [1], [0, 0, 1, 1], [], []>} : vector<8x64xbf16>, vector<64x128xbf16>, vector<8x128xf32> -> vector<8x128xf32>
    %104 = tpu.reciprocal %101 {approx = true} : vector<8x1xf32> -> vector<8x1xf32>
    %105 = vector.broadcast %104 : vector<8x1xf32> to vector<8x128xf32>
    %106 = arith.mulf %103, %105 : vector<8x128xf32>
    %107 = vector.extract_strided_slice %89 {offsets = [64, 0], sizes = [64, 128], strides = [1, 1]} : vector<128x256xf32> to vector<64x128xf32>
    %108 = arith.truncf %107 : vector<64x128xf32> to vector<64x128xbf16>
    %109 = vector.extract_strided_slice %89 {offsets = [64, 128], sizes = [64, 128], strides = [1, 1]} : vector<128x256xf32> to vector<64x128xf32>
    %110 = arith.truncf %109 : vector<64x128xf32> to vector<64x128xbf16>
    %cst_45 = arith.constant dense<0.000000e+00> : vector<8x64xf32>
    %111 = tpu.matmul %3, %108, %cst_45 {dimension_numbers = #tpu.dot_dimension_numbers<[1], [1], [0], [0], [0, 0, 1, 0], [], []>} : vector<8x128xbf16>, vector<64x128xbf16>, vector<8x64xf32> -> vector<8x64xf32>
    %cst_46 = arith.constant dense<0xFF800000> : vector<8xf32>
    %112 = vector.multi_reduction <maximumf>, %111, %cst_46 [1] : vector<8x64xf32> to vector<8xf32>
    %113 = vector.shape_cast %112 : vector<8xf32> to vector<8x1xf32>
    %114 = vector.broadcast %113 : vector<8x1xf32> to vector<8x64xf32>
    %115 = arith.subf %111, %114 : vector<8x64xf32>
    %116 = math.exp %115 : vector<8x64xf32>
    %cst_47 = arith.constant dense<0.000000e+00> : vector<8xf32>
    %117 = vector.multi_reduction <add>, %116, %cst_47 [1] : vector<8x64xf32> to vector<8xf32>
    %118 = vector.shape_cast %117 : vector<8xf32> to vector<8x1xf32>
    %119 = arith.truncf %116 : vector<8x64xf32> to vector<8x64xbf16>
    %cst_48 = arith.constant dense<0.000000e+00> : vector<8x128xf32>
    %120 = tpu.matmul %119, %110, %cst_48 {dimension_numbers = #tpu.dot_dimension_numbers<[1], [0], [0], [1], [0, 0, 1, 1], [], []>} : vector<8x64xbf16>, vector<64x128xbf16>, vector<8x128xf32> -> vector<8x128xf32>
    %121 = tpu.reciprocal %118 {approx = true} : vector<8x1xf32> -> vector<8x1xf32>
    %122 = vector.broadcast %121 : vector<8x1xf32> to vector<8x128xf32>
    %123 = arith.mulf %120, %122 : vector<8x128xf32>
    %124 = tpu.concatenate %106, %123 in 0 : vector<8x128xf32>, vector<8x128xf32> -> vector<16x128xf32>
    %125 = tpu.concatenate %4, %4 in 0 : vector<8x128xf32>, vector<8x128xf32> -> vector<16x128xf32>
    %126 = arith.truncf %124 : vector<16x128xf32> to vector<16x128xbf16>
    %c0_49 = arith.constant 0 : index
    %c1152 = arith.constant 1152 : index
    %127 = vector.load %arg2[%c0_49, %c1152] : memref<144x1664xbf16, #tpu.memory_space<vmem>>, vector<128x128xbf16>
    %cst_50 = arith.constant dense<0.000000e+00> : vector<16x128xf32>
    %128 = tpu.matmul %126, %127, %cst_50 {dimension_numbers = #tpu.dot_dimension_numbers<[1], [0], [0], [1], [0, 0, 1, 1], [], []>} : vector<16x128xbf16>, vector<128x128xbf16>, vector<16x128xf32> -> vector<16x128xf32>
    %c0_51 = arith.constant 0 : index
    %c1152_52 = arith.constant 1152 : index
    %129 = vector.load %arg3[%c0_51, %c1152_52] : memref<1x1664xf32, #tpu.memory_space<vmem>>, vector<1x128xf32>
    %130 = vector.broadcast %129 : vector<1x128xf32> to vector<16x128xf32>
    %131 = arith.addf %128, %130 : vector<16x128xf32>
    %132 = arith.addf %125, %131 : vector<16x128xf32>
    %133 = arith.truncf %132 : vector<16x128xf32> to vector<16x128xbf16>
    %c0_53 = arith.constant 0 : index
    %c1280 = arith.constant 1280 : index
    %134 = vector.load %arg2[%c0_53, %c1280] : memref<144x1664xbf16, #tpu.memory_space<vmem>>, vector<128x128xbf16>
    %cst_54 = arith.constant dense<0.000000e+00> : vector<16x128xf32>
    %135 = tpu.matmul %133, %134, %cst_54 {dimension_numbers = #tpu.dot_dimension_numbers<[1], [0], [0], [1], [0, 0, 1, 1], [], []>} : vector<16x128xbf16>, vector<128x128xbf16>, vector<16x128xf32> -> vector<16x128xf32>
    %c0_55 = arith.constant 0 : index
    %c1280_56 = arith.constant 1280 : index
    %136 = vector.load %arg3[%c0_55, %c1280_56] : memref<1x1664xf32, #tpu.memory_space<vmem>>, vector<1x128xf32>
    %137 = vector.broadcast %136 : vector<1x128xf32> to vector<16x128xf32>
    %138 = arith.addf %135, %137 : vector<16x128xf32>
    %cst_57 = arith.constant 0.000000e+00 : f32
    %139 = vector.broadcast %cst_57 : f32 to vector<16x128xf32>
    %140 = arith.maximumf %138, %139 : vector<16x128xf32>
    %141 = arith.truncf %140 : vector<16x128xf32> to vector<16x128xbf16>
    %c0_58 = arith.constant 0 : index
    %c1408 = arith.constant 1408 : index
    %142 = vector.load %arg2[%c0_58, %c1408] : memref<144x1664xbf16, #tpu.memory_space<vmem>>, vector<128x128xbf16>
    %cst_59 = arith.constant dense<0.000000e+00> : vector<16x128xf32>
    %143 = tpu.matmul %141, %142, %cst_59 {dimension_numbers = #tpu.dot_dimension_numbers<[1], [0], [0], [1], [0, 0, 1, 1], [], []>} : vector<16x128xbf16>, vector<128x128xbf16>, vector<16x128xf32> -> vector<16x128xf32>
    %c0_60 = arith.constant 0 : index
    %c1408_61 = arith.constant 1408 : index
    %144 = vector.load %arg3[%c0_60, %c1408_61] : memref<1x1664xf32, #tpu.memory_space<vmem>>, vector<1x128xf32>
    %145 = vector.broadcast %144 : vector<1x128xf32> to vector<16x128xf32>
    %146 = arith.addf %143, %145 : vector<16x128xf32>
    %147 = arith.addf %132, %146 : vector<16x128xf32>
    %148 = arith.truncf %147 : vector<16x128xf32> to vector<16x128xbf16>
    %c0_62 = arith.constant 0 : index
    %c1536 = arith.constant 1536 : index
    %149 = vector.load %arg2[%c0_62, %c1536] : memref<144x1664xbf16, #tpu.memory_space<vmem>>, vector<128x128xbf16>
    %cst_63 = arith.constant dense<0.000000e+00> : vector<16x128xf32>
    %150 = tpu.matmul %148, %149, %cst_63 {dimension_numbers = #tpu.dot_dimension_numbers<[1], [0], [0], [1], [0, 0, 1, 1], [], []>} : vector<16x128xbf16>, vector<128x128xbf16>, vector<16x128xf32> -> vector<16x128xf32>
    %c0_64 = arith.constant 0 : index
    %c1536_65 = arith.constant 1536 : index
    %151 = vector.load %arg3[%c0_64, %c1536_65] : memref<1x1664xf32, #tpu.memory_space<vmem>>, vector<1x128xf32>
    %152 = vector.broadcast %151 : vector<1x128xf32> to vector<16x128xf32>
    %153 = arith.addf %150, %152 : vector<16x128xf32>
    %c0_66 = arith.constant 0 : index
    %c0_67 = arith.constant 0 : index
    %154 = vector.load %arg5[%c0_66, %c0_67] : memref<16x128xf32, #tpu.memory_space<vmem>>, vector<16x128xf32>
    tpu.vector_store %arg5[%c0_66, %c0_67], %153 {strides = array<i32>} : memref<16x128xf32, #tpu.memory_space<vmem>>, vector<16x128xf32>,
    return
  }
  func.func @transform_0(%arg0: i32) -> (i32, i32) {
    %c0_i32 = arith.constant 0 : i32
    %c0_i32_0 = arith.constant 0 : i32
    return %arg0, %c0_i32 : i32, i32
  }
  func.func @transform_1(%arg0: i32) -> (i32, i32) {
    %c0_i32 = arith.constant 0 : i32
    %c0_i32_0 = arith.constant 0 : i32
    %c0_i32_1 = arith.constant 0 : i32
    return %c0_i32, %c0_i32_0 : i32, i32
  }
  func.func @transform_2(%arg0: i32) -> (i32, i32) {
    %c0_i32 = arith.constant 0 : i32
    %c0_i32_0 = arith.constant 0 : i32
    %c0_i32_1 = arith.constant 0 : i32
    return %c0_i32, %c0_i32_0 : i32, i32
  }
  func.func @transform_3(%arg0: i32) -> (i32, i32) {
    %c0_i32 = arith.constant 0 : i32
    %c0_i32_0 = arith.constant 0 : i32
    %c0_i32_1 = arith.constant 0 : i32
    return %c0_i32, %c0_i32_0 : i32, i32
  }
  func.func @transform_4(%arg0: i32) -> (i32, i32) {
    %c0_i32 = arith.constant 0 : i32
    %c0_i32_0 = arith.constant 0 : i32
    return %arg0, %c0_i32 : i32, i32
  }
}

</mosaic_0001>

<bundles_post_ra>
// kernel: _forward_core.2
= control target key start
LH: loop header
LB: loop body
LE: loop exit
PB: predicated region body
PF: predicated region fallthrough
CT: control target
= control target key end

     0   :  { %vm262_vm0 = vcmask 261120   ;;  %s1402_s1 = inlined_call_operand.vmem [shape: bf16[32,128], index: 1, kind: input, shape index: {}]   ;;  %s1403_s0 = inlined_call_operand.vmem [shape: bf16[512,32], index: 0, kind: input, shape index: {}]   ;;  %s1404_s2 = inlined_call_operand.vmem [shape: f32[1,128], index: 2, kind: input, shape index: {}]   ;;  %s1405_s3 = inlined_call_operand.vmem [shape: f32[512,128], index: 3, kind: output, shape index: {}]  }
   0x1   :  { %v953_v0 = vld [vmem:[%s1402_s1 + $0x8] sm:$0xff]   ;;  %v954_v1 = vld [vmem:[%s1402_s1] sm:$0xff]   ;;  %v959_v6 = vld [vmem:[%s1403_s0 + $0x10] sm:$0xff]  }
   0x2   :  { %881 = vmatprep.subr.bf16.mxu0 %v953_v0  ;;  %949 = vmatprep.subr.bf16.mxu1 %v953_v0  ;;  %v955_v2 = vld [vmem:[%s1403_s0] sm:$0xff]   ;;  %v957_v4 = vld [vmem:[%s1403_s0 + $0x8] sm:$0xff]   ;;  %v960_v7 = vld [vmem:[%s1403_s0 + $0x90] sm:$0xff]  }
   0x3   :  { %882 = vmatpush3.bf16.msra.mxu0 %v953_v0  ;;  %951 = vmatpush3.bf16.msra.mxu1 %v953_v0  ;;  %v956_v3 = vld [vmem:[%s1403_s0 + $0x80] sm:$0xff]   ;;  %v958_v5 = vld [vmem:[%s1403_s0 + $0x88] sm:$0xff]   ;;  %v961_v8 = vld [vmem:[%s1403_s0 + $0x18] sm:$0xff]  }
   0x4   :  { %883 = vmatprep.subr.bf16.mxu0 %v954_v1  ;;  %950 = vmatprep.subr.bf16.mxu1 %v954_v1  ;;  %v962_v9 = vld [vmem:[%s1403_s0 + $0x98] sm:$0xff]   ;;  %v963_v10 = vld [vmem:[%s1403_s0 + $0x20] sm:$0xff]   ;;  %v965_v12 = vld [vmem:[%s1403_s0 + $0x28] sm:$0xff]  }
   0x5   :  { %885 = vmatprep.mubr.msk.bf16.mxu0 %vm262_vm0, %v955_v2  ;;  %917 = vmatprep.mubr.msk.bf16.mxu1 %vm262_vm0, %v956_v3  ;;  %v964_v11 = vld [vmem:[%s1403_s0 + $0xa0] sm:$0xff]   ;;  %v966_v13 = vld [vmem:[%s1403_s0 + $0xa8] sm:$0xff]   ;;  %v967_v14 = vld [vmem:[%s1403_s0 + $0x30] sm:$0xff]  }
   0x6   :  { %v968_v15 = vld [vmem:[%s1403_s0 + $0xb0] sm:$0xff]   ;;  %v969_v16 = vld [vmem:[%s1403_s0 + $0x38] sm:$0xff]   ;;  %v971_v18 = vld [vmem:[%s1403_s0 + $0x40] sm:$0xff]  }
   0x7   :  { %884 = vmatpush3.bf16.msra.mxu0 %v954_v1  ;;  %952 = vmatpush3.bf16.msra.mxu1 %v954_v1  ;;  %v970_v17 = vld [vmem:[%s1403_s0 + $0xb8] sm:$0xff]   ;;  %v972_v19 = vld [vmem:[%s1403_s0 + $0xc0] sm:$0xff]   ;;  %v973_v20 = vld [vmem:[%s1403_s0 + $0x48] sm:$0xff]  }
   0x8   :  { %v974_v21 = vld [vmem:[%s1403_s0 + $0xc8] sm:$0xff]   ;;  %v975_v22 = vld [vmem:[%s1403_s0 + $0x50] sm:$0xff]   ;;  %v977_v24 = vld [vmem:[%s1403_s0 + $0x58] sm:$0xff]  }
   0x9   :  { %v976_v23 = vld [vmem:[%s1403_s0 + $0xd0] sm:$0xff]   ;;  %v978_v25 = vld [vmem:[%s1403_s0 + $0xd8] sm:$0xff]   ;;  %v979_v26 = vld [vmem:[%s1403_s0 + $0x60] sm:$0xff]  }
   0xa   :  { %886 = vmatmul.mubr.msk.bf16.vlgmr.msra.gmra.mxu0 %vm262_vm0, %v957_v4  ;;  %918 = vmatmul.mubr.msk.bf16.vlgmr.msra.gmra.mxu1 %vm262_vm0, %v958_v5  ;;  %v980_v27 = vld [vmem:[%s1403_s0 + $0xe0] sm:$0xff]   ;;  %v981_v28 = vld [vmem:[%s1403_s0 + $0x68] sm:$0xff]   ;;  %v983_v30 = vld [vmem:[%s1403_s0 + $0x70] sm:$0xff]  }
   0xb   :  { %889 = vmatprep.mubr.msk.bf16.mxu0 %vm262_vm0, %v959_v6  ;;  %921 = vmatprep.mubr.msk.bf16.mxu1 %vm262_vm0, %v960_v7  ;;  %v982_v29 = vld [vmem:[%s1403_s0 + $0xe8] sm:$0xff]   ;;  %v984_v31 = vld [vmem:[%s1403_s0 + $0xf0] sm:$0xff]   ;;  %v985_v32 = vld [vmem:[%s1403_s0 + $0x78] sm:$0xff]  }
   0xc   :  { %v986_v33 = vld [vmem:[%s1403_s0 + $0xf8] sm:$0xff]   ;;  %v1144_v34 = vld [vmem:[%s1404_s2] ss:$0 sm:$0xff] }
  0x12   :  { %890 = vmatmul.mubr.msk.bf16.gmra.mxu0 %vm262_vm0, %v961_v8  ;;  %922 = vmatmul.mubr.msk.bf16.gmra.mxu1 %vm262_vm0, %v962_v9 }
  0x13   :  { %893 = vmatprep.mubr.msk.bf16.mxu0 %vm262_vm0, %v963_v10  ;;  %925 = vmatprep.mubr.msk.bf16.mxu1 %vm262_vm0, %v964_v11 }
  0x1a   :  { %894 = vmatmul.mubr.msk.bf16.gmra.mxu0 %vm262_vm0, %v965_v12  ;;  %926 = vmatmul.mubr.msk.bf16.gmra.mxu1 %vm262_vm0, %v966_v13 }
  0x1b   :  { %897 = vmatprep.mubr.msk.bf16.mxu0 %vm262_vm0, %v967_v14  ;;  %929 = vmatprep.mubr.msk.bf16.mxu1 %vm262_vm0, %v968_v15 }
  0x22   :  { %898 = vmatmul.mubr.msk.bf16.gmra.mxu0 %vm262_vm0, %v969_v16  ;;  %930 = vmatmul.mubr.msk.bf16.gmra.mxu1 %vm262_vm0, %v970_v17 }
  0x23   :  { %901 = vmatprep.mubr.msk.bf16.mxu0 %vm262_vm0, %v971_v18  ;;  %933 = vmatprep.mubr.msk.bf16.mxu1 %vm262_vm0, %v972_v19 }
  0x2a   :  { %902 = vmatmul.mubr.msk.bf16.gmra.mxu0 %vm262_vm0, %v973_v20  ;;  %934 = vmatmul.mubr.msk.bf16.gmra.mxu1 %vm262_vm0, %v974_v21 }
  0x2b   :  { %905 = vmatprep.mubr.msk.bf16.mxu0 %vm262_vm0, %v975_v22  ;;  %937 = vmatprep.mubr.msk.bf16.mxu1 %vm262_vm0, %v976_v23 }
  0x32   :  { %906 = vmatmul.mubr.msk.bf16.gmra.mxu0 %vm262_vm0, %v977_v24  ;;  %938 = vmatmul.mubr.msk.bf16.gmra.mxu1 %vm262_vm0, %v978_v25 }
  0x33   :  { %909 = vmatprep.mubr.msk.bf16.mxu0 %vm262_vm0, %v979_v26  ;;  %941 = vmatprep.mubr.msk.bf16.mxu1 %vm262_vm0, %v980_v27 }
  0x3a   :  { %910 = vmatmul.mubr.msk.bf16.gmra.mxu0 %vm262_vm0, %v981_v28  ;;  %942 = vmatmul.mubr.msk.bf16.gmra.mxu1 %vm262_vm0, %v982_v29 }
  0x3b   :  { %913 = vmatprep.mubr.msk.bf16.mxu0 %vm262_vm0, %v983_v30  ;;  %945 = vmatprep.mubr.msk.bf16.mxu1 %vm262_vm0, %v984_v31 }
  0x42   :  { %914 = vmatmul.mubr.msk.bf16.gmra.mxu0 %vm262_vm0, %v985_v32  ;;  %946 = vmatmul.mubr.msk.bf16.gmra.mxu1 %vm262_vm0, %v986_v33 }
  0xca   :  { %v887_v35 = vpop.f32.mrf.mxu0  ;;  %v919_v36 = vpop.f32.mrf.mxu1 }
  0xcb   :  { %v402_v37 = vadd.f32 %v887_v35, %v1144_v34  ;;  %v530_v38 = vadd.f32 %v919_v36, %v1144_v34 }
  0xcc   :  { %v393_v39 = vpop.f32.mrf.mxu0  ;;  %v521_v40 = vpop.f32.mrf.mxu1 }
  0xcd   :  { %v650_v41 = vmax.f32 %v402_v37, 0.0  ;;  %v682_v42 = vmax.f32 %v530_v38, 0.0  ;;  %v394_v43 = vadd.f32 %v1144_v34, %v393_v39  ;;  %v522_v44 = vadd.f32 %v1144_v34, %v521_v40 }
  0xce   :  { %v888_v45 = vpop.f32.mrf.mxu0  ;;  %v920_v46 = vpop.f32.mrf.mxu1 }
  0xcf   :  { %714 = vst [vmem:[%s1405_s3 + $0x10] sm:$0xff] %v650_v41  ;;  %746 = vst [vmem:[%s1405_s3 + $0x110] sm:$0xff] %v682_v42  ;;  %v648_v47 = vmax.f32 %v394_v43, 0.0  ;;  %v680_v48 = vmax.f32 %v522_v44, 0.0  ;;  %v405_v49 = vadd.f32 %v888_v45, %v1144_v34  ;;  %v533_v50 = vadd.f32 %v920_v46, %v1144_v34 }
  0xd0   :  { %v396_v51 = vpop.f32.mrf.mxu0  ;;  %v524_v52 = vpop.f32.mrf.mxu1 }
  0xd1   :  { %712 = vst [vmem:[%s1405_s3] sm:$0xff] %v648_v47  ;;  %744 = vst [vmem:[%s1405_s3 + $0x100] sm:$0xff] %v680_v48  ;;  %v651_v53 = vmax.f32 %v405_v49, 0.0  ;;  %v683_v54 = vmax.f32 %v533_v50, 0.0  ;;  %v397_v55 = vadd.f32 %v1144_v34, %v396_v51  ;;  %v525_v56 = vadd.f32 %v1144_v34, %v524_v52 }
  0xd2   :  { %v891_v57 = vpop.f32.mrf.mxu0  ;;  %v923_v58 = vpop.f32.mrf.mxu1 }
  0xd3   :  { %715 = vst [vmem:[%s1405_s3 + $0x18] sm:$0xff] %v651_v53  ;;  %747 = vst [vmem:[%s1405_s3 + $0x118] sm:$0xff] %v683_v54  ;;  %v649_v59 = vmax.f32 %v397_v55, 0.0  ;;  %v681_v60 = vmax.f32 %v525_v56, 0.0  ;;  %v418_v61 = vadd.f32 %v891_v57, %v1144_v34  ;;  %v546_v62 = vadd.f32 %v923_v58, %v1144_v34 }
  0xd4   :  { %v409_v63 = vpop.f32.mrf.mxu0  ;;  %v537_v0 = vpop.f32.mrf.mxu1 }
  0xd5   :  { %713 = vst [vmem:[%s1405_s3 + $0x8] sm:$0xff] %v649_v59  ;;  %745 = vst [vmem:[%s1405_s3 + $0x108] sm:$0xff] %v681_v60  ;;  %v654_v1 = vmax.f32 %v418_v61, 0.0  ;;  %v686_v2 = vmax.f32 %v546_v62, 0.0  ;;  %v410_v3 = vadd.f32 %v1144_v34, %v409_v63  ;;  %v538_v4 = vadd.f32 %v1144_v34, %v537_v0 }
  0xd6   :  { %v892_v5 = vpop.f32.mrf.mxu0  ;;  %v924_v6 = vpop.f32.mrf.mxu1 }
  0xd7   :  { %718 = vst [vmem:[%s1405_s3 + $0x30] sm:$0xff] %v654_v1  ;;  %750 = vst [vmem:[%s1405_s3 + $0x130] sm:$0xff] %v686_v2  ;;  %v652_v7 = vmax.f32 %v410_v3, 0.0  ;;  %v684_v8 = vmax.f32 %v538_v4, 0.0  ;;  %v421_v9 = vadd.f32 %v892_v5, %v1144_v34  ;;  %v549_v10 = vadd.f32 %v924_v6, %v1144_v34 }
  0xd8   :  { %v412_v11 = vpop.f32.mrf.mxu0  ;;  %v540_v12 = vpop.f32.mrf.mxu1 }
  0xd9   :  { %716 = vst [vmem:[%s1405_s3 + $0x20] sm:$0xff] %v652_v7  ;;  %748 = vst [vmem:[%s1405_s3 + $0x120] sm:$0xff] %v684_v8  ;;  %v655_v13 = vmax.f32 %v421_v9, 0.0  ;;  %v687_v14 = vmax.f32 %v549_v10, 0.0  ;;  %v413_v15 = vadd.f32 %v1144_v34, %v412_v11  ;;  %v541_v16 = vadd.f32 %v1144_v34, %v540_v12 }
  0xda   :  { %v895_v17 = vpop.f32.mrf.mxu0  ;;  %v927_v18 = vpop.f32.mrf.mxu1 }
  0xdb   :  { %719 = vst [vmem:[%s1405_s3 + $0x38] sm:$0xff] %v655_v13  ;;  %751 = vst [vmem:[%s1405_s3 + $0x138] sm:$0xff] %v687_v14  ;;  %v653_v19 = vmax.f32 %v413_v15, 0.0  ;;  %v685_v20 = vmax.f32 %v541_v16, 0.0  ;;  %v434_v21 = vadd.f32 %v895_v17, %v1144_v34  ;;  %v562_v22 = vadd.f32 %v927_v18, %v1144_v34 }
  0xdc   :  { %v425_v23 = vpop.f32.mrf.mxu0  ;;  %v553_v24 = vpop.f32.mrf.mxu1 }
  0xdd   :  { %717 = vst [vmem:[%s1405_s3 + $0x28] sm:$0xff] %v653_v19  ;;  %749 = vst [vmem:[%s1405_s3 + $0x128] sm:$0xff] %v685_v20  ;;  %v658_v25 = vmax.f32 %v434_v21, 0.0  ;;  %v690_v26 = vmax.f32 %v562_v22, 0.0  ;;  %v426_v27 = vadd.f32 %v1144_v34, %v425_v23  ;;  %v554_v28 = vadd.f32 %v1144_v34, %v553_v24 }
  0xde   :  { %v896_v29 = vpop.f32.mrf.mxu0  ;;  %v928_v30 = vpop.f32.mrf.mxu1 }
  0xdf   :  { %722 = vst [vmem:[%s1405_s3 + $0x50] sm:$0xff] %v658_v25  ;;  %754 = vst [vmem:[%s1405_s3 + $0x150] sm:$0xff] %v690_v26  ;;  %v656_v31 = vmax.f32 %v426_v27, 0.0  ;;  %v688_v32 = vmax.f32 %v554_v28, 0.0  ;;  %v437_v33 = vadd.f32 %v896_v29, %v1144_v34  ;;  %v565_v35 = vadd.f32 %v928_v30, %v1144_v34 }
  0xe0   :  { %v428_v36 = vpop.f32.mrf.mxu0  ;;  %v556_v37 = vpop.f32.mrf.mxu1 }
  0xe1   :  { %720 = vst [vmem:[%s1405_s3 + $0x40] sm:$0xff] %v656_v31  ;;  %752 = vst [vmem:[%s1405_s3 + $0x140] sm:$0xff] %v688_v32  ;;  %v659_v38 = vmax.f32 %v437_v33, 0.0  ;;  %v691_v39 = vmax.f32 %v565_v35, 0.0  ;;  %v429_v40 = vadd.f32 %v1144_v34, %v428_v36  ;;  %v557_v41 = vadd.f32 %v1144_v34, %v556_v37 }
  0xe2   :  { %v899_v42 = vpop.f32.mrf.mxu0  ;;  %v931_v43 = vpop.f32.mrf.mxu1 }
  0xe3   :  { %723 = vst [vmem:[%s1405_s3 + $0x58] sm:$0xff] %v659_v38  ;;  %755 = vst [vmem:[%s1405_s3 + $0x158] sm:$0xff] %v691_v39  ;;  %v657_v44 = vmax.f32 %v429_v40, 0.0  ;;  %v689_v45 = vmax.f32 %v557_v41, 0.0  ;;  %v450_v46 = vadd.f32 %v899_v42, %v1144_v34  ;;  %v578_v47 = vadd.f32 %v931_v43, %v1144_v34 }
  0xe4   :  { %v441_v48 = vpop.f32.mrf.mxu0  ;;  %v569_v49 = vpop.f32.mrf.mxu1 }
  0xe5   :  { %721 = vst [vmem:[%s1405_s3 + $0x48] sm:$0xff] %v657_v44  ;;  %753 = vst [vmem:[%s1405_s3 + $0x148] sm:$0xff] %v689_v45  ;;  %v662_v50 = vmax.f32 %v450_v46, 0.0  ;;  %v694_v51 = vmax.f32 %v578_v47, 0.0  ;;  %v442_v52 = vadd.f32 %v1144_v34, %v441_v48  ;;  %v570_v53 = vadd.f32 %v1144_v34, %v569_v49 }
  0xe6   :  { %v900_v54 = vpop.f32.mrf.mxu0  ;;  %v932_v55 = vpop.f32.mrf.mxu1 }
  0xe7   :  { %726 = vst [vmem:[%s1405_s3 + $0x70] sm:$0xff] %v662_v50  ;;  %758 = vst [vmem:[%s1405_s3 + $0x170] sm:$0xff] %v694_v51  ;;  %v660_v56 = vmax.f32 %v442_v52, 0.0  ;;  %v692_v57 = vmax.f32 %v570_v53, 0.0  ;;  %v453_v58 = vadd.f32 %v900_v54, %v1144_v34  ;;  %v581_v59 = vadd.f32 %v932_v55, %v1144_v34 }
  0xe8   :  { %v444_v60 = vpop.f32.mrf.mxu0  ;;  %v572_v61 = vpop.f32.mrf.mxu1 }
  0xe9   :  { %724 = vst [vmem:[%s1405_s3 + $0x60] sm:$0xff] %v660_v56  ;;  %756 = vst [vmem:[%s1405_s3 + $0x160] sm:$0xff] %v692_v57  ;;  %v663_v62 = vmax.f32 %v453_v58, 0.0  ;;  %v695_v63 = vmax.f32 %v581_v59, 0.0  ;;  %v445_v0 = vadd.f32 %v1144_v34, %v444_v60  ;;  %v573_v1 = vadd.f32 %v1144_v34, %v572_v61 }
  0xea   :  { %v903_v2 = vpop.f32.mrf.mxu0  ;;  %v935_v3 = vpop.f32.mrf.mxu1 }
  0xeb   :  { %727 = vst [vmem:[%s1405_s3 + $0x78] sm:$0xff] %v663_v62  ;;  %759 = vst [vmem:[%s1405_s3 + $0x178] sm:$0xff] %v695_v63  ;;  %v661_v4 = vmax.f32 %v445_v0, 0.0  ;;  %v693_v5 = vmax.f32 %v573_v1, 0.0  ;;  %v466_v6 = vadd.f32 %v903_v2, %v1144_v34  ;;  %v594_v7 = vadd.f32 %v935_v3, %v1144_v34 }
  0xec   :  { %v457_v8 = vpop.f32.mrf.mxu0  ;;  %v585_v9 = vpop.f32.mrf.mxu1 }
  0xed   :  { %725 = vst [vmem:[%s1405_s3 + $0x68] sm:$0xff] %v661_v4  ;;  %757 = vst [vmem:[%s1405_s3 + $0x168] sm:$0xff] %v693_v5  ;;  %v666_v10 = vmax.f32 %v466_v6, 0.0  ;;  %v698_v11 = vmax.f32 %v594_v7, 0.0  ;;  %v458_v12 = vadd.f32 %v1144_v34, %v457_v8  ;;  %v586_v13 = vadd.f32 %v1144_v34, %v585_v9 }
  0xee   :  { %v904_v14 = vpop.f32.mrf.mxu0  ;;  %v936_v15 = vpop.f32.mrf.mxu1 }
  0xef   :  { %730 = vst [vmem:[%s1405_s3 + $0x90] sm:$0xff] %v666_v10  ;;  %762 = vst [vmem:[%s1405_s3 + $0x190] sm:$0xff] %v698_v11  ;;  %v664_v16 = vmax.f32 %v458_v12, 0.0  ;;  %v696_v17 = vmax.f32 %v586_v13, 0.0  ;;  %v469_v18 = vadd.f32 %v904_v14, %v1144_v34  ;;  %v597_v19 = vadd.f32 %v936_v15, %v1144_v34 }
  0xf0   :  { %v460_v20 = vpop.f32.mrf.mxu0  ;;  %v588_v21 = vpop.f32.mrf.mxu1 }
  0xf1   :  { %728 = vst [vmem:[%s1405_s3 + $0x80] sm:$0xff] %v664_v16  ;;  %760 = vst [vmem:[%s1405_s3 + $0x180] sm:$0xff] %v696_v17  ;;  %v667_v22 = vmax.f32 %v469_v18, 0.0  ;;  %v699_v23 = vmax.f32 %v597_v19, 0.0  ;;  %v461_v24 = vadd.f32 %v1144_v34, %v460_v20  ;;  %v589_v25 = vadd.f32 %v1144_v34, %v588_v21 }
  0xf2   :  { %v907_v26 = vpop.f32.mrf.mxu0  ;;  %v939_v27 = vpop.f32.mrf.mxu1 }
  0xf3   :  { %731 = vst [vmem:[%s1405_s3 + $0x98] sm:$0xff] %v667_v22  ;;  %763 = vst [vmem:[%s1405_s3 + $0x198] sm:$0xff] %v699_v23  ;;  %v665_v28 = vmax.f32 %v461_v24, 0.0  ;;  %v697_v29 = vmax.f32 %v589_v25, 0.0  ;;  %v482_v30 = vadd.f32 %v907_v26, %v1144_v34  ;;  %v610_v31 = vadd.f32 %v939_v27, %v1144_v34 }
  0xf4   :  { %v473_v32 = vpop.f32.mrf.mxu0  ;;  %v601_v33 = vpop.f32.mrf.mxu1 }
  0xf5   :  { %729 = vst [vmem:[%s1405_s3 + $0x88] sm:$0xff] %v665_v28  ;;  %761 = vst [vmem:[%s1405_s3 + $0x188] sm:$0xff] %v697_v29  ;;  %v670_v35 = vmax.f32 %v482_v30, 0.0  ;;  %v702_v36 = vmax.f32 %v610_v31, 0.0  ;;  %v474_v37 = vadd.f32 %v1144_v34, %v473_v32  ;;  %v602_v38 = vadd.f32 %v1144_v34, %v601_v33 }
  0xf6   :  { %v908_v39 = vpop.f32.mrf.mxu0  ;;  %v940_v40 = vpop.f32.mrf.mxu1 }
  0xf7   :  { %734 = vst [vmem:[%s1405_s3 + $0xb0] sm:$0xff] %v670_v35  ;;  %766 = vst [vmem:[%s1405_s3 + $0x1b0] sm:$0xff] %v702_v36  ;;  %v668_v41 = vmax.f32 %v474_v37, 0.0  ;;  %v700_v42 = vmax.f32 %v602_v38, 0.0  ;;  %v485_v43 = vadd.f32 %v908_v39, %v1144_v34  ;;  %v613_v44 = vadd.f32 %v940_v40, %v1144_v34 }
  0xf8   :  { %v476_v45 = vpop.f32.mrf.mxu0  ;;  %v604_v46 = vpop.f32.mrf.mxu1 }
  0xf9   :  { %732 = vst [vmem:[%s1405_s3 + $0xa0] sm:$0xff] %v668_v41  ;;  %764 = vst [vmem:[%s1405_s3 + $0x1a0] sm:$0xff] %v700_v42  ;;  %v671_v47 = vmax.f32 %v485_v43, 0.0  ;;  %v703_v48 = vmax.f32 %v613_v44, 0.0  ;;  %v477_v49 = vadd.f32 %v1144_v34, %v476_v45  ;;  %v605_v50 = vadd.f32 %v1144_v34, %v604_v46 }
  0xfa   :  { %v911_v51 = vpop.f32.mrf.mxu0  ;;  %v943_v52 = vpop.f32.mrf.mxu1 }
  0xfb   :  { %735 = vst [vmem:[%s1405_s3 + $0xb8] sm:$0xff] %v671_v47  ;;  %767 = vst [vmem:[%s1405_s3 + $0x1b8] sm:$0xff] %v703_v48  ;;  %v669_v53 = vmax.f32 %v477_v49, 0.0  ;;  %v701_v54 = vmax.f32 %v605_v50, 0.0  ;;  %v498_v55 = vadd.f32 %v911_v51, %v1144_v34  ;;  %v626_v56 = vadd.f32 %v943_v52, %v1144_v34 }
  0xfc   :  { %v489_v57 = vpop.f32.mrf.mxu0  ;;  %v617_v58 = vpop.f32.mrf.mxu1 }
  0xfd   :  { %733 = vst [vmem:[%s1405_s3 + $0xa8] sm:$0xff] %v669_v53  ;;  %765 = vst [vmem:[%s1405_s3 + $0x1a8] sm:$0xff] %v701_v54  ;;  %v674_v59 = vmax.f32 %v498_v55, 0.0  ;;  %v706_v60 = vmax.f32 %v626_v56, 0.0  ;;  %v490_v61 = vadd.f32 %v1144_v34, %v489_v57  ;;  %v618_v62 = vadd.f32 %v1144_v34, %v617_v58 }
  0xfe   :  { %v912_v63 = vpop.f32.mrf.mxu0  ;;  %v944_v0 = vpop.f32.mrf.mxu1 }
  0xff   :  { %738 = vst [vmem:[%s1405_s3 + $0xd0] sm:$0xff] %v674_v59  ;;  %770 = vst [vmem:[%s1405_s3 + $0x1d0] sm:$0xff] %v706_v60  ;;  %v672_v1 = vmax.f32 %v490_v61, 0.0  ;;  %v704_v2 = vmax.f32 %v618_v62, 0.0  ;;  %v501_v3 = vadd.f32 %v912_v63, %v1144_v34  ;;  %v629_v4 = vadd.f32 %v944_v0, %v1144_v34 }
 0x100   :  { %v492_v5 = vpop.f32.mrf.mxu0  ;;  %v620_v6 = vpop.f32.mrf.mxu1 }
 0x101   :  { %736 = vst [vmem:[%s1405_s3 + $0xc0] sm:$0xff] %v672_v1  ;;  %768 = vst [vmem:[%s1405_s3 + $0x1c0] sm:$0xff] %v704_v2  ;;  %v675_v7 = vmax.f32 %v501_v3, 0.0  ;;  %v707_v8 = vmax.f32 %v629_v4, 0.0  ;;  %v493_v9 = vadd.f32 %v1144_v34, %v492_v5  ;;  %v621_v10 = vadd.f32 %v1144_v34, %v620_v6 }
 0x102   :  { %v915_v11 = vpop.f32.mrf.mxu0  ;;  %v947_v12 = vpop.f32.mrf.mxu1 }
 0x103   :  { %739 = vst [vmem:[%s1405_s3 + $0xd8] sm:$0xff] %v675_v7  ;;  %771 = vst [vmem:[%s1405_s3 + $0x1d8] sm:$0xff] %v707_v8  ;;  %v673_v13 = vmax.f32 %v493_v9, 0.0  ;;  %v705_v14 = vmax.f32 %v621_v10, 0.0  ;;  %v514_v15 = vadd.f32 %v915_v11, %v1144_v34  ;;  %v642_v16 = vadd.f32 %v947_v12, %v1144_v34 }
 0x104   :  { %v505_v17 = vpop.f32.mrf.mxu0  ;;  %v633_v18 = vpop.f32.mrf.mxu1 }
 0x105   :  { %737 = vst [vmem:[%s1405_s3 + $0xc8] sm:$0xff] %v673_v13  ;;  %769 = vst [vmem:[%s1405_s3 + $0x1c8] sm:$0xff] %v705_v14  ;;  %v678_v19 = vmax.f32 %v514_v15, 0.0  ;;  %v710_v20 = vmax.f32 %v642_v16, 0.0  ;;  %v506_v21 = vadd.f32 %v1144_v34, %v505_v17  ;;  %v634_v22 = vadd.f32 %v1144_v34, %v633_v18 }
 0x106   :  { %v916_v23 = vpop.f32.mrf.mxu0  ;;  %v948_v24 = vpop.f32.mrf.mxu1 }
 0x107   :  { %742 = vst [vmem:[%s1405_s3 + $0xf0] sm:$0xff] %v678_v19  ;;  %774 = vst [vmem:[%s1405_s3 + $0x1f0] sm:$0xff] %v710_v20  ;;  %v676_v25 = vmax.f32 %v506_v21, 0.0  ;;  %v708_v26 = vmax.f32 %v634_v22, 0.0  ;;  %v517_v27 = vadd.f32 %v916_v23, %v1144_v34  ;;  %v645_v28 = vadd.f32 %v948_v24, %v1144_v34 }
 0x108   :  { %v508_v29 = vpop.f32.mrf.mxu0  ;;  %v636_v30 = vpop.f32.mrf.mxu1 }
 0x109   :  { %740 = vst [vmem:[%s1405_s3 + $0xe0] sm:$0xff] %v676_v25  ;;  %772 = vst [vmem:[%s1405_s3 + $0x1e0] sm:$0xff] %v708_v26  ;;  %v679_v31 = vmax.f32 %v517_v27, 0.0  ;;  %v711_v32 = vmax.f32 %v645_v28, 0.0  ;;  %v509_v33 = vadd.f32 %v1144_v34, %v508_v29  ;;  %v637_v35 = vadd.f32 %v1144_v34, %v636_v30 }
 0x10b   :  { %743 = vst [vmem:[%s1405_s3 + $0xf8] sm:$0xff] %v679_v31  ;;  %775 = vst [vmem:[%s1405_s3 + $0x1f8] sm:$0xff] %v711_v32  ;;  %v677_v36 = vmax.f32 %v509_v33, 0.0  ;;  %v709_v37 = vmax.f32 %v637_v35, 0.0 }
 0x10d   :  { %741 = vst [vmem:[%s1405_s3 + $0xe8] sm:$0xff] %v677_v36  ;;  %773 = vst [vmem:[%s1405_s3 + $0x1e8] sm:$0xff] %v709_v37 }

// kernel: _forward_core.3
= control target key start
LH: loop header
LB: loop body
LE: loop exit
PB: predicated region body
PF: predicated region fallthrough
CT: control target
= control target key end

     0   :  { %v4731_v0 = vmov 0   ;;  %vm204_vm0 = vcmask 130048   ;;  %vm830_vm1 = vcmask 523264   ;;  %vm3578_vm2 = vmmov 0   ;;  %s4724_s1 = inlined_call_operand.vmem [shape: bf16[144,1664], index: 1, kind: input, shape index: {}]   ;;  %s4725_s0 = inlined_call_operand.vmem [shape: bf16[128,144], index: 0, kind: input, shape index: {}]   ;;  %s4726_s2 = inlined_call_operand.vmem [shape: f32[1,1664], index: 2, kind: input, shape index: {}]   ;;  %s4727_s3 = inlined_call_operand.vmem [shape: f32[64,512], index: 3, kind: input, shape index: {}]   ;;  %s4728_s4 = inlined_call_operand.vmem [shape: f32[16,128], index: 4, kind: output, shape index: {}]  }
   0x1   :  { %229 = vmatprep.subr.bf16.mxu0 %v4731_v0  ;;  %v3359_v1 = vld [vmem:[%s4724_s1 + $0x2d8] ss:$52 sps:$4 sm:$0xff]   ;;  %559 = vmatprep.mubr.bf16.mxu1 %v4731_v0  ;;  %v3360_v2 = vld [vmem:[%s4724_s1 + $0x270] ss:$52 sps:$4 sm:$0xff]   ;;  %v3361_v3 = vld [vmem:[%s4724_s1 + $0x208] ss:$52 sps:$4 sm:$0xff]  }
   0x2   :  { %230 = vmatpush1.bf16.msra.mxu0 %v3359_v1  ;;  %v3362_v4 = vld [vmem:[%s4724_s1 + $0x1a0] ss:$52 sps:$4 sm:$0xff]   ;;  %v3370_v5 = vld [vmem:[%s4725_s0 + $0x4] ss:$8 sps:$4 sm:$0xff]   ;;  %v3394_v9 = vld [vmem:[%s4724_s1 + $0x2dc] ss:$52 sps:$4 sm:$0xff]  }
   0x3   :  { %231 = vmatprep.subr.bf16.mxu0 %v4731_v0  ;;  %2763 = vmatprep.mubr.msk.bf16.mxu0 %vm204_vm0, %v3370_v5  ;;  %v3363_v6 = vld [vmem:[%s4724_s1 + $0x138] ss:$52 sps:$4 sm:$0xff]   ;;  %v3364_v7 = vld [vmem:[%s4724_s1 + $0xd0] ss:$52 sps:$4 sm:$0xff]   ;;  %v3392_v8 = vld [vmem:[%s4724_s1 + $0x2e0] ss:$52 sps:$4 sm:$0xff]  }
   0x4   :  { %v3395_v10 = vld [vmem:[%s4724_s1 + $0x278] ss:$52 sps:$4 sm:$0xff]   ;;  %v3365_v11 = vld [vmem:[%s4724_s1 + $0x68] ss:$52 sps:$4 sm:$0xff]   ;;  %527 = vmatprep.subr.bf16.mxu1 %v3392_v8  ;;  %v3398_v13 = vld [vmem:[%s4724_s1 + $0x210] ss:$52 sps:$4 sm:$0xff]  }
   0x5   :  { %528 = vmatpush1.bf16.msra.mxu1 %v3394_v9  ;;  %v3397_v12 = vld [vmem:[%s4724_s1 + $0x274] ss:$52 sps:$4 sm:$0xff]   ;;  %v3400_v15 = vld [vmem:[%s4724_s1 + $0x20c] ss:$52 sps:$4 sm:$0xff]   ;;  %v3403_v18 = vld [vmem:[%s4724_s1 + $0x1a4] ss:$52 sps:$4 sm:$0xff]  }
   0x6   :  { %232 = vmatpush1.bf16.msra.mxu0 %v3360_v2  ;;  %529 = vmatprep.subr.bf16.mxu1 %v3395_v10  ;;  %v3366_v14 = vld [vmem:[%s4724_s1] ss:$52 sps:$4 sm:$0xff]   ;;  %v3401_v16 = vld [vmem:[%s4724_s1 + $0x1a8] ss:$52 sps:$4 sm:$0xff]   ;;  %v3407_v23 = vld [vmem:[%s4724_s1 + $0xd8] ss:$52 sps:$4 sm:$0xff]  }
   0x7   :  { %233 = vmatprep.subr.bf16.mxu0 %v4731_v0  ;;  %v3367_v17 = vld [vmem:[%s4724_s1 + $0x340] ss:$52 sps:$4 sm:$0xff]   ;;  %v3406_v22 = vld [vmem:[%s4724_s1 + $0x13c] ss:$52 sps:$4 sm:$0xff]   ;;  %v3374_v25 = vld [vmem:[%s4725_s0 + $0x24] ss:$8 sps:$4 sm:$0xff]  }
   0x8   :  { %v3404_v19 = vld [vmem:[%s4724_s1 + $0x140] ss:$52 sps:$4 sm:$0xff]   ;;  %v3373_v24 = vld [vmem:[%s4725_s0 + $0x10] ss:$8 sps:$4 sm:$0xff]   ;;  %v3380_v29 = vld [vmem:[%s4725_s0 + $0x44] ss:$8 sps:$4 sm:$0xff]  }
   0x9   :  { %530 = vmatpush1.bf16.msra.mxu1 %v3397_v12  ;;  %v3368_v20 = vld [vmem:[%s4725_s0] ss:$8 sps:$4 sm:$0xff]   ;;  %v3371_v21 = vld [vmem:[%s4725_s0 + $0x14] ss:$8 sps:$4 sm:$0xff]   ;;  %v3379_v28 = vld [vmem:[%s4725_s0 + $0x30] ss:$8 sps:$4 sm:$0xff]  }
   0xa   :  { %234 = vmatpush1.bf16.msra.mxu0 %v3361_v3  ;;  %531 = vmatprep.subr.bf16.mxu1 %v3398_v13  ;;  %v3376_v26 = vld [vmem:[%s4725_s0 + $0x20] ss:$8 sps:$4 sm:$0xff]   ;;  %v3377_v27 = vld [vmem:[%s4725_s0 + $0x34] ss:$8 sps:$4 sm:$0xff]   ;;  %v3385_v32 = vld [vmem:[%s4725_s0 + $0x50] ss:$8 sps:$4 sm:$0xff]  }
   0xb   :  { %235 = vmatprep.subr.bf16.mxu0 %v4731_v0  ;;  %v3382_v30 = vld [vmem:[%s4725_s0 + $0x40] ss:$8 sps:$4 sm:$0xff]   ;;  %v3383_v31 = vld [vmem:[%s4725_s0 + $0x54] ss:$8 sps:$4 sm:$0xff]   ;;  %v3386_v33 = vld [vmem:[%s4725_s0 + $0x64] ss:$8 sps:$4 sm:$0xff]  }
   0xc   :  { %v3388_v34 = vld [vmem:[%s4725_s0 + $0x60] ss:$8 sps:$4 sm:$0xff]   ;;  %v3389_v35 = vld [vmem:[%s4725_s0 + $0x74] ss:$8 sps:$4 sm:$0xff]   ;;  %v3391_v36 = vld [vmem:[%s4725_s0 + $0x70] ss:$8 sps:$4 sm:$0xff]  }
   0xd   :  { %532 = vmatpush1.bf16.msra.mxu1 %v3400_v15  ;;  %v3409_v37 = vld [vmem:[%s4724_s1 + $0xd4] ss:$52 sps:$4 sm:$0xff]   ;;  %v3410_v38 = vld [vmem:[%s4724_s1 + $0x70] ss:$52 sps:$4 sm:$0xff]   ;;  %v3412_v39 = vld [vmem:[%s4724_s1 + $0x6c] ss:$52 sps:$4 sm:$0xff]  }
   0xe   :  { %236 = vmatpush1.bf16.msra.mxu0 %v3362_v4  ;;  %533 = vmatprep.subr.bf16.mxu1 %v3401_v16  ;;  %v3413_v40 = vld [vmem:[%s4724_s1 + $0x8] ss:$52 sps:$4 sm:$0xff]   ;;  %v3415_v41 = vld [vmem:[%s4724_s1 + $0x4] ss:$52 sps:$4 sm:$0xff]   ;;  %v3751_v43 = vld [vmem:[%s4726_s2] ss:$0 sm:$0xff] }
   0xf   :  { %237 = vmatprep.subr.bf16.mxu0 %v4731_v0  ;;  %v3416_v42 = vld [vmem:[%s4724_s1 + $0x2e4] ss:$52 sps:$4 sm:$0xff]   ;;  %v3417_v54 = vld [vmem:[%s4724_s1 + $0x27c] ss:$52 sps:$4 sm:$0xff]   ;;  %v3418_v59 = vld [vmem:[%s4724_s1 + $0x214] ss:$52 sps:$4 sm:$0xff]  }
  0x10   :  { %v3419_v2 = vld [vmem:[%s4724_s1 + $0x1ac] ss:$52 sps:$4 sm:$0xff]   ;;  %v3421_v13 = vld [vmem:[%s4724_s1 + $0xdc] ss:$52 sps:$4 sm:$0xff]  }
  0x11   :  { %534 = vmatpush1.bf16.msra.mxu1 %v3403_v18  ;;  %v3422_v18 = vld [vmem:[%s4724_s1 + $0x74] ss:$52 sps:$4 sm:$0xff]  }
  0x12   :  { %238 = vmatpush1.bf16.msra.mxu0 %v3363_v6  ;;  %535 = vmatprep.subr.bf16.mxu1 %v3404_v19 }
  0x13   :  { %239 = vmatprep.subr.bf16.mxu0 %v4731_v0 }
  0x15   :  { %536 = vmatpush1.bf16.msra.mxu1 %v3406_v22 }
  0x16   :  { %240 = vmatpush1.bf16.msra.mxu0 %v3364_v7  ;;  %537 = vmatprep.subr.bf16.mxu1 %v3407_v23  ;;  %v3420_v7 = vld [vmem:[%s4724_s1 + $0x144] ss:$52 sps:$4 sm:$0xff]  }
  0x17   :  { %241 = vmatprep.subr.bf16.mxu0 %v4731_v0 }
  0x19   :  { %538 = vmatpush1.bf16.msra.mxu1 %v3409_v37 }
  0x1a   :  { %242 = vmatpush1.bf16.msra.mxu0 %v3365_v11  ;;  %539 = vmatprep.subr.bf16.mxu1 %v3410_v38 }
  0x1b   :  { %243 = vmatprep.subr.bf16.mxu0 %v4731_v0 }
  0x1d   :  { %540 = vmatpush1.bf16.msra.mxu1 %v3412_v39 }
  0x1e   :  { %244 = vmatpush1.bf16.msra.mxu0 %v3366_v14  ;;  %541 = vmatprep.subr.bf16.mxu1 %v3413_v40 }
  0x1f   :  { %259 = vmatprep.subr.bf16.mxu0 %v4731_v0 }
  0x21   :  { %542 = vmatpush1.bf16.msra.mxu1 %v3415_v41 }
  0x22   :  { %260 = vmatpush2.bf16.msra.mxu0 %v3367_v17  ;;  %3036 = vmatprep.subr.bf16.mxu1 %v3416_v42 }
  0x25   :  { %262 = vmatmul.mubr.bf16.vlgmr.msra.gmra.mxu0 %v3368_v20 }
  0x26   :  { %2764 = vmatprep.mubr.msk.bf16.mxu0 %vm204_vm0, %v3371_v21 }
  0x2d   :  { %270 = vmatmul.mubr.bf16.gmra.mxu0 %v3373_v24  ;;  %v3423_v24 = vld [vmem:[%s4724_s1 + $0xc] ss:$52 sps:$4 sm:$0xff]  }
  0x2e   :  { %2765 = vmatprep.mubr.msk.bf16.mxu0 %vm204_vm0, %v3374_v25 }
  0x35   :  { %278 = vmatmul.mubr.bf16.gmra.mxu0 %v3376_v26 }
  0x36   :  { %2766 = vmatprep.mubr.msk.bf16.mxu0 %vm204_vm0, %v3377_v27 }
  0x3d   :  { %286 = vmatmul.mubr.bf16.gmra.mxu0 %v3379_v28 }
  0x3e   :  { %2767 = vmatprep.mubr.msk.bf16.mxu0 %vm204_vm0, %v3380_v29 }
  0x45   :  { %294 = vmatmul.mubr.bf16.gmra.mxu0 %v3382_v30 }
  0x46   :  { %2768 = vmatprep.mubr.msk.bf16.mxu0 %vm204_vm0, %v3383_v31 }
  0x4d   :  { %302 = vmatmul.mubr.bf16.gmra.mxu0 %v3385_v32 }
  0x4e   :  { %2769 = vmatprep.mubr.msk.bf16.mxu0 %vm204_vm0, %v3386_v33 }
  0x55   :  { %310 = vmatmul.mubr.bf16.gmra.mxu0 %v3388_v34 }
  0x56   :  { %2770 = vmatprep.mubr.msk.bf16.mxu0 %vm204_vm0, %v3389_v35 }
  0x5d   :  { %318 = vmatmul.mubr.bf16.gmra.mxu0 %v3391_v36 }
  0xe5   :  { %v263_v44 = vpop.f32.mrf.mxu0 }
  0xe6   :  { %v3754_v46 = vadd.f32 %v3751_v43, %v263_v44 }
  0xe7   :  { %v265_v45 = vpop.f32.mrf.mxu0 }
  0xe8   :  { %v4747_v50 = vmax.f32 %v3754_v46, 0.0 }
  0xe9   :  { %v266_v47 = vpop.f32.mrf.mxu0 }
  0xea   :  { %v3757_v48 = vadd.f32 %v3751_v43, %v266_v47 }
  0xeb   :  { %v268_v49 = vpop.f32.mrf.mxu0 }
  0xec   :  { %v4746_v51 = vmax.f32 %v3757_v48, 0.0 }
  0xed   :  { %v271_v52 = vpop.f32.mrf.mxu0 }
  0xee   :  { %v3765_v53 = vpack.c.bf16 %v4746_v51, %v4747_v50  ;;  %v3771_v56 = vadd.f32 %v3751_v43, %v271_v52 }
  0xef   :  { %v273_v55 = vpop.f32.mrf.mxu0 }
  0xf0   :  { %560 = vmatmul.mubr.bf16.vlgmr.msra.gmra.mxu1 %v3765_v53  ;;  %v4745_v61 = vmax.f32 %v3771_v56, 0.0 }
  0xf1   :  { %v274_v57 = vpop.f32.mrf.mxu0  ;;  %569 = vmatprep.mubr.bf16.mxu1 %v4731_v0  ;;  %3037 = vmatpush3.bf16.msra.mxu1 %v3416_v42 }
  0xf2   :  { %v3776_v58 = vadd.f32 %v3751_v43, %v274_v57  ;;  %3038 = vmatprep.subr.bf16.mxu1 %v3417_v54 }
  0xf3   :  { %v276_v60 = vpop.f32.mrf.mxu0 }
  0xf4   :  { %v4748_v62 = vmax.f32 %v3776_v58, 0.0 }
  0xf5   :  { %v279_v63 = vpop.f32.mrf.mxu0  ;;  %3039 = vmatpush3.bf16.msra.mxu1 %v3417_v54 }
  0xf6   :  { %v3787_v1 = vpack.c.bf16 %v4748_v62, %v4745_v61  ;;  %3040 = vmatprep.subr.bf16.mxu1 %v3418_v59  ;;  %v3793_v4 = vadd.f32 %v3751_v43, %v279_v63 }
  0xf7   :  { %v281_v3 = vpop.f32.mrf.mxu0 }
  0xf8   :  { %570 = vmatmul.mubr.bf16.gmra.mxu1 %v3787_v1  ;;  %v4743_v9 = vmax.f32 %v3793_v4, 0.0 }
  0xf9   :  { %v282_v5 = vpop.f32.mrf.mxu0  ;;  %579 = vmatprep.mubr.bf16.mxu1 %v4731_v0  ;;  %3041 = vmatpush3.bf16.msra.mxu1 %v3418_v59 }
  0xfa   :  { %v3798_v6 = vadd.f32 %v3751_v43, %v282_v5  ;;  %3042 = vmatprep.subr.bf16.mxu1 %v3419_v2 }
  0xfb   :  { %v284_v8 = vpop.f32.mrf.mxu0 }
  0xfc   :  { %v4742_v10 = vmax.f32 %v3798_v6, 0.0 }
  0xfd   :  { %v287_v11 = vpop.f32.mrf.mxu0  ;;  %3043 = vmatpush3.bf16.msra.mxu1 %v3419_v2 }
  0xfe   :  { %v3809_v12 = vpack.c.bf16 %v4742_v10, %v4743_v9  ;;  %3044 = vmatprep.subr.bf16.mxu1 %v3420_v7  ;;  %v3815_v15 = vadd.f32 %v3751_v43, %v287_v11 }
  0xff   :  { %v289_v14 = vpop.f32.mrf.mxu0 }
 0x100   :  { %580 = vmatmul.mubr.bf16.gmra.mxu1 %v3809_v12  ;;  %v4741_v20 = vmax.f32 %v3815_v15, 0.0 }
 0x101   :  { %v290_v16 = vpop.f32.mrf.mxu0  ;;  %589 = vmatprep.mubr.bf16.mxu1 %v4731_v0  ;;  %3045 = vmatpush3.bf16.msra.mxu1 %v3420_v7 }
 0x102   :  { %v3820_v17 = vadd.f32 %v3751_v43, %v290_v16  ;;  %3046 = vmatprep.subr.bf16.mxu1 %v3421_v13  ;;  %v3895_v16 = vld [vmem:[%s4726_s2 + $0x1] sm:$0x7] }
 0x103   :  { %v292_v19 = vpop.f32.mrf.mxu0 }
 0x104   :  { %v4744_v21 = vmax.f32 %v3820_v17, 0.0  ;;  %v18_v19 = vld [vmem:[%s4727_s3] sm:$0xff] }
 0x105   :  { %v295_v22 = vpop.f32.mrf.mxu0  ;;  %3047 = vmatpush3.bf16.msra.mxu1 %v3421_v13 }
 0x106   :  { %v345_v23 = vpack.c.bf16 %v4744_v21, %v4741_v20  ;;  %3048 = vmatprep.subr.bf16.mxu1 %v3422_v18  ;;  %v3835_v26 = vadd.f32 %v3751_v43, %v295_v22  ;;  %v19_v22 = vld [vmem:[%s4727_s3 + $0x20] sm:$0xff] }
 0x107   :  { %v297_v25 = vpop.f32.mrf.mxu0  ;;  %v4036_v20 = vld [vmem:[%s4727_s3 + $0x80] sm:$0xff] }
 0x108   :  { %590 = vmatmul.mubr.bf16.gmra.mxu1 %v345_v23  ;;  %v4739_v30 = vmax.f32 %v3835_v26, 0.0 }
 0x109   :  { %v298_v27 = vpop.f32.mrf.mxu0  ;;  %599 = vmatprep.mubr.bf16.mxu1 %v4731_v0  ;;  %3049 = vmatpush3.bf16.msra.mxu1 %v3422_v18 }
 0x10a   :  { %v3839_v28 = vadd.f32 %v3751_v43, %v298_v27  ;;  %3050 = vmatprep.subr.bf16.mxu1 %v3423_v24 }
 0x10b   :  { %v300_v29 = vpop.f32.mrf.mxu0 }
 0x10c   :  { %v4738_v31 = vmax.f32 %v3839_v28, 0.0 }
 0x10d   :  { %v303_v32 = vpop.f32.mrf.mxu0  ;;  %3051 = vmatpush3.bf16.msra.mxu1 %v3423_v24 }
 0x10e   :  { %v346_v33 = vpack.c.bf16 %v4738_v31, %v4739_v30  ;;  %v3848_v35 = vadd.f32 %v3751_v43, %v303_v32  ;;  %v4010_v31 = vld [vmem:[%s4727_s3 + $0x60] sm:$0xff] }
 0x10f   :  { %v305_v34 = vpop.f32.mrf.mxu0  ;;  %v4028_v30 = vld [vmem:[%s4727_s3 + $0x40] sm:$0xff] }
 0x110   :  { %600 = vmatmul.mubr.bf16.gmra.mxu1 %v346_v33  ;;  %v4737_v39 = vmax.f32 %v3848_v35, 0.0 }
 0x111   :  { %v306_v36 = vpop.f32.mrf.mxu0  ;;  %609 = vmatprep.mubr.bf16.mxu1 %v4731_v0 }
 0x112   :  { %v3852_v37 = vadd.f32 %v3751_v43, %v306_v36 }
 0x113   :  { %v308_v38 = vpop.f32.mrf.mxu0 }
 0x114   :  { %v4740_v40 = vmax.f32 %v3852_v37, 0.0 }
 0x115   :  { %v311_v41 = vpop.f32.mrf.mxu0 }
 0x116   :  { %v347_v42 = vpack.c.bf16 %v4740_v40, %v4737_v39  ;;  %v3861_v45 = vadd.f32 %v3751_v43, %v311_v41 }
 0x117   :  { %v313_v44 = vpop.f32.mrf.mxu0 }
 0x118   :  { %610 = vmatmul.mubr.bf16.gmra.mxu1 %v347_v42  ;;  %v4735_v54 = vmax.f32 %v3861_v45, 0.0 }
 0x119   :  { %v314_v47 = vpop.f32.mrf.mxu0  ;;  %619 = vmatprep.mubr.bf16.mxu1 %v4731_v0 }
 0x11a   :  { %v3865_v49 = vadd.f32 %v3751_v43, %v314_v47 }
 0x11b   :  { %v316_v52 = vpop.f32.mrf.mxu0 }
 0x11c   :  { %v4734_v55 = vmax.f32 %v3865_v49, 0.0 }
 0x11d   :  { %v319_v57 = vpop.f32.mrf.mxu0 }
 0x11e   :  { %v348_v59 = vpack.c.bf16 %v4734_v55, %v4735_v54  ;;  %v3874_v63 = vadd.f32 %v3751_v43, %v319_v57 }
 0x11f   :  { %v321_v60 = vpop.f32.mrf.mxu0 }
 0x120   :  { %620 = vmatmul.mubr.bf16.gmra.mxu1 %v348_v59  ;;  %v4733_v7 = vmax.f32 %v3874_v63, 0.0 }
 0x121   :  { %v322_v2 = vpop.f32.mrf.mxu0  ;;  %629 = vmatprep.mubr.bf16.mxu1 %v4731_v0 }
 0x122   :  { %v3878_v3 = vadd.f32 %v3751_v43, %v322_v2  ;;  %v384_v43 = vlaneseq }
 0x123   :  { %v324_v5 = vpop.f32.mrf.mxu0 }
 0x124   :  { %v4736_v8 = vmax.f32 %v3878_v3, 0.0  ;;  %v3889_v13 = vshrl.u32 %v384_v43, 7  ;;  %v3935_v43 = vld [vmem:[%s4727_s3 + $0xa8] sm:$0xff] }
 0x126   :  { %v349_v11 = vpack.c.bf16 %v4736_v8, %v4733_v7  ;;  %v4729_v14 = vsub.s32 0, %v3889_v13  ;;  %v4730_v52 = vsub.s32 1, %v3889_v13 }
 0x128   :  { %630 = vmatmul.mubr.bf16.gmra.mxu1 %v349_v11  ;;  %v3926_v60 = vrot.slane %v3895_v16, %v4730_v52 }
 0x129   :  { %3052 = vmatprep.mubr.bf16.mxu1 %v3765_v53  ;;  %v3900_v53 = vrot.slane %v3895_v16, %v4729_v14 }
 0x130   :  { %3053 = vmatmul.mubr.bf16.vlgmr.msra.gmra.mxu1 %v3787_v1 }
 0x131   :  { %3056 = vmatprep.mubr.bf16.mxu1 %v3809_v12 }
 0x138   :  { %3057 = vmatmul.mubr.bf16.gmra.mxu1 %v345_v23 }
 0x139   :  { %3060 = vmatprep.mubr.bf16.mxu1 %v346_v33 }
 0x140   :  { %3061 = vmatmul.mubr.bf16.gmra.mxu1 %v347_v42 }
 0x141   :  { %3064 = vmatprep.mubr.bf16.mxu1 %v348_v59 }
 0x148   :  { %3065 = vmatmul.mubr.bf16.gmra.mxu1 %v349_v11 }
 0x1b0   :  { %v561_v1 = vpop.f32.mrf.mxu1 }
 0x1b1   :  { %v562_v18 = vadd.f32 %v561_v1, %v3900_v53  ;;  %v3940_v1 = vld [vmem:[%s4727_s3 + $0xc8] sm:$0xff] }
 0x1b2   :  { %v3902_v12 = vpop.f32.mrf.mxu1 }
 0x1b3   :  { %v737_v27 = vadd.f32 %v562_v18, %v18_v19  ;;  %v3945_v18 = vld [vmem:[%s4727_s3 + $0xe8] sm:$0xff] }
 0x1b4   :  { %v565_v23 = vpop.f32.mrf.mxu1 }
 0x1b5   :  { %v566_v24 = vadd.f32 %v565_v23, %v3900_v53 }
 0x1b6   :  { %v567_v25 = vpop.f32.mrf.mxu1 }
 0x1b7   :  { %v738_v29 = vadd.f32 %v566_v24, %v19_v22 }
 0x1b8   :  { %v3912_v32 = vpop.f32.mrf.mxu1 }
 0x1b9   :  { %v745_v33 = vpack.c.bf16 %v738_v29, %v737_v27  ;;  %v3952_v29 = vld [vmem:[%s4727_s3 + $0x88] sm:$0xff] }
 0x1ba   :  { %v573_v34 = vpop.f32.mrf.mxu1 }
 0x1bb   :  { %3076 = vmatprep.mubr.bf16.mxu0 %v745_v33 }
 0x1bc   :  { %v3914_v36 = vpop.f32.mrf.mxu1 }
 0x1bd   :  { %v576_v39 = vadd.f32 %v3914_v36, %v3900_v53 }
 0x1be   :  { %v577_v38 = vpop.f32.mrf.mxu1 }
 0x1bf   :  { %v578_v55 = vadd.f32 %v577_v38, %v3926_v60 }
 0x1c0   :  { %v3916_v41 = vpop.f32.mrf.mxu1 }
 0x1c2   :  { %v583_v42 = vpop.f32.mrf.mxu1 }
 0x1c3   :  { %v584_v24 = vadd.f32 %v583_v42, %v3926_v60 }
 0x1c4   :  { %v3918_v44 = vpop.f32.mrf.mxu1 }
 0x1c5   :  { %v753_v0 = vadd.f32 %v584_v24, %v3952_v29  ;;  %v574_v24 = vadd.f32 %v573_v34, %v3926_v60 }
 0x1c6   :  { %v587_v47 = vpop.f32.mrf.mxu1 }
 0x1c7   :  { %v588_v5 = vadd.f32 %v587_v47, %v3926_v60 }
 0x1c8   :  { %v3921_v57 = vpop.f32.mrf.mxu1 }
 0x1c9   :  { %v754_v47 = vadd.f32 %v588_v5, %v3935_v43  ;;  %v3966_v5 = vld [vmem:[%s4727_s3 + $0x68] sm:$0xff] }
 0x1ca   :  { %v593_v59 = vpop.f32.mrf.mxu1 }
 0x1cb   :  { %v594_v11 = vadd.f32 %v593_v59, %v3926_v60  ;;  %v759_v8 = vpack.c.bf16 %v754_v47, %v753_v0  ;;  %v752_v0 = vadd.f32 %v578_v55, %v3966_v5  ;;  %v564_v55 = vadd.f32 %v3902_v12, %v3926_v60 }
 0x1cc   :  { %v3928_v2 = vpop.f32.mrf.mxu1 }
 0x1cd   :  { %v755_v59 = vadd.f32 %v594_v11, %v3940_v1 }
 0x1ce   :  { %v597_v23 = vpop.f32.mrf.mxu1 }
 0x1cf   :  { %v598_v27 = vadd.f32 %v597_v23, %v3926_v60 }
 0x1d0   :  { %v601_v33 = vpop.f32.mrf.mxu1 }
 0x1d1   :  { %v756_v14 = vadd.f32 %v598_v27, %v3945_v18  ;;  %v602_v42 = vadd.f32 %v601_v33, %v3900_v53 }
 0x1d2   :  { %v3957_v52 = vpop.f32.mrf.mxu1 }
 0x1d3   :  { %v760_v7 = vpack.c.bf16 %v756_v14, %v755_v59  ;;  %v1000_v27 = vadd.f32 %v602_v42, %v18_v19  ;;  %v3974_v14 = vld [vmem:[%s4727_s3 + $0x48] sm:$0xff] }
 0x1d4   :  { %v605_v23 = vpop.f32.mrf.mxu1  ;;  %v3995_v42 = vld [vmem:[%s4727_s3 + $0x8] sm:$0xff] }
 0x1d5   :  { %v606_v54 = vadd.f32 %v605_v23, %v3900_v53  ;;  %3068 = vmatprep.subr.bf16.mxu0 %v760_v7  ;;  %v751_v23 = vadd.f32 %v574_v24, %v3974_v14 }
 0x1d6   :  { %v3968_v11 = vpop.f32.mrf.mxu1  ;;  %3069 = vmatpush3.bf16.xpose.msra.mxu0 %v760_v7 }
 0x1d7   :  { %v1001_v33 = vadd.f32 %v606_v54, %v19_v22  ;;  %3070 = vmatprep.subr.bf16.mxu0 %v759_v8  ;;  %v568_v54 = vadd.f32 %v567_v25, %v3926_v60  ;;  %v758_v19 = vpack.c.bf16 %v752_v0, %v751_v23  ;;  %v3988_v22 = vld [vmem:[%s4727_s3 + $0x28] sm:$0xff] }
 0x1d8   :  { %v3976_v38 = vpop.f32.mrf.mxu1 }
 0x1d9   :  { %v1008_v47 = vpack.c.bf16 %v1001_v33, %v1000_v27  ;;  %v750_v25 = vadd.f32 %v568_v54, %v3988_v22  ;;  %v749_v33 = vadd.f32 %v564_v55, %v3995_v42  ;;  %v586_v54 = vadd.f32 %v3918_v44, %v3900_v53 }
 0x1da   :  { %v3979_v59 = vpop.f32.mrf.mxu1  ;;  %v582_v44 = vadd.f32 %v3916_v41, %v3900_v53 }
 0x1db   :  { %3108 = vmatprep.mubr.bf16.mxu1 %v1008_v47  ;;  %v757_v47 = vpack.c.bf16 %v750_v25, %v749_v33  ;;  %v4021_v25 = vld [vmem:[%s4727_s3 + $0xa0] sm:$0xff] }
 0x1dc   :  { %v3982_v7 = vpop.f32.mrf.mxu1  ;;  %v742_v10 = vadd.f32 %v586_v54, %v4021_v25  ;;  %v741_v61 = vadd.f32 %v582_v44, %v4036_v20  ;;  %v4052_v54 = vld [vmem:[%s4727_s3 + $0xe0] sm:$0xff] }
 0x1de   :  { %v617_v34 = vpop.f32.mrf.mxu1  ;;  %3071 = vmatpush3.bf16.xpose.msra.mxu0 %v759_v8 }
 0x1df   :  { %3072 = vmatprep.subr.bf16.mxu0 %v758_v19 }
 0x1e0   :  { %v3997_v24 = vpop.f32.mrf.mxu1 }
 0x1e2   :  { %v623_v27 = vpop.f32.mrf.mxu1 }
 0x1e4   :  { %v4001_v0 = vpop.f32.mrf.mxu1 }
 0x1e6   :  { %v627_v8 = vpop.f32.mrf.mxu1  ;;  %3073 = vmatpush3.bf16.xpose.msra.mxu0 %v758_v19  ;;  %v572_v19 = vadd.f32 %v3912_v32, %v3900_v53  ;;  %v740_v32 = vadd.f32 %v576_v39, %v4010_v31 }
 0x1e7   :  { %3074 = vmatprep.subr.bf16.mxu0 %v757_v47  ;;  %v628_v36 = vadd.f32 %v627_v8, %v3926_v60  ;;  %v624_v8 = vadd.f32 %v623_v27, %v3926_v60  ;;  %v596_v27 = vadd.f32 %v3928_v2, %v3900_v53  ;;  %v4060_v2 = vld [vmem:[%s4727_s3 + $0xc0] sm:$0xff] }
 0x1e8   :  { %v4003_v12 = vpop.f32.mrf.mxu1  ;;  %v739_v21 = vadd.f32 %v572_v19, %v4028_v30  ;;  %v747_v19 = vpack.c.bf16 %v742_v10, %v741_v61  ;;  %v614_v61 = vadd.f32 %v3979_v59, %v3926_v60  ;;  %v394_v10 = vsub.s32 2, %v3889_v13 }
 0x1e9   :  { %v1017_v41 = vadd.f32 %v628_v36, %v3935_v43  ;;  %v744_v36 = vadd.f32 %v596_v27, %v4052_v54  ;;  %v604_v27 = vadd.f32 %v3957_v52, %v3926_v60 }
 0x1ea   :  { %v633_v23 = vpop.f32.mrf.mxu1  ;;  %v746_v50 = vpack.c.bf16 %v740_v32, %v739_v21  ;;  %v1014_v44 = vadd.f32 %v614_v61, %v3974_v14  ;;  %v395_v32 = vrot.slane %v3895_v16, %v394_v10 }
 0x1eb   :  { %v634_v33 = vadd.f32 %v633_v23, %v3926_v60  ;;  %v1012_v61 = vadd.f32 %v604_v27, %v3995_v42  ;;  %v622_v27 = vadd.f32 %v3997_v24, %v3900_v53 }
 0x1ec   :  { %v4014_v55 = vpop.f32.mrf.mxu1 }
 0x1ed   :  { %v636_v24 = vadd.f32 %v4014_v55, %v3900_v53 }
 0x1ee   :  { %v637_v40 = vpop.f32.mrf.mxu1  ;;  %3075 = vmatpush3.bf16.xpose.msra.mxu0 %v757_v47  ;;  %v1018_v47 = vadd.f32 %v634_v33, %v3940_v1  ;;  %v592_v1 = vadd.f32 %v3921_v57, %v3900_v53 }
 0x1ef   :  { %v638_v23 = vadd.f32 %v637_v40, %v3926_v60  ;;  %v1016_v40 = vadd.f32 %v624_v8, %v3952_v29 }
 0x1f0   :  { %v3054_v9 = vpop.f32.mrf.mxu1 }
 0x1f1   :  { %v1019_v39 = vadd.f32 %v638_v23, %v3945_v18  ;;  %v618_v18 = vadd.f32 %v617_v34, %v3926_v60  ;;  %v1022_v21 = vpack.c.bf16 %v1017_v41, %v1016_v40  ;;  %v608_v23 = vadd.f32 %v3968_v11, %v3926_v60 }
 0x1f2   :  { %v674_v51 = vpop.f32.mrf.mxu1  ;;  %v683_v10 = vadd.f32 %v3054_v9, %v395_v32 }
 0x1f3   :  { %v1023_v62 = vpack.c.bf16 %v1019_v39, %v1018_v47  ;;  %v1015_v34 = vadd.f32 %v618_v18, %v3966_v5  ;;  %v1013_v16 = vadd.f32 %v608_v23, %v3988_v22  ;;  %v675_v22 = vadd.f32 %v674_v51, %v395_v32 }
 0x1f4   :  { %v3055_v43 = vpop.f32.mrf.mxu1 }
 0x1f5   :  { %3077 = vmatmul.mubr.bf16.vlgmr.msra.gmra.mxu0 %v746_v50  ;;  %3100 = vmatprep.subr.bf16.mxu1 %v1023_v62  ;;  %v743_v50 = vadd.f32 %v592_v1, %v4060_v2  ;;  %v1021_v47 = vpack.c.bf16 %v1015_v34, %v1014_v44  ;;  %v686_v1 = vadd.f32 %v3055_v43, %v395_v32 }
 0x1f6   :  { %v677_v29 = vpop.f32.mrf.mxu1  ;;  %3080 = vmatprep.mubr.bf16.mxu0 %v747_v19  ;;  %3101 = vmatpush3.bf16.xpose.msra.mxu1 %v1023_v62  ;;  %v1020_v34 = vpack.c.bf16 %v1013_v16, %v1012_v61 }
 0x1f7   :  { %3102 = vmatprep.subr.bf16.mxu1 %v1022_v21  ;;  %v748_v8 = vpack.c.bf16 %v744_v36, %v743_v50  ;;  %v762_v52 = vpack.c.bf16 %v686_v1, %v683_v10  ;;  %v678_v60 = vadd.f32 %v677_v29, %v395_v32  ;;  %v616_v29 = vadd.f32 %v3982_v7, %v3900_v53 }
 0x1f8   :  { %v3058_v57 = vpop.f32.mrf.mxu1 }
 0x1f9   :  { %v699_v41 = vadd.f32 %v3058_v57, %v395_v32 }
 0x1fa   :  { %v690_v33 = vpop.f32.mrf.mxu1 }
 0x1fb   :  { %v691_v5 = vadd.f32 %v690_v33, %v395_v32 }
 0x1fc   :  { %v3059_v62 = vpop.f32.mrf.mxu1 }
 0x1fd   :  { %v702_v59 = vadd.f32 %v3059_v62, %v395_v32  ;;  %3081 = vmatmul.mubr.bf16.gmra.mxu0 %v748_v8  ;;  %v761_v62 = vpack.c.bf16 %v678_v60, %v675_v22 }
 0x1fe   :  { %v693_v39 = vpop.f32.mrf.mxu1  ;;  %3103 = vmatpush3.bf16.xpose.msra.mxu1 %v1022_v21 }
 0x1ff   :  { %v764_v40 = vpack.c.bf16 %v702_v59, %v699_v41  ;;  %v694_v19 = vadd.f32 %v693_v39, %v395_v32  ;;  %3104 = vmatprep.subr.bf16.mxu1 %v1021_v47  ;;  %v626_v41 = vadd.f32 %v4001_v0, %v3900_v53  ;;  %v612_v59 = vadd.f32 %v3976_v38, %v3900_v53 }
 0x200   :  { %v3062_v14 = vpop.f32.mrf.mxu1  ;;  %v1004_v38 = vadd.f32 %v622_v27, %v4036_v20 }
 0x201   :  { %v763_v18 = vpack.c.bf16 %v694_v19, %v691_v5  ;;  %v715_v36 = vadd.f32 %v3062_v14, %v395_v32  ;;  %3084 = vmatprep.subr.bf16.mxu0 %v764_v40  ;;  %v1005_v14 = vadd.f32 %v626_v41, %v4021_v25  ;;  %v1002_v0 = vadd.f32 %v612_v59, %v4028_v30 }
 0x202   :  { %v706_v11 = vpop.f32.mrf.mxu1  ;;  %3085 = vmatpush3.bf16.msra.mxu0 %v764_v40  ;;  %v1003_v40 = vadd.f32 %v616_v29, %v4010_v31  ;;  %v632_v31 = vadd.f32 %v4003_v12, %v3900_v53  ;;  %v1007_v25 = vadd.f32 %v636_v24, %v4052_v54 }
 0x203   :  { %v707_v21 = vadd.f32 %v706_v11, %v395_v32  ;;  %3086 = vmatprep.subr.bf16.mxu0 %v763_v18 }
 0x204   :  { %v3063_v57 = vpop.f32.mrf.mxu1  ;;  %v1009_v1 = vpack.c.bf16 %v1003_v40, %v1002_v0  ;;  %v1006_v30 = vadd.f32 %v632_v31, %v4060_v2 }
 0x205   :  { %v718_v50 = vadd.f32 %v3063_v57, %v395_v32 }
 0x206   :  { %v709_v33 = vpop.f32.mrf.mxu1  ;;  %3087 = vmatpush3.bf16.msra.mxu0 %v763_v18  ;;  %3105 = vmatpush3.bf16.xpose.msra.mxu1 %v1021_v47  ;;  %v1010_v18 = vpack.c.bf16 %v1005_v14, %v1004_v38 }
 0x207   :  { %v4076_v43 = vpack.c.bf16 %v718_v50, %v715_v36  ;;  %v710_v44 = vadd.f32 %v709_v33, %v395_v32  ;;  %3088 = vmatprep.subr.bf16.mxu0 %v762_v52  ;;  %3106 = vmatprep.subr.bf16.mxu1 %v1020_v34 }
 0x208   :  { %v3066_v8 = vpop.f32.mrf.mxu1 }
 0x209   :  { %v4078_v42 = vpack.c.bf16 %v710_v44, %v707_v21  ;;  %v731_v47 = vadd.f32 %v3066_v8, %v395_v32 }
 0x20a   :  { %v722_v9 = vpop.f32.mrf.mxu1  ;;  %3089 = vmatpush3.bf16.msra.mxu0 %v762_v52 }
 0x20b   :  { %v723_v23 = vadd.f32 %v722_v9, %v395_v32  ;;  %3090 = vmatprep.subr.bf16.mxu0 %v761_v62 }
 0x20c   :  { %v3067_v51 = vpop.f32.mrf.mxu1 }
 0x20d   :  { %v734_v39 = vadd.f32 %v3067_v51, %v395_v32 }
 0x20e   :  { %v725_v5 = vpop.f32.mrf.mxu1  ;;  %3091 = vmatpush3.bf16.msra.mxu0 %v761_v62  ;;  %3107 = vmatpush3.bf16.xpose.msra.mxu1 %v1020_v34 }
 0x20f   :  { %v4089_v7 = vpack.c.bf16 %v734_v39, %v731_v47  ;;  %v726_v19 = vadd.f32 %v725_v5, %v395_v32  ;;  %v1011_v32 = vpack.c.bf16 %v1007_v25, %v1006_v30 }
 0x211   :  { %v4093_v16 = vpack.c.bf16 %v726_v19, %v723_v23  ;;  %3116 = vmatprep.subr.bf16.mxu0 %v4089_v7 }
 0x215   :  { %3109 = vmatmul.mubr.bf16.vlgmr.msra.gmra.mxu1 %v1009_v1 }
 0x216   :  { %3112 = vmatprep.mubr.bf16.mxu1 %v1010_v18 }
 0x21d   :  { %3113 = vmatmul.mubr.bf16.gmra.mxu1 %v1011_v32 }
 0x2b5   :  { %v3078_v36 = vpop.f32.mrf.mxu0 }
 0x2b6   :  { %v837_v20 = vsel %vm830_vm1, %v3078_v36, -inf }
 0x2b7   :  { %838 = vmax.xlane.f32.xlu1 %v837_v20  ;;  %v799_v11 = vpop.f32.mrf.mxu0 }
 0x2b8   :  { %v831_v55 = vsel %vm830_vm1, %v799_v11, -inf }
 0x2b9   :  { %832 = vmax.xlane.f32.xlu0 %v831_v55  ;;  %v3079_v61 = vpop.f32.mrf.mxu0 }
 0x2ba   :  { %v840_v53 = vsel %vm830_vm1, %v3079_v61, -inf }
 0x2bb   :  { %841 = vmax.xlane.f32.xlu1 %v840_v53  ;;  %v802_v12 = vpop.f32.mrf.mxu0 }
 0x2bc   :  { %v834_v54 = vsel %vm830_vm1, %v802_v12, -inf }
 0x2bd   :  { %835 = vmax.xlane.f32.xlu0 %v834_v54  ;;  %v3082_v2 = vpop.f32.mrf.mxu0 }
 0x2be   :  { %v849_v60 = vsel %vm830_vm1, %v3082_v2, -inf }
 0x2bf   :  { %v815_v10 = vpop.f32.mrf.mxu0 }
 0x2c0   :  { %v843_v21 = vsel %vm830_vm1, %v815_v10, -inf }
 0x2c1   :  { %844 = vmax.xlane.f32.xlu0 %v843_v21  ;;  %v4108_v57 = vpop.f32.mrf.mxu0 }
 0x2c2   :  { %v852_v34 = vsel %vm830_vm1, %v4108_v57, -inf }
 0x2c3   :  { %v818_v52 = vpop.f32.mrf.mxu0 }
 0x2c4   :  { %v846_v50 = vsel %vm830_vm1, %v818_v52, -inf }
 0x2c5   :  { %850 = vmax.xlane.f32.xlu0 %v849_v60  ;;  %847 = vmax.xlane.f32.xlu1 %v846_v50 }
 0x2c9   :  { %853 = vmax.xlane.f32.xlu1 %v852_v34 }
 0x2d5   :  { %v4114_v33 = vpop.f32.mrf.mxu1 }
 0x2d6   :  { %v1099_v9 = vsel %vm830_vm1, %v4114_v33, -inf }
 0x2d7   :  { %v4116_v22 = vpop.f32.mrf.mxu1 }
 0x2d8   :  { %v1093_v44 = vsel %vm830_vm1, %v4116_v22, -inf }
 0x2d9   :  { %v4120_v8 = vpop.f32.mrf.mxu1  ;;  %1094 = vmax.xlane.f32.xlu0 %v1093_v44 }
 0x2da   :  { %v1102_v59 = vsel %vm830_vm1, %v4120_v8, -inf }
 0x2db   :  { %v4122_v62 = vpop.f32.mrf.mxu1 }
 0x2dc   :  { %v1096_v29 = vsel %vm830_vm1, %v4122_v62, -inf }
 0x2dd   :  { %v4128_v23 = vpop.f32.mrf.mxu1  ;;  %1100 = vmax.xlane.f32.xlu0 %v1099_v9  ;;  %1097 = vmax.xlane.f32.xlu1 %v1096_v29 }
 0x2de   :  { %v1111_v27 = vsel %vm830_vm1, %v4128_v23, -inf }
 0x2df   :  { %v4130_v41 = vpop.f32.mrf.mxu1 }
 0x2e0   :  { %v1105_v51 = vsel %vm830_vm1, %v4130_v41, -inf }
 0x2e1   :  { %v4136_v47 = vpop.f32.mrf.mxu1  ;;  %1106 = vmax.xlane.f32.xlu0 %v1105_v51  ;;  %1103 = vmax.xlane.f32.xlu1 %v1102_v59 }
 0x2e2   :  { %v1114_v40 = vsel %vm830_vm1, %v4136_v47, -inf }
 0x2e3   :  { %v4138_v39 = vpop.f32.mrf.mxu1 }
 0x2e4   :  { %v1108_v5 = vsel %vm830_vm1, %v4138_v39, -inf }
 0x2e5   :  { %1112 = vmax.xlane.f32.xlu0 %v1111_v27  ;;  %1109 = vmax.xlane.f32.xlu1 %v1108_v5 }
 0x2e9   :  { %1115 = vmax.xlane.f32.xlu1 %v1114_v40 }
 0x340   :  { %v839_v19 = vpop.xlane.xlu1 %838 }
 0x341   :  { %v857_v14 = vsub.f32 %v3078_v36, %v839_v19 }
 0x342   :  { %v833_v0 = vpop.xlane.xlu0 %832 }
 0x343   :  { %v855_v38 = vsub.f32 %v799_v11, %v833_v0  ;;  %v867_v24 = vmul.f32 1.442695, %v857_v14 }
 0x344   :  { %v842_v1 = vpop.xlane.xlu1 %841 }
 0x345   :  { %v863_v18 = vmul.f32 1.442695, %v855_v38  ;;  %v858_v31 = vsub.f32 %v3079_v61, %v842_v1 }
 0x346   :  { %v836_v25 = vpop.xlane.xlu0 %835 }
 0x347   :  { %3504 = vpow2.f32 %v863_v18  ;;  %v869_v30 = vmul.f32 1.442695, %v858_v31  ;;  %v856_v32 = vsub.f32 %v802_v12, %v836_v25 }
 0x348   :  { %3506 = vpow2.f32 %v867_v24 }
 0x349   :  { %v865_v20 = vmul.f32 1.442695, %v856_v32  ;;  %3508 = vpow2.f32 %v869_v30 }
 0x34a   :  { %v845_v55 = vpop.xlane.xlu0 %844 }
 0x34b   :  { %3510 = vpow2.f32 %v865_v20  ;;  %v859_v53 = vsub.f32 %v815_v10, %v845_v55 }
 0x34d   :  { %v871_v54 = vmul.f32 1.442695, %v859_v53 }
 0x34e   :  { %v851_v21 = vpop.xlane.xlu0 %850  ;;  %v848_v60 = vpop.xlane.xlu1 %847 }
 0x34f   :  { %3512 = vpow2.f32 %v871_v54  ;;  %v861_v36 = vsub.f32 %v3082_v2, %v851_v21  ;;  %v860_v11 = vsub.f32 %v818_v52, %v848_v60 }
 0x351   :  { %v875_v50 = vmul.f32 1.442695, %v861_v36  ;;  %v873_v34 = vmul.f32 1.442695, %v860_v11 }
 0x352   :  { %v854_v44 = vpop.xlane.xlu1 %853 }
 0x353   :  { %3514 = vpow2.f32 %v875_v50  ;;  %v862_v61 = vsub.f32 %v4108_v57, %v854_v44 }
 0x354   :  { %v3505_v9 = vpop.eup %3504  ;;  %3516 = vpow2.f32 %v873_v34 }
 0x355   :  { %v877_v12 = vmul.f32 1.442695, %v862_v61  ;;  %v879_v29 = vsel %vm830_vm1, %v3505_v9, 0.0  ;;  %v3507_v51 = vpop.eup %3506 }
 0x356   :  { %880 = vadd.xlane.f32.xlu0 %v879_v29  ;;  %v3509_v10 = vpop.eup %3508  ;;  %v885_v27 = vsel %vm830_vm1, %v3507_v51, 0.0 }
 0x357   :  { %3518 = vpow2.f32 %v877_v12  ;;  %v904_v5 = vpack.c.bf16 %v3509_v10, %v3507_v51  ;;  %v888_v19 = vsel %vm830_vm1, %v3509_v10, 0.0 }
 0x358   :  { %v3511_v59 = vpop.eup %3510 }
 0x359   :  { %v882_v2 = vsel %vm830_vm1, %v3511_v59, 0.0  ;;  %v903_v52 = vpack.c.bf16 %v3511_v59, %v3505_v9 }
 0x35a   :  { %886 = vadd.xlane.f32.xlu0 %v885_v27  ;;  %883 = vadd.xlane.f32.xlu1 %v882_v2 }
 0x35b   :  { %3092 = vmatprep.mubr.msk.bf16.mxu0 %vm830_vm1, %v903_v52 }
 0x35c   :  { %v3513_v57 = vpop.eup %3512  ;;  %3093 = vmatmul.mubr.msk.bf16.vlgmr.msra.gmra.mxu0 %vm830_vm1, %v904_v5 }
 0x35d   :  { %3117 = vmatpush3.bf16.msra.mxu0 %v4089_v7  ;;  %v891_v40 = vsel %vm830_vm1, %v3513_v57, 0.0 }
 0x35e   :  { %3118 = vmatprep.subr.bf16.mxu0 %v4093_v16  ;;  %892 = vadd.xlane.f32.xlu0 %v891_v40 }
 0x35f   :  { %889 = vadd.xlane.f32.xlu1 %v888_v19 }
 0x360   :  { %v3515_v14 = vpop.eup %3514 }
 0x361   :  { %v3517_v0 = vpop.eup %3516  ;;  %3119 = vmatpush3.bf16.msra.mxu0 %v4093_v16  ;;  %v897_v38 = vsel %vm830_vm1, %v3515_v14, 0.0 }
 0x362   :  { %3120 = vmatprep.subr.bf16.mxu0 %v4076_v43  ;;  %898 = vadd.xlane.f32.xlu0 %v897_v38  ;;  %v1095_v1 = vpop.xlane.xlu0 %1094  ;;  %v894_v7 = vsel %vm830_vm1, %v3517_v0, 0.0  ;;  %v905_v24 = vpack.c.bf16 %v3517_v0, %v3513_v57 }
 0x363   :  { %v1117_v18 = vsub.f32 %v4116_v22, %v1095_v1  ;;  %895 = vadd.xlane.f32.xlu1 %v894_v7 }
 0x364   :  { %v3519_v31 = vpop.eup %3518  ;;  %3096 = vmatprep.mubr.msk.bf16.mxu0 %vm830_vm1, %v905_v24  ;;  %v3424_v24 = vld [vmem:[%s4724_s1 + $0x2e8] ss:$52 sps:$4 sm:$0xff]  }
 0x365   :  { %v1125_v25 = vmul.f32 1.442695, %v1117_v18  ;;  %3121 = vmatpush3.bf16.msra.mxu0 %v4076_v43  ;;  %v900_v16 = vsel %vm830_vm1, %v3519_v31, 0.0  ;;  %v906_v30 = vpack.c.bf16 %v3519_v31, %v3515_v14  ;;  %3132 = vmatprep.subr.bf16.mxu1 %v3424_v24  ;;  %v3425_v18 = vld [vmem:[%s4724_s1 + $0x280] ss:$52 sps:$4 sm:$0xff]  }
 0x366   :  { %3122 = vmatprep.subr.bf16.mxu0 %v4078_v42  ;;  %v1101_v32 = vpop.xlane.xlu0 %1100  ;;  %v1098_v20 = vpop.xlane.xlu1 %1097  ;;  %3133 = vmatpush3.bf16.msra.mxu1 %v3424_v24  ;;  %v3426_v31 = vld [vmem:[%s4724_s1 + $0x218] ss:$52 sps:$4 sm:$0xff]  }
 0x367   :  { %3520 = vpow2.f32 %v1125_v25  ;;  %v1119_v55 = vsub.f32 %v4114_v33, %v1101_v32  ;;  %901 = vadd.xlane.f32.xlu1 %v900_v16  ;;  %v1118_v22 = vsub.f32 %v4122_v62, %v1098_v20  ;;  %3097 = vmatmul.mubr.msk.bf16.gmra.mxu0 %vm830_vm1, %v906_v30  ;;  %v3427_v25 = vld [vmem:[%s4724_s1 + $0x1b0] ss:$52 sps:$4 sm:$0xff]   ;;  %v3428_v16 = vld [vmem:[%s4724_s1 + $0x148] ss:$52 sps:$4 sm:$0xff]   ;;  %v3429_v30 = vld [vmem:[%s4724_s1 + $0xe0] ss:$52 sps:$4 sm:$0xff]  }
 0x368   :  { %3134 = vmatprep.subr.bf16.mxu1 %v3425_v18  ;;  %v3430_v32 = vld [vmem:[%s4724_s1 + $0x78] ss:$52 sps:$4 sm:$0xff]   ;;  %v3431_v20 = vld [vmem:[%s4724_s1 + $0x10] ss:$52 sps:$4 sm:$0xff]  }
 0x369   :  { %v1129_v53 = vmul.f32 1.442695, %v1119_v55  ;;  %v1127_v54 = vmul.f32 1.442695, %v1118_v22  ;;  %3123 = vmatpush3.bf16.msra.mxu0 %v4078_v42  ;;  %v3432_v55 = vld [vmem:[%s4724_s1 + $0x2ec] ss:$52 sps:$4 sm:$0xff]  }
 0x36a   :  { %v1107_v43 = vpop.xlane.xlu0 %1106  ;;  %v1104_v21 = vpop.xlane.xlu1 %1103  ;;  %3135 = vmatpush3.bf16.msra.mxu1 %v3425_v18  ;;  %v3433_v22 = vld [vmem:[%s4724_s1 + $0x284] ss:$52 sps:$4 sm:$0xff]   ;;  %3164 = vmatprep.subr.bf16.mxu0 %v3432_v55 }
 0x36b   :  { %3522 = vpow2.f32 %v1129_v53  ;;  %v1121_v60 = vsub.f32 %v4130_v41, %v1107_v43  ;;  %v1120_v36 = vsub.f32 %v4120_v8, %v1104_v21  ;;  %3136 = vmatprep.subr.bf16.mxu1 %v3426_v31  ;;  %v3434_v53 = vld [vmem:[%s4724_s1 + $0x21c] ss:$52 sps:$4 sm:$0xff]   ;;  %v3436_v43 = vld [vmem:[%s4724_s1 + $0x14c] ss:$52 sps:$4 sm:$0xff]  }
 0x36c   :  { %3524 = vpow2.f32 %v1127_v54  ;;  %v3435_v54 = vld [vmem:[%s4724_s1 + $0x1b4] ss:$52 sps:$4 sm:$0xff]  }
 0x36d   :  { %v1133_v11 = vmul.f32 1.442695, %v1121_v60  ;;  %v1131_v50 = vmul.f32 1.442695, %v1120_v36 }
 0x36e   :  { %v1113_v33 = vpop.xlane.xlu0 %1112  ;;  %v1110_v34 = vpop.xlane.xlu1 %1109  ;;  %3137 = vmatpush3.bf16.msra.mxu1 %v3426_v31 }
 0x36f   :  { %3526 = vpow2.f32 %v1133_v11  ;;  %v1123_v62 = vsub.f32 %v4128_v23, %v1113_v33  ;;  %v1122_v44 = vsub.f32 %v4138_v39, %v1110_v34  ;;  %3138 = vmatprep.subr.bf16.mxu1 %v3427_v25 }
 0x370   :  { %3528 = vpow2.f32 %v1131_v50 }
 0x371   :  { %v1137_v61 = vmul.f32 1.442695, %v1123_v62  ;;  %v1135_v42 = vmul.f32 1.442695, %v1122_v44 }
 0x372   :  { %v1116_v9 = vpop.xlane.xlu1 %1115  ;;  %3139 = vmatpush3.bf16.msra.mxu1 %v3427_v25 }
 0x373   :  { %3530 = vpow2.f32 %v1137_v61  ;;  %v1124_v12 = vsub.f32 %v4136_v47, %v1116_v9  ;;  %3140 = vmatprep.subr.bf16.mxu1 %v3428_v16 }
 0x374   :  { %v3521_v41 = vpop.eup %3520  ;;  %3532 = vpow2.f32 %v1135_v42 }
 0x375   :  { %v1139_v8 = vmul.f32 1.442695, %v1124_v12  ;;  %v1141_v29 = vsel %vm830_vm1, %v3521_v41, 0.0 }
 0x376   :  { %1142 = vadd.xlane.f32.xlu0 %v1141_v29  ;;  %3141 = vmatpush3.bf16.msra.mxu1 %v3428_v16 }
 0x377   :  { %3534 = vpow2.f32 %v1139_v8  ;;  %3142 = vmatprep.subr.bf16.mxu1 %v3429_v30 }
 0x378   :  { %v3523_v51 = vpop.eup %3522 }
 0x379   :  { %v3525_v10 = vpop.eup %3524  ;;  %v1147_v23 = vsel %vm830_vm1, %v3523_v51, 0.0 }
 0x37a   :  { %1148 = vadd.xlane.f32.xlu0 %v1147_v23  ;;  %v1144_v39 = vsel %vm830_vm1, %v3525_v10, 0.0  ;;  %v1165_v59 = vpack.c.bf16 %v3525_v10, %v3521_v41  ;;  %3143 = vmatpush3.bf16.msra.mxu1 %v3429_v30 }
 0x37b   :  { %1145 = vadd.xlane.f32.xlu1 %v1144_v39  ;;  %3144 = vmatprep.subr.bf16.mxu1 %v3430_v32 }
 0x37c   :  { %v3527_v27 = vpop.eup %3526  ;;  %3124 = vmatprep.mubr.msk.bf16.mxu0 %vm830_vm1, %v1165_v59 }
 0x37d   :  { %v3529_v47 = vpop.eup %3528  ;;  %v1153_v2 = vsel %vm830_vm1, %v3527_v27, 0.0 }
 0x37e   :  { %v1166_v52 = vpack.c.bf16 %v3529_v47, %v3523_v51  ;;  %1154 = vadd.xlane.f32.xlu0 %v1153_v2  ;;  %v1150_v5 = vsel %vm830_vm1, %v3529_v47, 0.0  ;;  %3145 = vmatpush3.bf16.msra.mxu1 %v3430_v32 }
 0x37f   :  { %1151 = vadd.xlane.f32.xlu1 %v1150_v5  ;;  %3146 = vmatprep.subr.bf16.mxu1 %v3431_v20 }
 0x380   :  { %v3531_v57 = vpop.eup %3530  ;;  %3125 = vmatmul.mubr.msk.bf16.vlgmr.msra.gmra.mxu0 %vm830_vm1, %v1166_v52 }
 0x381   :  { %v3533_v40 = vpop.eup %3532  ;;  %v1159_v19 = vsel %vm830_vm1, %v3531_v57, 0.0  ;;  %3165 = vmatpush3.bf16.msra.mxu0 %v3432_v55 }
 0x382   :  { %1160 = vadd.xlane.f32.xlu0 %v1159_v19  ;;  %v1156_v14 = vsel %vm830_vm1, %v3533_v40, 0.0  ;;  %v1167_v0 = vpack.c.bf16 %v3533_v40, %v3527_v27  ;;  %3147 = vmatpush3.bf16.msra.mxu1 %v3431_v20 }
 0x383   :  { %1157 = vadd.xlane.f32.xlu1 %v1156_v14  ;;  %3166 = vmatprep.subr.bf16.mxu0 %v3433_v22 }
 0x384   :  { %v3535_v38 = vpop.eup %3534  ;;  %3128 = vmatprep.mubr.msk.bf16.mxu0 %vm830_vm1, %v1167_v0 }
 0x385   :  { %v1162_v1 = vsel %vm830_vm1, %v3535_v38, 0.0  ;;  %v1168_v7 = vpack.c.bf16 %v3535_v38, %v3531_v57  ;;  %3167 = vmatpush3.bf16.msra.mxu0 %v3433_v22 }
 0x386   :  { %3168 = vmatprep.subr.bf16.mxu0 %v3434_v53 }
 0x387   :  { %1163 = vadd.xlane.f32.xlu1 %v1162_v1 }
 0x388   :  { %3129 = vmatmul.mubr.msk.bf16.gmra.mxu0 %vm830_vm1, %v1168_v7 }
 0x389   :  { %3169 = vmatpush3.bf16.msra.mxu0 %v3434_v53 }
 0x38a   :  { %3170 = vmatprep.subr.bf16.mxu0 %v3435_v54 }
 0x38d   :  { %3171 = vmatpush3.bf16.msra.mxu0 %v3435_v54 }
 0x38e   :  { %3172 = vmatprep.subr.bf16.mxu0 %v3436_v43 }
 0x391   :  { %3173 = vmatpush3.bf16.msra.mxu0 %v3436_v43 }
 0x3df   :  { %v881_v60 = vpop.xlane.xlu0 %880 }
 0x3e0   :  { %3536 = vrcp.f32 %v881_v60 }
 0x3e3   :  { %v884_v21 = vpop.xlane.xlu1 %883  ;;  %v887_v11 = vpop.xlane.xlu0 %886 }
 0x3e7   :  { %v893_v33 = vpop.xlane.xlu0 %892 }
 0x3e8   :  { %v890_v36 = vpop.xlane.xlu1 %889 }
 0x3e9   :  { %3538 = vrcp.f32 %v890_v36 }
 0x3ea   :  { %3540 = vrcp.f32 %v884_v21 }
 0x3eb   :  { %3542 = vrcp.f32 %v887_v11  ;;  %v899_v44 = vpop.xlane.xlu0 %898 }
 0x3ec   :  { %v896_v50 = vpop.xlane.xlu1 %895  ;;  %3544 = vrcp.f32 %v893_v33 }
 0x3ed   :  { %v3537_v42 = vpop.eup %3536 }
 0x3f0   :  { %v902_v34 = vpop.xlane.xlu1 %901 }
 0x3f1   :  { %3546 = vrcp.f32 %v902_v34 }
 0x3f2   :  { %3548 = vrcp.f32 %v896_v50 }
 0x3f3   :  { %3550 = vrcp.f32 %v899_v44 }
 0x3f6   :  { %v3539_v12 = vpop.eup %3538 }
 0x3f7   :  { %v3541_v41 = vpop.eup %3540 }
 0x3f8   :  { %v3543_v51 = vpop.eup %3542 }
 0x3f9   :  { %v3545_v52 = vpop.eup %3544 }
 0x3fe   :  { %v3547_v40 = vpop.eup %3546 }
 0x3ff   :  { %v3549_v19 = vpop.eup %3548  ;;  %v1143_v14 = vpop.xlane.xlu0 %1142 }
 0x400   :  { %v3551_v1 = vpop.eup %3550  ;;  %3552 = vrcp.f32 %v1143_v14  ;;  %v3441_v14 = vld [vmem:[%s4724_s1 + $0x288] ss:$52 sps:$4 sm:$0xff]  }
 0x403   :  { %v1149_v30 = vpop.xlane.xlu0 %1148 }
 0x404   :  { %v1146_v5 = vpop.xlane.xlu1 %1145 }
 0x407   :  { %v1155_v20 = vpop.xlane.xlu0 %1154 }
 0x408   :  { %v1152_v25 = vpop.xlane.xlu1 %1151 }
 0x409   :  { %3554 = vrcp.f32 %v1152_v25 }
 0x40a   :  { %3556 = vrcp.f32 %v1146_v5  ;;  %v3437_v5 = vld [vmem:[%s4724_s1 + $0xe4] ss:$52 sps:$4 sm:$0xff]  }
 0x40b   :  { %3558 = vrcp.f32 %v1149_v30  ;;  %v1161_v22 = vpop.xlane.xlu0 %1160  ;;  %3174 = vmatprep.subr.bf16.mxu0 %v3437_v5 }
 0x40c   :  { %v1158_v32 = vpop.xlane.xlu1 %1157  ;;  %3560 = vrcp.f32 %v1155_v20  ;;  %3175 = vmatpush3.bf16.msra.mxu0 %v3437_v5 }
 0x40d   :  { %v3553_v43 = vpop.eup %3552 }
 0x410   :  { %v1164_v55 = vpop.xlane.xlu1 %1163 }
 0x411   :  { %3562 = vrcp.f32 %v1164_v55  ;;  %v4749_v55 = vmax.f32 %v3776_v58, 0.0 }
 0x412   :  { %3564 = vrcp.f32 %v1158_v32 }
 0x413   :  { %3566 = vrcp.f32 %v1161_v22 }
 0x416   :  { %v3555_v60 = vpop.eup %3554 }
 0x417   :  { %v3557_v36 = vpop.eup %3556 }
 0x418   :  { %v3559_v33 = vpop.eup %3558 }
 0x41c   :  { %v3094_v62 = vpop.f32.mrf.mxu0 }
 0x41d   :  { %v994_v39 = vmul.f32 %v3543_v51, %v3094_v62 }
 0x41e   :  { %v953_v61 = vpop.f32.mrf.mxu0 }
 0x41f   :  { %v992_v10 = vmul.f32 %v3537_v42, %v953_v61 }
 0x420   :  { %v3095_v9 = vpop.f32.mrf.mxu0 }
 0x421   :  { %v995_v8 = vmul.f32 %v3539_v12, %v3095_v9 }
 0x422   :  { %v956_v29 = vpop.f32.mrf.mxu0 }
 0x423   :  { %v993_v23 = vmul.f32 %v3541_v41, %v956_v29  ;;  %v1263_v27 = vpack.c.bf16 %v995_v8, %v994_v39  ;;  %v3561_v41 = vpop.eup %3560 }
 0x424   :  { %v3563_v29 = vpop.eup %3562 }
 0x425   :  { %v1262_v59 = vpack.c.bf16 %v993_v23, %v992_v10  ;;  %v3565_v51 = vpop.eup %3564 }
 0x426   :  { %v3567_v39 = vpop.eup %3566 }
 0x427   :  { %v3098_v47 = vpop.f32.mrf.mxu0  ;;  %3148 = vmatprep.mubr.bf16.mxu1 %v1262_v59 }
 0x428   :  { %3149 = vmatmul.mubr.bf16.vlgmr.msra.gmra.mxu1 %v1263_v27  ;;  %v998_v18 = vmul.f32 %v3551_v1, %v3098_v47  ;;  %v3444_v1 = vld [vmem:[%s4724_s1 + $0x150] ss:$52 sps:$4 sm:$0xff]  }
 0x429   :  { %v969_v2 = vpop.f32.mrf.mxu0 }
 0x42a   :  { %v996_v7 = vmul.f32 %v3545_v52, %v969_v2 }
 0x42b   :  { %v3099_v57 = vpop.f32.mrf.mxu0 }
 0x42c   :  { %v999_v0 = vmul.f32 %v3547_v40, %v3099_v57  ;;  %v3438_v57 = vld [vmem:[%s4724_s1 + $0x7c] ss:$52 sps:$4 sm:$0xff]   ;;  %v3439_v40 = vld [vmem:[%s4724_s1 + $0x14] ss:$52 sps:$4 sm:$0xff]  }
 0x42d   :  { %v972_v38 = vpop.f32.mrf.mxu0  ;;  %3176 = vmatprep.subr.bf16.mxu0 %v3438_v57 }
 0x42e   :  { %v997_v24 = vmul.f32 %v3549_v19, %v972_v38  ;;  %v1265_v16 = vpack.c.bf16 %v999_v0, %v998_v18  ;;  %3177 = vmatpush3.bf16.msra.mxu0 %v3438_v57  ;;  %v3440_v19 = vld [vmem:[%s4724_s1 + $0x2f0] ss:$52 sps:$4 sm:$0xff]   ;;  %v3442_v0 = vld [vmem:[%s4724_s1 + $0x220] ss:$52 sps:$4 sm:$0xff]   ;;  %v3443_v38 = vld [vmem:[%s4724_s1 + $0x1b8] ss:$52 sps:$4 sm:$0xff]  }
 0x42f   :  { %3178 = vmatprep.subr.bf16.mxu0 %v3439_v40  ;;  %3196 = vmatprep.subr.bf16.mxu1 %v3440_v19  ;;  %v2803_v18 = vld [vmem:[%s4726_s2 + $0x4] ss:$0 sm:$0xff]  ;;  %v4758_v57 = vmax.f32 %v3835_v26, 0.0 }
 0x430   :  { %v1264_v31 = vpack.c.bf16 %v997_v24, %v996_v7  ;;  %3197 = vmatpush3.bf16.msra.mxu1 %v3440_v19  ;;  %v4759_v19 = vmax.f32 %v3839_v28, 0.0 }
 0x431   :  { %3198 = vmatprep.subr.bf16.mxu1 %v3441_v14 }
 0x432   :  { %3152 = vmatprep.mubr.bf16.mxu1 %v1264_v31  ;;  %3179 = vmatpush3.bf16.msra.mxu0 %v3439_v40 }
 0x433   :  { %3153 = vmatmul.mubr.bf16.gmra.mxu1 %v1265_v16 }
 0x434   :  { %3199 = vmatpush3.bf16.msra.mxu1 %v3441_v14 }
 0x435   :  { %3200 = vmatprep.subr.bf16.mxu1 %v3442_v0 }
 0x438   :  { %3201 = vmatpush3.bf16.msra.mxu1 %v3442_v0  ;;  %v4760_v0 = vmax.f32 %v3848_v35, 0.0 }
 0x439   :  { %3202 = vmatprep.subr.bf16.mxu1 %v3443_v38 }
 0x43c   :  { %3203 = vmatpush3.bf16.msra.mxu1 %v3443_v38 }
 0x43d   :  { %3204 = vmatprep.subr.bf16.mxu1 %v3444_v1 }
 0x440   :  { %v3126_v53 = vpop.f32.mrf.mxu0  ;;  %3205 = vmatpush3.bf16.msra.mxu1 %v3444_v1 }
 0x441   :  { %v1256_v44 = vmul.f32 %v3559_v33, %v3126_v53  ;;  %v4750_v53 = vmax.f32 %v3754_v46, 0.0 }
 0x442   :  { %v1215_v54 = vpop.f32.mrf.mxu0 }
 0x443   :  { %v1254_v34 = vmul.f32 %v3553_v43, %v1215_v54  ;;  %v4751_v43 = vmax.f32 %v3757_v48, 0.0 }
 0x444   :  { %v3127_v21 = vpop.f32.mrf.mxu0 }
 0x445   :  { %v1257_v11 = vmul.f32 %v3555_v60, %v3127_v21  ;;  %v4752_v60 = vmax.f32 %v3771_v56, 0.0  ;;  %v4753_v56 = vmax.f32 %v3820_v17, 0.0 }
 0x446   :  { %v1218_v50 = vpop.f32.mrf.mxu0 }
 0x447   :  { %v1255_v62 = vmul.f32 %v3557_v36, %v1218_v50  ;;  %v1267_v9 = vpack.c.bf16 %v1257_v11, %v1256_v44 }
 0x448   :  { %v3130_v61 = vpop.f32.mrf.mxu0 }
 0x449   :  { %v1266_v42 = vpack.c.bf16 %v1255_v62, %v1254_v34  ;;  %v1260_v47 = vmul.f32 %v3567_v39, %v3130_v61 }
 0x44a   :  { %v1231_v12 = vpop.f32.mrf.mxu0 }
 0x44b   :  { %3156 = vmatprep.mubr.bf16.mxu1 %v1266_v42  ;;  %v1258_v59 = vmul.f32 %v3561_v41, %v1231_v12  ;;  %v4755_v41 = vmax.f32 %v3798_v6, 0.0 }
 0x44c   :  { %v3131_v8 = vpop.f32.mrf.mxu0  ;;  %3157 = vmatmul.mubr.bf16.gmra.mxu1 %v1267_v9  ;;  %v4754_v9 = vmax.f32 %v3793_v4, 0.0 }
 0x44d   :  { %v1261_v10 = vmul.f32 %v3563_v29, %v3131_v8  ;;  %v4756_v29 = vmax.f32 %v3815_v15, 0.0  ;;  %v4757_v15 = vmax.f32 %v3852_v37, 0.0 }
 0x44e   :  { %v1234_v23 = vpop.f32.mrf.mxu0 }
 0x44f   :  { %v1259_v27 = vmul.f32 %v3565_v51, %v1234_v23  ;;  %v1269_v52 = vpack.c.bf16 %v1261_v10, %v1260_v47 }
 0x451   :  { %v1268_v2 = vpack.c.bf16 %v1259_v27, %v1258_v59 }
 0x453   :  { %3160 = vmatprep.mubr.bf16.mxu1 %v1268_v2 }
 0x454   :  { %3161 = vmatmul.mubr.bf16.gmra.mxu1 %v1269_v52 }
 0x4e8   :  { %v3150_v7 = vpop.f32.mrf.mxu1 }
 0x4e9   :  { %v1384_v30 = vadd.f32 %v3150_v7, %v2803_v18 }
 0x4ea   :  { %v1375_v24 = vpop.f32.mrf.mxu1 }
 0x4eb   :  { %v1376_v25 = vadd.f32 %v2803_v18, %v1375_v24  ;;  %v4266_v36 = vadd.f32 %v1384_v30, %v4752_v60  ;;  %v4761_v30 = vmax.f32 %v3878_v3, 0.0 }
 0x4ec   :  { %v3151_v31 = vpop.f32.mrf.mxu1 }
 0x4ed   :  { %v1387_v16 = vadd.f32 %v3151_v31, %v2803_v18  ;;  %v4258_v54 = vadd.f32 %v1376_v25, %v4750_v53 }
 0x4ee   :  { %v1378_v32 = vpop.f32.mrf.mxu1 }
 0x4ef   :  { %v1379_v20 = vadd.f32 %v2803_v18, %v1378_v32  ;;  %v4254_v22 = vadd.f32 %v1387_v16, %v4749_v55  ;;  %v4762_v32 = vmax.f32 %v3861_v45, 0.0  ;;  %v4763_v55 = vmax.f32 %v3865_v49, 0.0  ;;  %v3445_v45 = vld [vmem:[%s4724_s1 + $0xe8] ss:$52 sps:$4 sm:$0xff]   ;;  %v3446_v49 = vld [vmem:[%s4724_s1 + $0x80] ss:$52 sps:$4 sm:$0xff]  }
 0x4f0   :  { %3206 = vmatprep.subr.bf16.mxu1 %v3445_v45 }
 0x4f1   :  { %v4262_v21 = vadd.f32 %v1379_v20, %v4751_v43  ;;  %v1455_v58 = vpack.c.bf16 %v4254_v22, %v4266_v36  ;;  %v4764_v43 = vmax.f32 %v3874_v63, 0.0  ;;  %3207 = vmatpush3.bf16.msra.mxu1 %v3445_v45  ;;  %v3447_v63 = vld [vmem:[%s4724_s1 + $0x18] ss:$52 sps:$4 sm:$0xff]  }
 0x4f2   :  { %3208 = vmatprep.subr.bf16.mxu1 %v3446_v49 }
 0x4f3   :  { %v3154_v11 = vpop.f32.mrf.mxu1  ;;  %v1454_v50 = vpack.c.bf16 %v4262_v21, %v4258_v54 }
 0x4f4   :  { %v1400_v48 = vadd.f32 %v3154_v11, %v2803_v18 }
 0x4f5   :  { %v1391_v33 = vpop.f32.mrf.mxu1  ;;  %3180 = vmatprep.mubr.bf16.mxu0 %v1454_v50  ;;  %3209 = vmatpush3.bf16.msra.mxu1 %v3446_v49  ;;  %v3448_v50 = vld [vmem:[%s4724_s1 + $0x2f4] ss:$52 sps:$4 sm:$0xff]  }
 0x4f6   :  { %3181 = vmatmul.mubr.bf16.vlgmr.msra.gmra.mxu0 %v1455_v58  ;;  %v1392_v34 = vadd.f32 %v2803_v18, %v1391_v33  ;;  %v4286_v51 = vadd.f32 %v1400_v48, %v4756_v29  ;;  %3210 = vmatprep.subr.bf16.mxu1 %v3447_v63  ;;  %v3450_v58 = vld [vmem:[%s4724_s1 + $0x2f8] ss:$52 sps:$4 sm:$0xff]   ;;  %v3453_v33 = vld [vmem:[%s4724_s1 + $0x290] ss:$52 sps:$4 sm:$0xff]   ;;  %v3459_v48 = vld [vmem:[%s4724_s1 + $0x1c0] ss:$52 sps:$4 sm:$0xff]  }
 0x4f7   :  { %v3155_v46 = vpop.f32.mrf.mxu1  ;;  %1954 = vmatprep.subr.bf16.mxu0 %v3450_v58  ;;  %v2812_v29 = vld [vmem:[%s4726_s2 + $0x5] ss:$0 sm:$0xff] }
 0x4f8   :  { %v1403_v62 = vadd.f32 %v3155_v46, %v2803_v18  ;;  %v4278_v12 = vadd.f32 %v1392_v34, %v4754_v9  ;;  %1955 = vmatpush1.bf16.msra.mxu0 %v3448_v50  ;;  %v3451_v46 = vld [vmem:[%s4724_s1 + $0x28c] ss:$52 sps:$4 sm:$0xff]   ;;  %v3456_v34 = vld [vmem:[%s4724_s1 + $0x228] ss:$52 sps:$4 sm:$0xff]  }
 0x4f9   :  { %v1394_v44 = vpop.f32.mrf.mxu1  ;;  %3211 = vmatpush3.bf16.msra.mxu1 %v3447_v63  ;;  %1956 = vmatprep.subr.bf16.mxu0 %v3453_v33 }
 0x4fa   :  { %v1395_v61 = vadd.f32 %v2803_v18, %v1394_v44  ;;  %v4274_v42 = vadd.f32 %v1403_v62, %v4753_v56  ;;  %v3454_v62 = vld [vmem:[%s4724_s1 + $0x224] ss:$52 sps:$4 sm:$0xff]   ;;  %v3457_v44 = vld [vmem:[%s4724_s1 + $0x1bc] ss:$52 sps:$4 sm:$0xff]   ;;  %v3460_v56 = vld [vmem:[%s4724_s1 + $0x154] ss:$52 sps:$4 sm:$0xff]  }
 0x4fc   :  { %v4282_v8 = vadd.f32 %v1395_v61, %v4755_v41  ;;  %v1457_v17 = vpack.c.bf16 %v4274_v42, %v4286_v51  ;;  %1957 = vmatpush1.bf16.msra.mxu0 %v3451_v46  ;;  %v3462_v61 = vld [vmem:[%s4724_s1 + $0x158] ss:$52 sps:$4 sm:$0xff]  }
 0x4fd   :  { %1958 = vmatprep.subr.bf16.mxu0 %v3456_v34 }
 0x4fe   :  { %v1456_v10 = vpack.c.bf16 %v4282_v8, %v4278_v12 }
 0x500   :  { %3184 = vmatprep.mubr.bf16.mxu0 %v1456_v10  ;;  %1959 = vmatpush1.bf16.msra.mxu0 %v3454_v62 }
 0x501   :  { %3185 = vmatmul.mubr.bf16.gmra.mxu0 %v1457_v17  ;;  %1960 = vmatprep.subr.bf16.mxu0 %v3459_v48 }
 0x504   :  { %1961 = vmatpush1.bf16.msra.mxu0 %v3457_v44 }
 0x505   :  { %1962 = vmatprep.subr.bf16.mxu0 %v3462_v61 }
 0x508   :  { %1963 = vmatpush1.bf16.msra.mxu0 %v3460_v56 }
 0x50c   :  { %v3158_v23 = vpop.f32.mrf.mxu1 }
 0x50d   :  { %v1416_v6 = vadd.f32 %v3158_v23, %v2803_v18 }
 0x50e   :  { %v1407_v4 = vpop.f32.mrf.mxu1 }
 0x50f   :  { %v1408_v59 = vadd.f32 %v2803_v18, %v1407_v4  ;;  %v4306_v38 = vadd.f32 %v1416_v6, %v4760_v0 }
 0x510   :  { %v3159_v39 = vpop.f32.mrf.mxu1 }
 0x511   :  { %v1419_v27 = vadd.f32 %v3159_v39, %v2803_v18  ;;  %v4298_v40 = vadd.f32 %v1408_v59, %v4758_v57 }
 0x512   :  { %v1410_v47 = vpop.f32.mrf.mxu1 }
 0x513   :  { %v1411_v2 = vadd.f32 %v2803_v18, %v1410_v47  ;;  %v4294_v52 = vadd.f32 %v1419_v27, %v4757_v15 }
 0x514   :  { %v3162_v5 = vpop.f32.mrf.mxu1 }
 0x515   :  { %v4302_v14 = vadd.f32 %v1411_v2, %v4759_v19  ;;  %v1459_v24 = vpack.c.bf16 %v4294_v52, %v4306_v38  ;;  %v1432_v25 = vadd.f32 %v3162_v5, %v2803_v18 }
 0x516   :  { %v1423_v1 = vpop.f32.mrf.mxu1 }
 0x517   :  { %v1458_v7 = vpack.c.bf16 %v4302_v14, %v4298_v40  ;;  %v1424_v31 = vadd.f32 %v2803_v18, %v1423_v1  ;;  %v4326_v60 = vadd.f32 %v1432_v25, %v4764_v43 }
 0x518   :  { %v3163_v37 = vpop.f32.mrf.mxu1 }
 0x519   :  { %v1435_v26 = vadd.f32 %v3163_v37, %v2803_v18  ;;  %3188 = vmatprep.mubr.bf16.mxu0 %v1458_v7  ;;  %v4318_v20 = vadd.f32 %v1424_v31, %v4762_v32 }
 0x51a   :  { %v1426_v16 = vpop.f32.mrf.mxu1  ;;  %3189 = vmatmul.mubr.bf16.gmra.mxu0 %v1459_v24 }
 0x51b   :  { %v1427_v28 = vadd.f32 %v2803_v18, %v1426_v16  ;;  %v4314_v35 = vadd.f32 %v1435_v26, %v4761_v30  ;;  %v4765_v18 = vmov 0  }
 0x51d   :  { %v4322_v53 = vadd.f32 %v1427_v28, %v4763_v55  ;;  %v1461_v3 = vpack.c.bf16 %v4314_v35, %v4326_v60 }
 0x51f   :  { %v1460_v11 = vpack.c.bf16 %v4322_v53, %v4318_v20 }
 0x521   :  { %3192 = vmatprep.mubr.bf16.mxu0 %v1460_v11 }
 0x522   :  { %3193 = vmatmul.mubr.bf16.gmra.mxu0 %v1461_v3 }
 0x523   :  { %1986 = vmatprep.mubr.bf16.mxu0 %v4765_v18 }
 0x5b6   :  { %v3182_v9 = vpop.f32.mrf.mxu0 }
 0x5b7   :  { %v1576_v4 = vadd.f32 %v3182_v9, %v2812_v29 }
 0x5b8   :  { %v1567_v41 = vpop.f32.mrf.mxu0 }
 0x5b9   :  { %v1568_v17 = vadd.f32 %v2812_v29, %v1567_v41  ;;  %v1632_v2 = vmax.f32 %v1576_v4, 0.0 }
 0x5ba   :  { %v3183_v10 = vpop.f32.mrf.mxu0 }
 0x5bb   :  { %v1579_v23 = vadd.f32 %v3183_v10, %v2812_v29  ;;  %v1630_v6 = vmax.f32 %v1568_v17, 0.0 }
 0x5bc   :  { %v1570_v39 = vpop.f32.mrf.mxu0 }
 0x5bd   :  { %v1571_v59 = vadd.f32 %v2812_v29, %v1570_v39  ;;  %v1633_v27 = vmax.f32 %v1579_v23, 0.0 }
 0x5bf   :  { %v1631_v47 = vmax.f32 %v1571_v59, 0.0  ;;  %v1647_v57 = vpack.c.bf16 %v1633_v27, %v1632_v2  ;;  %v3465_v2 = vld [vmem:[%s4724_s1 + $0xf0] ss:$52 sps:$4 sm:$0xff]  }
 0x5c0   :  { %1964 = vmatprep.subr.bf16.mxu0 %v3465_v2 }
 0x5c1   :  { %v1646_v15 = vpack.c.bf16 %v1631_v47, %v1630_v6  ;;  %v3186_v5 = vpop.f32.mrf.mxu0 }
 0x5c2   :  { %v1592_v37 = vadd.f32 %v3186_v5, %v2812_v29  ;;  %v3466_v5 = vld [vmem:[%s4724_s1 + $0x84] ss:$52 sps:$4 sm:$0xff]  }
 0x5c3   :  { %v1583_v19 = vpop.f32.mrf.mxu0  ;;  %3212 = vmatprep.mubr.bf16.mxu1 %v1646_v15  ;;  %v3463_v15 = vld [vmem:[%s4724_s1 + $0xec] ss:$52 sps:$4 sm:$0xff]  }
 0x5c4   :  { %3213 = vmatmul.mubr.bf16.vlgmr.msra.gmra.mxu1 %v1647_v57  ;;  %v1584_v1 = vadd.f32 %v2812_v29, %v1583_v19  ;;  %v1636_v28 = vmax.f32 %v1592_v37, 0.0  ;;  %1965 = vmatpush1.bf16.msra.mxu0 %v3463_v15  ;;  %v3471_v57 = vld [vmem:[%s4724_s1 + $0x20] ss:$52 sps:$4 sm:$0xff]   ;;  %v3469_v19 = vld [vmem:[%s4724_s1 + $0x1c] ss:$52 sps:$4 sm:$0xff]  }
 0x5c5   :  { %v3187_v0 = vpop.f32.mrf.mxu0 }
 0x5c6   :  { %v1595_v7 = vadd.f32 %v3187_v0, %v2812_v29  ;;  %v1634_v25 = vmax.f32 %v1584_v1, 0.0 }
 0x5c7   :  { %v1586_v24 = vpop.f32.mrf.mxu0 }
 0x5c8   :  { %v1587_v31 = vadd.f32 %v2812_v29, %v1586_v24  ;;  %v1637_v26 = vmax.f32 %v1595_v7, 0.0  ;;  %v4396_v7 = vld [vmem:[%s4726_s2 + $0x6] ss:$0 sm:$0xff] }
 0x5ca   :  { %v1635_v16 = vmax.f32 %v1587_v31, 0.0  ;;  %v1649_v32 = vpack.c.bf16 %v1637_v26, %v1636_v28 }
 0x5cc   :  { %v1648_v30 = vpack.c.bf16 %v1635_v16, %v1634_v25 }
 0x5ce   :  { %3216 = vmatprep.mubr.bf16.mxu1 %v1648_v30 }
 0x5cf   :  { %3217 = vmatmul.mubr.bf16.gmra.mxu1 %v1649_v32 }
 0x5da   :  { %v3190_v55 = vpop.f32.mrf.mxu0 }
 0x5db   :  { %v1608_v49 = vadd.f32 %v3190_v55, %v2812_v29 }
 0x5dc   :  { %v1599_v43 = vpop.f32.mrf.mxu0 }
 0x5dd   :  { %v1600_v3 = vadd.f32 %v2812_v29, %v1599_v43  ;;  %v1640_v62 = vmax.f32 %v1608_v49, 0.0 }
 0x5de   :  { %v3191_v11 = vpop.f32.mrf.mxu0 }
 0x5df   :  { %v1611_v45 = vadd.f32 %v3191_v11, %v2812_v29  ;;  %v1638_v46 = vmax.f32 %v1600_v3, 0.0 }
 0x5e0   :  { %v1602_v63 = vpop.f32.mrf.mxu0 }
 0x5e1   :  { %v1603_v50 = vadd.f32 %v2812_v29, %v1602_v63  ;;  %v1641_v58 = vmax.f32 %v1611_v45, 0.0 }
 0x5e2   :  { %v3194_v33 = vpop.f32.mrf.mxu0 }
 0x5e3   :  { %v1639_v34 = vmax.f32 %v1603_v50, 0.0  ;;  %v1651_v61 = vpack.c.bf16 %v1641_v58, %v1640_v62  ;;  %v1624_v10 = vadd.f32 %v3194_v33, %v2812_v29 }
 0x5e4   :  { %v1615_v48 = vpop.f32.mrf.mxu0 }
 0x5e5   :  { %v1650_v44 = vpack.c.bf16 %v1639_v34, %v1638_v46  ;;  %v1616_v9 = vadd.f32 %v2812_v29, %v1615_v48  ;;  %v1644_v27 = vmax.f32 %v1624_v10, 0.0 }
 0x5e6   :  { %v3195_v56 = vpop.f32.mrf.mxu0 }
 0x5e7   :  { %v1627_v41 = vadd.f32 %v3195_v56, %v2812_v29  ;;  %3220 = vmatprep.mubr.bf16.mxu1 %v1650_v44  ;;  %v1642_v39 = vmax.f32 %v1616_v9, 0.0 }
 0x5e8   :  { %v1618_v17 = vpop.f32.mrf.mxu0  ;;  %3221 = vmatmul.mubr.bf16.gmra.mxu1 %v1651_v61 }
 0x5e9   :  { %v1619_v23 = vadd.f32 %v2812_v29, %v1618_v17  ;;  %v1645_v4 = vmax.f32 %v1627_v41, 0.0  ;;  %v3468_v29 = vld [vmem:[%s4724_s1 + $0x88] ss:$52 sps:$4 sm:$0xff]  }
 0x5ea   :  { %1966 = vmatprep.subr.bf16.mxu0 %v3468_v29 }
 0x5eb   :  { %v1643_v59 = vmax.f32 %v1619_v23, 0.0  ;;  %v1653_v47 = vpack.c.bf16 %v1645_v4, %v1644_v27  ;;  %1967 = vmatpush1.bf16.msra.mxu0 %v3466_v5 }
 0x5ec   :  { %1968 = vmatprep.subr.bf16.mxu0 %v3471_v57 }
 0x5ed   :  { %v1652_v6 = vpack.c.bf16 %v1643_v59, %v1642_v39 }
 0x5ef   :  { %3224 = vmatprep.mubr.bf16.mxu1 %v1652_v6  ;;  %1969 = vmatpush1.bf16.msra.mxu0 %v3469_v19  ;;  %v3577_v19 = vmov 0.0  }
 0x5f0   :  { %3225 = vmatmul.mubr.bf16.gmra.mxu1 %v1653_v47  ;;  %3228 = vmatprep.subr.bf16.mxu1 %v3577_v19 }
 0x5f1   :  { %3252 = vmatprep.subr.bf16.mxu0 %v3577_v19  ;;  %3236 = vmatprep.mubr.msk.bf16.mxu1 %vm3578_vm2, %v3577_v19 }
 0x684   :  { %v3214_v0 = vpop.f32.mrf.mxu1 }
 0x685   :  { %v1768_v55 = vadd.f32 %v3214_v0, %v4396_v7 }
 0x686   :  { %v1759_v1 = vpop.f32.mrf.mxu1 }
 0x687   :  { %v1760_v24 = vadd.f32 %v4396_v7, %v1759_v1  ;;  %v1824_v45 = vadd.f32 %v1768_v55, %v4266_v36 }
 0x688   :  { %v3215_v37 = vpop.f32.mrf.mxu1 }
 0x689   :  { %v1822_v25 = vadd.f32 %v1760_v24, %v4258_v54  ;;  %v1771_v28 = vadd.f32 %v3215_v37, %v4396_v7 }
 0x68a   :  { %v1762_v31 = vpop.f32.mrf.mxu1 }
 0x68b   :  { %v1763_v26 = vadd.f32 %v4396_v7, %v1762_v31  ;;  %v1825_v11 = vadd.f32 %v1771_v28, %v4254_v22 }
 0x68d   :  { %v1823_v16 = vadd.f32 %v1763_v26, %v4262_v21  ;;  %v1839_v63 = vpack.c.bf16 %v1825_v11, %v1824_v45 }
 0x68f   :  { %v1838_v30 = vpack.c.bf16 %v1823_v16, %v1822_v25  ;;  %v3218_v32 = vpop.f32.mrf.mxu1 }
 0x690   :  { %v1784_v22 = vadd.f32 %v3218_v32, %v4396_v7 }
 0x691   :  { %v1775_v43 = vpop.f32.mrf.mxu1  ;;  %1987 = vmatmul.mubr.bf16.vlgmr.msra.gmra.mxu0 %v1838_v30 }
 0x692   :  { %1996 = vmatprep.mubr.bf16.mxu0 %v4765_v18  ;;  %v1776_v21 = vadd.f32 %v4396_v7, %v1775_v43  ;;  %v1828_v34 = vadd.f32 %v1784_v22, %v4286_v51 }
 0x693   :  { %v3219_v3 = vpop.f32.mrf.mxu1 }
 0x694   :  { %v1826_v58 = vadd.f32 %v1776_v21, %v4278_v12  ;;  %v1787_v33 = vadd.f32 %v3219_v3, %v4396_v7  ;;  %v4767_v3 = vsub.s32 0, %v3889_v13 }
 0x695   :  { %v1778_v49 = vpop.f32.mrf.mxu1 }
 0x696   :  { %v1779_v54 = vadd.f32 %v4396_v7, %v1778_v49  ;;  %v1829_v36 = vadd.f32 %v1787_v33, %v4274_v42 }
 0x698   :  { %v1827_v50 = vadd.f32 %v1779_v54, %v4282_v8  ;;  %v1841_v62 = vpack.c.bf16 %v1829_v36, %v1828_v34 }
 0x699   :  { %1997 = vmatmul.mubr.bf16.gmra.mxu0 %v1839_v63 }
 0x69a   :  { %2006 = vmatprep.mubr.bf16.mxu0 %v4765_v18  ;;  %v1840_v46 = vpack.c.bf16 %v1827_v50, %v1826_v58 }
 0x6a1   :  { %2007 = vmatmul.mubr.bf16.gmra.mxu0 %v1840_v46 }
 0x6a2   :  { %2016 = vmatprep.mubr.bf16.mxu0 %v4765_v18 }
 0x6a8   :  { %v3222_v48 = vpop.f32.mrf.mxu1 }
 0x6a9   :  { %2017 = vmatmul.mubr.bf16.gmra.mxu0 %v1841_v62  ;;  %v1800_v4 = vadd.f32 %v3222_v48, %v4396_v7 }
 0x6aa   :  { %v1791_v44 = vpop.f32.mrf.mxu1  ;;  %2026 = vmatprep.mubr.bf16.mxu0 %v4765_v18 }
 0x6ab   :  { %v1792_v12 = vadd.f32 %v4396_v7, %v1791_v44  ;;  %v1832_v27 = vadd.f32 %v1800_v4, %v4306_v38 }
 0x6ac   :  { %v3223_v8 = vpop.f32.mrf.mxu1 }
 0x6ad   :  { %v1830_v41 = vadd.f32 %v1792_v12, %v4298_v40  ;;  %v1803_v51 = vadd.f32 %v3223_v8, %v4396_v7 }
 0x6ae   :  { %v1794_v61 = vpop.f32.mrf.mxu1 }
 0x6af   :  { %v1795_v56 = vadd.f32 %v4396_v7, %v1794_v61  ;;  %v1833_v39 = vadd.f32 %v1803_v51, %v4294_v52 }
 0x6b0   :  { %v3226_v9 = vpop.f32.mrf.mxu1 }
 0x6b1   :  { %v1831_v10 = vadd.f32 %v1795_v56, %v4302_v14  ;;  %v1843_v40 = vpack.c.bf16 %v1833_v39, %v1832_v27  ;;  %v1816_v52 = vadd.f32 %v3226_v9, %v4396_v7 }
 0x6b2   :  { %v1807_v42 = vpop.f32.mrf.mxu1 }
 0x6b3   :  { %v1842_v17 = vpack.c.bf16 %v1831_v10, %v1830_v41  ;;  %v1808_v14 = vadd.f32 %v4396_v7, %v1807_v42  ;;  %v1836_v5 = vadd.f32 %v1816_v52, %v4326_v60  ;;  %v4766_v60 = vsub.s32 1, %v3889_v13 }
 0x6b4   :  { %v3227_v23 = vpop.f32.mrf.mxu1 }
 0x6b5   :  { %2027 = vmatmul.mubr.bf16.gmra.mxu0 %v1842_v17  ;;  %v1834_v2 = vadd.f32 %v1808_v14, %v4318_v20  ;;  %v1819_v15 = vadd.f32 %v3227_v23, %v4396_v7  ;;  %v34_v14 = vld [vmem:[%s4727_s3 + $0x10] sm:$0xff] }
 0x6b6   :  { %2036 = vmatprep.mubr.bf16.mxu0 %v4765_v18  ;;  %v1810_v59 = vpop.f32.mrf.mxu1  ;;  %v35_v52 = vpack.c.bf16 %v34_v14, %v34_v14  ;;  %v3480_v14 = vld [vmem:[%s4724_s1 + $0x300] ss:$52 sps:$4 sm:$0xff]  }
 0x6b7   :  { %v1811_v6 = vadd.f32 %v4396_v7, %v1810_v59  ;;  %v1837_v38 = vadd.f32 %v1819_v15, %v4314_v35  ;;  %v1862_v35 = vld [vmem:[%s4726_s2 + $0x7] sm:$0x3] }
 0x6b8   :  { %v4464_v45 = vrot.slane %v1862_v35, %v4767_v3 }
 0x6b9   :  { %v1835_v47 = vadd.f32 %v1811_v6, %v4322_v53  ;;  %v1845_v57 = vpack.c.bf16 %v1837_v38, %v1836_v5 }
 0x6bb   :  { %v1844_v29 = vpack.c.bf16 %v1835_v47, %v1834_v2 }
 0x6bd   :  { %2037 = vmatmul.mubr.bf16.gmra.mxu0 %v1843_v40 }
 0x6be   :  { %2046 = vmatprep.mubr.bf16.mxu0 %v4765_v18 }
 0x6c5   :  { %2047 = vmatmul.mubr.bf16.gmra.mxu0 %v1844_v29 }
 0x6c6   :  { %2056 = vmatprep.mubr.bf16.mxu0 %v4765_v18  ;;  %v4448_v18 = vrot.slane %v1862_v35, %v4766_v60 }
 0x6cd   :  { %2057 = vmatmul.mubr.bf16.gmra.mxu0 %v1845_v57 }
 0x6ce   :  { %3260 = vmatprep.mubr.msk.bf16.mxu0 %vm3578_vm2, %v3577_v19 }
 0x751   :  { %v1988_v20 = vpop.f32.mrf.mxu0 }
 0x752   :  { %v1989_v4 = vadd.f32 %v1988_v20, %v4464_v45 }
 0x753   :  { %v1990_v53 = vpop.f32.mrf.mxu0 }
 0x754   :  { %v4451_v7 = vadd.f32 %v1990_v53, %v4448_v18 }
 0x755   :  { %v1992_v0 = vpop.f32.mrf.mxu0 }
 0x756   :  { %v1993_v51 = vadd.f32 %v1992_v0, %v4464_v45 }
 0x757   :  { %v1994_v1 = vpop.f32.mrf.mxu0 }
 0x758   :  { %v4454_v37 = vadd.f32 %v1994_v1, %v4448_v18  ;;  %v2067_v27 = vpack.c.bf16 %v1993_v51, %v1989_v4 }
 0x759   :  { %v1998_v24 = vpop.f32.mrf.mxu0 }
 0x75a   :  { %v2071_v31 = vpack.c.bf16 %v4454_v37, %v4451_v7  ;;  %v1999_v12 = vadd.f32 %v1998_v24, %v4464_v45 }
 0x75b   :  { %v4458_v26 = vpop.f32.mrf.mxu0 }
 0x75d   :  { %v2002_v25 = vpop.f32.mrf.mxu0 }
 0x75e   :  { %v2003_v48 = vadd.f32 %v2002_v25, %v4464_v45 }
 0x75f   :  { %v4460_v16 = vpop.f32.mrf.mxu0 }
 0x760   :  { %v2068_v9 = vpack.c.bf16 %v2003_v48, %v1999_v12 }
 0x761   :  { %v2008_v28 = vpop.f32.mrf.mxu0 }
 0x762   :  { %v2009_v46 = vadd.f32 %v2008_v28, %v4464_v45  ;;  %v2005_v28 = vadd.f32 %v4460_v16, %v4448_v18 }
 0x763   :  { %v2010_v30 = vpop.f32.mrf.mxu0 }
 0x764   :  { %v2011_v0 = vadd.f32 %v2010_v30, %v4448_v18  ;;  %v2001_v30 = vadd.f32 %v4458_v26, %v4448_v18 }
 0x765   :  { %v2012_v32 = vpop.f32.mrf.mxu0 }
 0x766   :  { %v2013_v58 = vadd.f32 %v2012_v32, %v4464_v45  ;;  %v2072_v3 = vpack.c.bf16 %v2005_v28, %v2001_v30  ;;  %v3486_v30 = vld [vmem:[%s4724_s1 + $0x90] ss:$52 sps:$4 sm:$0xff]  }
 0x767   :  { %v2014_v55 = vpop.f32.mrf.mxu0 }
 0x768   :  { %v2069_v13 = vpack.c.bf16 %v2013_v58, %v2009_v46  ;;  %v2015_v20 = vadd.f32 %v2014_v55, %v4448_v18 }
 0x769   :  { %v2018_v43 = vpop.f32.mrf.mxu0 }
 0x76a   :  { %v2019_v54 = vadd.f32 %v2018_v43, %v4464_v45  ;;  %v2073_v32 = vpack.c.bf16 %v2015_v20, %v2011_v0 }
 0x76b   :  { %v2020_v11 = vpop.f32.mrf.mxu0 }
 0x76c   :  { %v2021_v38 = vadd.f32 %v2020_v11, %v4448_v18 }
 0x76d   :  { %v2022_v49 = vpop.f32.mrf.mxu0 }
 0x76e   :  { %v2023_v63 = vadd.f32 %v2022_v49, %v4464_v45 }
 0x76f   :  { %v2024_v50 = vpop.f32.mrf.mxu0 }
 0x770   :  { %v2070_v21 = vpack.c.bf16 %v2023_v63, %v2019_v54  ;;  %v2025_v2 = vadd.f32 %v2024_v50, %v4448_v18 }
 0x772   :  { %3229 = vmatpush3.bf16.xpose.msra.mxu1 %v2070_v21  ;;  %v2074_v35 = vpack.c.bf16 %v2025_v2, %v2021_v38  ;;  %v3482_v2 = vld [vmem:[%s4724_s1 + $0x230] ss:$52 sps:$4 sm:$0xff]  }
 0x773   :  { %3230 = vmatprep.subr.bf16.mxu1 %v3577_v19 }
 0x775   :  { %v4470_v33 = vpop.f32.mrf.mxu0 }
 0x776   :  { %v2029_v7 = vadd.f32 %v4470_v33, %v4464_v45 }
 0x777   :  { %v2030_v22 = vpop.f32.mrf.mxu0 }
 0x778   :  { %v4474_v36 = vadd.f32 %v2030_v22, %v4448_v18 }
 0x779   :  { %v4476_v34 = vpop.f32.mrf.mxu0 }
 0x77a   :  { %3231 = vmatpush3.bf16.xpose.msra.mxu1 %v2069_v13  ;;  %v2033_v21 = vadd.f32 %v4476_v34, %v4464_v45 }
 0x77b   :  { %v2034_v62 = vpop.f32.mrf.mxu0  ;;  %3232 = vmatprep.subr.bf16.mxu1 %v3577_v19 }
 0x77c   :  { %v4481_v44 = vadd.f32 %v2034_v62, %v4448_v18  ;;  %v2170_v37 = vpack.c.bf16 %v2033_v21, %v2029_v7 }
 0x77d   :  { %v4483_v8 = vpop.f32.mrf.mxu0 }
 0x77e   :  { %v2174_v61 = vpack.c.bf16 %v4481_v44, %v4474_v36  ;;  %v2039_v26 = vadd.f32 %v4483_v8, %v4464_v45  ;;  %v3472_v36 = vld [vmem:[%s4724_s1 + $0x2fc] ss:$52 sps:$4 sm:$0xff]   ;;  %v3473_v44 = vld [vmem:[%s4724_s1 + $0x294] ss:$52 sps:$4 sm:$0xff]  }
 0x77f   :  { %v2040_v56 = vpop.f32.mrf.mxu0 }
 0x780   :  { %v4489_v41 = vadd.f32 %v2040_v56, %v4448_v18 }
 0x781   :  { %v2042_v10 = vpop.f32.mrf.mxu0 }
 0x782   :  { %3233 = vmatpush3.bf16.xpose.msra.mxu1 %v2068_v9 }
 0x783   :  { %v2044_v42 = vpop.f32.mrf.mxu0  ;;  %3234 = vmatprep.subr.bf16.mxu1 %v3577_v19 }
 0x784   :  { %v4494_v17 = vadd.f32 %v2044_v42, %v4448_v18 }
 0x785   :  { %v2048_v23 = vpop.f32.mrf.mxu0 }
 0x786   :  { %v2175_v39 = vpack.c.bf16 %v4494_v17, %v4489_v41  ;;  %v2049_v16 = vadd.f32 %v2048_v23, %v4464_v45  ;;  %v3475_v41 = vld [vmem:[%s4724_s1 + $0x1c4] ss:$52 sps:$4 sm:$0xff]   ;;  %v3476_v17 = vld [vmem:[%s4724_s1 + $0x15c] ss:$52 sps:$4 sm:$0xff]  }
 0x787   :  { %v2050_v59 = vpop.f32.mrf.mxu0 }
 0x788   :  { %v4500_v6 = vadd.f32 %v2050_v59, %v4448_v18 }
 0x789   :  { %v2052_v40 = vpop.f32.mrf.mxu0 }
 0x78a   :  { %3235 = vmatpush3.bf16.xpose.msra.mxu1 %v2067_v27  ;;  %v2053_v49 = vadd.f32 %v2052_v40, %v4464_v45  ;;  %v3479_v40 = vld [vmem:[%s4724_s1 + $0x24] ss:$52 sps:$4 sm:$0xff]  }
 0x78b   :  { %v2054_v47 = vpop.f32.mrf.mxu0  ;;  %3240 = vmatprep.subr.bf16.mxu1 %v3577_v19 }
 0x78c   :  { %v4508_v15 = vadd.f32 %v2054_v47, %v4448_v18  ;;  %v2172_v54 = vpack.c.bf16 %v2053_v49, %v2049_v16  ;;  %v3481_v47 = vld [vmem:[%s4724_s1 + $0x298] ss:$52 sps:$4 sm:$0xff]   ;;  %v3489_v49 = vld [vmem:[%s4724_s1 + $0x29c] ss:$52 sps:$4 sm:$0xff]   ;;  %v3490_v16 = vld [vmem:[%s4724_s1 + $0x234] ss:$52 sps:$4 sm:$0xff]  }
 0x78d   :  { %v2058_v29 = vpop.f32.mrf.mxu0 }
 0x78e   :  { %v2176_v5 = vpack.c.bf16 %v4508_v15, %v4500_v6  ;;  %v2059_v1 = vadd.f32 %v2058_v29, %v4464_v45  ;;  %v3478_v6 = vld [vmem:[%s4724_s1 + $0x8c] ss:$52 sps:$4 sm:$0xff]   ;;  %v3483_v15 = vld [vmem:[%s4724_s1 + $0x1c8] ss:$52 sps:$4 sm:$0xff]  }
 0x78f   :  { %v2060_v57 = vpop.f32.mrf.mxu0  ;;  %v3484_v29 = vld [vmem:[%s4724_s1 + $0x160] ss:$52 sps:$4 sm:$0xff]  }
 0x790   :  { %v4515_v53 = vadd.f32 %v2060_v57, %v4448_v18 }
 0x791   :  { %v2062_v60 = vpop.f32.mrf.mxu0  ;;  %3237 = vmatmul.mubr.bf16.vlgmr.msra.gmra.mxu1 %v35_v52 }
 0x792   :  { %v2063_v24 = vadd.f32 %v2062_v60, %v4464_v45  ;;  %3241 = vmatpush3.bf16.msra.mxu1 %v2074_v35  ;;  %3248 = vmatprep.mubr.msk.bf16.mxu1 %vm3578_vm2, %v3577_v19 }
 0x793   :  { %v2064_v25 = vpop.f32.mrf.mxu0  ;;  %3242 = vmatprep.subr.bf16.mxu1 %v3577_v19 }
 0x794   :  { %v2173_v55 = vpack.c.bf16 %v2063_v24, %v2059_v1  ;;  %v2065_v43 = vadd.f32 %v2064_v25, %v4448_v18  ;;  %v2043_v18 = vadd.f32 %v2042_v10, %v4464_v45 }
 0x796   :  { %v2177_v11 = vpack.c.bf16 %v2065_v43, %v4515_v53  ;;  %3253 = vmatpush3.bf16.xpose.msra.mxu0 %v2173_v55  ;;  %3243 = vmatpush3.bf16.msra.mxu1 %v2073_v32  ;;  %v2171_v63 = vpack.c.bf16 %v2043_v18, %v2039_v26  ;;  %v3485_v43 = vld [vmem:[%s4724_s1 + $0xf8] ss:$52 sps:$4 sm:$0xff]   ;;  %v2848_v26 = vld [vmem:[%s4726_s2 + $0x9] ss:$0 sm:$0xff] }
 0x797   :  { %3244 = vmatprep.subr.bf16.mxu1 %v3577_v19  ;;  %3254 = vmatprep.subr.bf16.mxu0 %v3577_v19  ;;  %v3492_v18 = vld [vmem:[%s4724_s1 + $0x164] ss:$52 sps:$4 sm:$0xff]  }
 0x79a   :  { %3245 = vmatpush3.bf16.msra.mxu1 %v2072_v3  ;;  %v3488_v3 = vld [vmem:[%s4724_s1 + $0x304] ss:$52 sps:$4 sm:$0xff]  }
 0x79b   :  { %3246 = vmatprep.subr.bf16.mxu1 %v3577_v19 }
 0x79e   :  { %3255 = vmatpush3.bf16.xpose.msra.mxu0 %v2172_v54  ;;  %3247 = vmatpush3.bf16.msra.mxu1 %v2071_v31  ;;  %v3491_v54 = vld [vmem:[%s4724_s1 + $0x1cc] ss:$52 sps:$4 sm:$0xff]  }
 0x79f   :  { %3256 = vmatprep.subr.bf16.mxu0 %v3577_v19  ;;  %3264 = vmatprep.subr.bf16.mxu1 %v3577_v19 }
 0x7a6   :  { %3257 = vmatpush3.bf16.xpose.msra.mxu0 %v2171_v63 }
 0x7a7   :  { %3258 = vmatprep.subr.bf16.mxu0 %v3577_v19 }
 0x7ae   :  { %3259 = vmatpush3.bf16.xpose.msra.mxu0 %v2170_v37  ;;  %v36_v37 = vld [vmem:[%s4727_s3 + $0x18] sm:$0xff] }
 0x7af   :  { %3296 = vmatprep.subr.bf16.mxu0 %v3577_v19 }
 0x7b5   :  { %3261 = vmatmul.mubr.bf16.vlgmr.msra.gmra.mxu0 %v35_v52 }
 0x7b6   :  { %3312 = vmatprep.mubr.msk.bf16.mxu0 %vm3578_vm2, %v3577_v19  ;;  %3297 = vmatpush3.bf16.msra.mxu0 %v3480_v14 }
 0x7b7   :  { %3298 = vmatprep.subr.bf16.mxu0 %v3577_v19 }
 0x7ba   :  { %3299 = vmatpush3.bf16.msra.mxu0 %v3481_v47 }
 0x7bb   :  { %3300 = vmatprep.subr.bf16.mxu0 %v3577_v19 }
 0x7be   :  { %3301 = vmatpush3.bf16.msra.mxu0 %v3482_v2 }
 0x7bf   :  { %3302 = vmatprep.subr.bf16.mxu0 %v3577_v19 }
 0x7c2   :  { %3303 = vmatpush3.bf16.msra.mxu0 %v3483_v15 }
 0x7c3   :  { %3304 = vmatprep.subr.bf16.mxu0 %v3577_v19 }
 0x7c6   :  { %3305 = vmatpush3.bf16.msra.mxu0 %v3484_v29 }
 0x7c7   :  { %3306 = vmatprep.subr.bf16.mxu0 %v3577_v19 }
 0x7ca   :  { %3307 = vmatpush3.bf16.msra.mxu0 %v3485_v43 }
 0x7cb   :  { %3308 = vmatprep.subr.bf16.mxu0 %v3577_v19 }
 0x7ce   :  { %3309 = vmatpush3.bf16.msra.mxu0 %v3486_v30 }
 0x7cf   :  { %3310 = vmatprep.subr.bf16.mxu0 %v3577_v19 }
 0x851   :  { %v2109_v31 = vpop.f32.mrf.mxu1 }
 0x852   :  { %v2115_v50 = vsel %vm830_vm1, %v2109_v31, -inf }
 0x853   :  { %2116 = vmax.xlane.f32.xlu0 %v2115_v50  ;;  %v3238_v58 = vpop.f32.mrf.mxu1 }
 0x855   :  { %v2112_v46 = vpop.f32.mrf.mxu1 }
 0x857   :  { %v3239_v22 = vpop.f32.mrf.mxu1 }
 0x875   :  { %v2212_v13 = vpop.f32.mrf.mxu0 }
 0x876   :  { %v2218_v34 = vsel %vm830_vm1, %v2212_v13, -inf }
 0x877   :  { %2219 = vmax.xlane.f32.xlu1 %v2218_v34  ;;  %v3262_v45 = vpop.f32.mrf.mxu0  ;;  %v3493_v34 = vld [vmem:[%s4724_s1 + $0xfc] ss:$52 sps:$4 sm:$0xff]  }
 0x878   :  { %v3494_v45 = vld [vmem:[%s4724_s1 + $0x94] ss:$52 sps:$4 sm:$0xff]  }
 0x879   :  { %v2215_v33 = vpop.f32.mrf.mxu0 }
 0x87a   :  { %v3495_v33 = vld [vmem:[%s4724_s1 + $0x2c] ss:$52 sps:$4 sm:$0xff]  }
 0x87b   :  { %v3263_v62 = vpop.f32.mrf.mxu0 }
 0x87c   :  { %v3496_v62 = vld [vmem:[%s4724_s1 + $0x308] ss:$52 sps:$4 sm:$0xff]  }
 0x8dc   :  { %v2117_v48 = vpop.xlane.xlu0 %2116 }
 0x8dd   :  { %v2118_v8 = vsub.f32 %v2109_v31, %v2117_v48  ;;  %v3497_v48 = vld [vmem:[%s4724_s1 + $0x2a0] ss:$52 sps:$4 sm:$0xff]  }
 0x8df   :  { %v2119_v12 = vmul.f32 1.442695, %v2118_v8  ;;  %v3498_v8 = vld [vmem:[%s4724_s1 + $0x238] ss:$52 sps:$4 sm:$0xff]  }
 0x8e1   :  { %3568 = vpow2.f32 %v2119_v12  ;;  %v3499_v12 = vld [vmem:[%s4724_s1 + $0x1d0] ss:$52 sps:$4 sm:$0xff]  }
 0x8ee   :  { %v3569_v56 = vpop.eup %3568 }
 0x8ef   :  { %v2121_v9 = vsel %vm830_vm1, %v3569_v56, 0.0  ;;  %v2124_v10 = vpack.c.bf16 %v3569_v56, %v3569_v56  ;;  %v3500_v56 = vld [vmem:[%s4724_s1 + $0x168] ss:$52 sps:$4 sm:$0xff]  }
 0x8f0   :  { %2122 = vadd.xlane.f32.xlu0 %v2121_v9  ;;  %v2857_v9 = vld [vmem:[%s4726_s2 + $0xa] ss:$0 sm:$0xff] }
 0x8f1   :  { %3249 = vmatmul.mubr.msk.bf16.vlgmr.msra.gmra.mxu1 %vm830_vm1, %v2124_v10 }
 0x8f2   :  { %3265 = vmatpush3.bf16.msra.mxu1 %v2177_v11  ;;  %3272 = vmatprep.mubr.msk.bf16.mxu1 %vm3578_vm2, %v3577_v19  ;;  %v3487_v11 = vld [vmem:[%s4724_s1 + $0x28] ss:$52 sps:$4 sm:$0xff]  }
 0x8f3   :  { %3266 = vmatprep.subr.bf16.mxu1 %v3577_v19  ;;  %3311 = vmatpush3.bf16.msra.mxu0 %v3487_v11 }
 0x8f4   :  { %3336 = vmatprep.subr.bf16.mxu0 %v3577_v19 }
 0x8f6   :  { %3267 = vmatpush3.bf16.msra.mxu1 %v2176_v5 }
 0x8f7   :  { %3268 = vmatprep.subr.bf16.mxu1 %v3577_v19 }
 0x8fa   :  { %3269 = vmatpush3.bf16.msra.mxu1 %v2175_v39  ;;  %v3477_v39 = vld [vmem:[%s4724_s1 + $0xf4] ss:$52 sps:$4 sm:$0xff]  }
 0x8fb   :  { %3270 = vmatprep.subr.bf16.mxu1 %v3577_v19 }
 0x8fe   :  { %3271 = vmatpush3.bf16.msra.mxu1 %v2174_v61  ;;  %v3474_v61 = vld [vmem:[%s4724_s1 + $0x22c] ss:$52 sps:$4 sm:$0xff]  }
 0x8ff   :  { %3276 = vmatprep.subr.bf16.mxu1 %v3577_v19 }
 0x900   :  { %v2220_v42 = vpop.xlane.xlu1 %2219 }
 0x901   :  { %v2221_v51 = vsub.f32 %v2212_v13, %v2220_v42 }
 0x903   :  { %v2222_v23 = vmul.f32 1.442695, %v2221_v51 }
 0x905   :  { %3570 = vpow2.f32 %v2222_v23 }
 0x912   :  { %v3571_v4 = vpop.eup %3570 }
 0x913   :  { %v2224_v59 = vsel %vm830_vm1, %v3571_v4, 0.0  ;;  %v2227_v27 = vpack.c.bf16 %v3571_v4, %v3571_v4 }
 0x914   :  { %2225 = vadd.xlane.f32.xlu1 %v2224_v59 }
 0x915   :  { %3273 = vmatmul.mubr.msk.bf16.vlgmr.msra.gmra.mxu1 %vm830_vm1, %v2227_v27 }
 0x916   :  { %3292 = vmatprep.mubr.msk.bf16.mxu1 %vm3578_vm2, %v3577_v19  ;;  %3277 = vmatpush3.bf16.msra.mxu1 %v3472_v36 }
 0x917   :  { %3278 = vmatprep.subr.bf16.mxu1 %v3577_v19 }
 0x91a   :  { %3279 = vmatpush3.bf16.msra.mxu1 %v3473_v44 }
 0x91b   :  { %3280 = vmatprep.subr.bf16.mxu1 %v3577_v19 }
 0x91e   :  { %3281 = vmatpush3.bf16.msra.mxu1 %v3474_v61  ;;  %v3501_v61 = vld [vmem:[%s4724_s1 + $0x100] ss:$52 sps:$4 sm:$0xff]  }
 0x91f   :  { %3282 = vmatprep.subr.bf16.mxu1 %v3577_v19 }
 0x922   :  { %3283 = vmatpush3.bf16.msra.mxu1 %v3475_v41  ;;  %v3502_v41 = vld [vmem:[%s4724_s1 + $0x98] ss:$52 sps:$4 sm:$0xff]  }
 0x923   :  { %3284 = vmatprep.subr.bf16.mxu1 %v3577_v19 }
 0x926   :  { %3285 = vmatpush3.bf16.msra.mxu1 %v3476_v17  ;;  %v3503_v17 = vld [vmem:[%s4724_s1 + $0x30] ss:$52 sps:$4 sm:$0xff]  }
 0x927   :  { %3286 = vmatprep.subr.bf16.mxu1 %v3577_v19 }
 0x92a   :  { %3287 = vmatpush3.bf16.msra.mxu1 %v3477_v39  ;;  %v2866_v39 = vld [vmem:[%s4726_s2 + $0xb] ss:$0 sm:$0xff] }
 0x92b   :  { %3288 = vmatprep.subr.bf16.mxu1 %v3577_v19 }
 0x92e   :  { %3289 = vmatpush3.bf16.msra.mxu1 %v3478_v6 }
 0x92f   :  { %3290 = vmatprep.subr.bf16.mxu1 %v3577_v19 }
 0x932   :  { %3291 = vmatpush3.bf16.msra.mxu1 %v3479_v40 }
 0x933   :  { %3316 = vmatprep.subr.bf16.mxu1 %v3577_v19 }
 0x979   :  { %v2123_v20 = vpop.xlane.xlu0 %2122 }
 0x97a   :  { %3572 = vrcp.f32 %v2123_v20 }
 0x987   :  { %v3573_v53 = vpop.eup %3572 }
 0x99d   :  { %v2226_v35 = vpop.xlane.xlu1 %2225 }
 0x99e   :  { %3574 = vrcp.f32 %v2226_v35 }
 0x9ab   :  { %v3575_v60 = vpop.eup %3574 }
 0x9b1   :  { %v2162_v52 = vpop.f32.mrf.mxu1 }
 0x9b2   :  { %v2169_v1 = vmul.f32 %v3573_v53, %v2162_v52 }
 0x9b3   :  { %v3250_v38 = vpop.f32.mrf.mxu1 }
 0x9b5   :  { %v2165_v5 = vpop.f32.mrf.mxu1 }
 0x9b7   :  { %v3251_v57 = vpop.f32.mrf.mxu1 }
 0x9d5   :  { %v2265_v0 = vpop.f32.mrf.mxu1 }
 0x9d6   :  { %v2272_v24 = vmul.f32 %v3575_v60, %v2265_v0 }
 0x9d7   :  { %v3274_v25 = vpop.f32.mrf.mxu1 }
 0x9d8   :  { %v2273_v28 = vpack.c.bf16 %v2272_v24, %v2169_v1 }
 0x9d9   :  { %v2268_v32 = vpop.f32.mrf.mxu1 }
 0x9da   :  { %3293 = vmatmul.mubr.bf16.vlgmr.msra.gmra.mxu1 %v2273_v28 }
 0x9db   :  { %v3275_v55 = vpop.f32.mrf.mxu1  ;;  %3332 = vmatprep.mubr.msk.bf16.mxu1 %vm3578_vm2, %v3577_v19  ;;  %3317 = vmatpush3.bf16.msra.mxu1 %v3488_v3 }
 0x9dc   :  { %3318 = vmatprep.subr.bf16.mxu1 %v3577_v19 }
 0x9df   :  { %3319 = vmatpush3.bf16.msra.mxu1 %v3489_v49 }
 0x9e0   :  { %3320 = vmatprep.subr.bf16.mxu1 %v3577_v19 }
 0x9e3   :  { %3321 = vmatpush3.bf16.msra.mxu1 %v3490_v16 }
 0x9e4   :  { %3322 = vmatprep.subr.bf16.mxu1 %v3577_v19 }
 0x9e7   :  { %3323 = vmatpush3.bf16.msra.mxu1 %v3491_v54 }
 0x9e8   :  { %3324 = vmatprep.subr.bf16.mxu1 %v3577_v19 }
 0x9eb   :  { %3325 = vmatpush3.bf16.msra.mxu1 %v3492_v18 }
 0x9ec   :  { %3326 = vmatprep.subr.bf16.mxu1 %v3577_v19 }
 0x9ef   :  { %3327 = vmatpush3.bf16.msra.mxu1 %v3493_v34 }
 0x9f0   :  { %3328 = vmatprep.subr.bf16.mxu1 %v3577_v19 }
 0x9f3   :  { %3329 = vmatpush3.bf16.msra.mxu1 %v3494_v45 }
 0x9f4   :  { %3330 = vmatprep.subr.bf16.mxu1 %v3577_v19 }
 0x9f7   :  { %3331 = vmatpush3.bf16.msra.mxu1 %v3495_v33 }
 0xa9a   :  { %v2379_v63 = vpop.f32.mrf.mxu1 }
 0xa9b   :  { %v2380_v7 = vadd.f32 %v2848_v26, %v2379_v63 }
 0xa9c   :  { %v3294_v21 = vpop.f32.mrf.mxu1 }
 0xa9d   :  { %v2386_v46 = vadd.f32 %v2380_v7, %v36_v37 }
 0xa9e   :  { %v2382_v31 = vpop.f32.mrf.mxu1 }
 0xa9f   :  { %v2383_v50 = vadd.f32 %v2848_v26, %v2382_v31 }
 0xaa0   :  { %v3295_v58 = vpop.f32.mrf.mxu1 }
 0xaa1   :  { %v2387_v22 = vadd.f32 %v2383_v50, %v36_v37 }
 0xaa3   :  { %v2388_v13 = vpack.c.bf16 %v2387_v22, %v2386_v46 }
 0xaa5   :  { %3313 = vmatmul.mubr.bf16.vlgmr.msra.gmra.mxu0 %v2388_v13 }
 0xaa6   :  { %3352 = vmatprep.mubr.msk.bf16.mxu0 %vm3578_vm2, %v3577_v19  ;;  %3337 = vmatpush3.bf16.msra.mxu0 %v3496_v62 }
 0xaa7   :  { %3338 = vmatprep.subr.bf16.mxu0 %v3577_v19 }
 0xaaa   :  { %3339 = vmatpush3.bf16.msra.mxu0 %v3497_v48 }
 0xaab   :  { %3340 = vmatprep.subr.bf16.mxu0 %v3577_v19 }
 0xaae   :  { %3341 = vmatpush3.bf16.msra.mxu0 %v3498_v8 }
 0xaaf   :  { %3342 = vmatprep.subr.bf16.mxu0 %v3577_v19 }
 0xab2   :  { %3343 = vmatpush3.bf16.msra.mxu0 %v3499_v12 }
 0xab3   :  { %3344 = vmatprep.subr.bf16.mxu0 %v3577_v19 }
 0xab6   :  { %3345 = vmatpush3.bf16.msra.mxu0 %v3500_v56 }
 0xab7   :  { %3346 = vmatprep.subr.bf16.mxu0 %v3577_v19 }
 0xaba   :  { %3347 = vmatpush3.bf16.msra.mxu0 %v3501_v61 }
 0xabb   :  { %3348 = vmatprep.subr.bf16.mxu0 %v3577_v19 }
 0xabe   :  { %3349 = vmatpush3.bf16.msra.mxu0 %v3502_v41 }
 0xabf   :  { %3350 = vmatprep.subr.bf16.mxu0 %v3577_v19  ;;  %v2875_v19 = vld [vmem:[%s4726_s2 + $0xc] ss:$0 sm:$0xff] }
 0xac2   :  { %3351 = vmatpush3.bf16.msra.mxu0 %v3503_v17 }
 0xb65   :  { %v2494_v10 = vpop.f32.mrf.mxu0 }
 0xb66   :  { %v2495_v51 = vadd.f32 %v2857_v9, %v2494_v10 }
 0xb67   :  { %v3314_v42 = vpop.f32.mrf.mxu0 }
 0xb68   :  { %v2501_v27 = vmax.f32 %v2495_v51, 0.0 }
 0xb69   :  { %v2497_v23 = vpop.f32.mrf.mxu0 }
 0xb6a   :  { %v2498_v4 = vadd.f32 %v2857_v9, %v2497_v23 }
 0xb6b   :  { %v3315_v59 = vpop.f32.mrf.mxu0 }
 0xb6c   :  { %v2502_v36 = vmax.f32 %v2498_v4, 0.0 }
 0xb6e   :  { %v2503_v44 = vpack.c.bf16 %v2502_v36, %v2501_v27 }
 0xb70   :  { %3333 = vmatmul.mubr.bf16.vlgmr.msra.gmra.mxu1 %v2503_v44 }
 0xc30   :  { %v2609_v6 = vpop.f32.mrf.mxu1 }
 0xc31   :  { %v2610_v14 = vadd.f32 %v2866_v39, %v2609_v6 }
 0xc32   :  { %v3334_v40 = vpop.f32.mrf.mxu1 }
 0xc33   :  { %v2616_v29 = vadd.f32 %v2610_v14, %v2386_v46 }
 0xc34   :  { %v2612_v47 = vpop.f32.mrf.mxu1 }
 0xc35   :  { %v2613_v2 = vadd.f32 %v2866_v39, %v2612_v47 }
 0xc36   :  { %v3335_v15 = vpop.f32.mrf.mxu1 }
 0xc37   :  { %v2617_v52 = vadd.f32 %v2613_v2, %v2387_v22 }
 0xc39   :  { %v2618_v38 = vpack.c.bf16 %v2617_v52, %v2616_v29 }
 0xc3b   :  { %3353 = vmatmul.mubr.bf16.vlgmr.msra.gmra.mxu0 %v2618_v38 }
 0xcfb   :  { %v2724_v5 = vpop.f32.mrf.mxu0 }
 0xcfc   :  { %v2725_v57 = vadd.f32 %v2875_v19, %v2724_v5 }
 0xcfd   :  { %v3354_v20 = vpop.f32.mrf.mxu0 }
 0xcfe   :  { %2731 = vst [vmem:[%s4728_s4] sm:$0xff] %v2725_v57 }
 0xcff   :  { %v2727_v35 = vpop.f32.mrf.mxu0 }
 0xd00   :  { %v2728_v53 = vadd.f32 %v2875_v19, %v2727_v35 }
 0xd01   :  { %v3355_v60 = vpop.f32.mrf.mxu0 }
 0xd02   :  { %2732 = vst [vmem:[%s4728_s4 + $0x8] sm:$0xff] %v2728_v53 }

</bundles_post_ra>
